<compile_context>
chip_gen: v7x
topology: tpu7x:2x2x1
jax: 0.10.0
libtpu: 0.0.40
codegen_flags: <defaults>
</compile_context>

<pallas_src>
import functools
import math

import jax
import jax.numpy as jnp
from jax.experimental import pallas as pl
from jax.experimental.pallas import tpu as pltpu

# ----------------------------- config ---------------------------------------
VOCAB = 128
HIDDEN = 64
N_LAYERS = 2
N_HEADS = 4
HEAD_DIM = HIDDEN // N_HEADS
INTERMEDIATE = 256
MAX_POS = 32
TYPE_VOCAB = 2
NUM_CLASSES = 2
LN_EPS = 1e-12
LOGIT_PAD = 128  # lane-dense classifier output width (sliced to NUM_CLASSES outside)


# --------------------------- in-kernel helpers --------------------------------
def _layernorm(x, g, b):
    mu = jnp.mean(x, axis=-1, keepdims=True)
    xc = x - mu
    var = jnp.mean(xc * xc, axis=-1, keepdims=True)
    return xc * jax.lax.rsqrt(var + LN_EPS) * g + b


def _erf(x):
    # fp32-accurate rational approximation of erf (Abramowitz & Stegun 7.1.26,
    # |abs err| < 1.5e-7 ~ fp32 eps), built from VPU/EUP-friendly primitives.
    a1, a2, a3, a4, a5 = (0.254829592, -0.284496736, 1.421413741,
                          -1.453152027, 1.061405429)
    p = 0.3275911
    ax = jnp.abs(x)
    t = pl.reciprocal(1.0 + p * ax, approx=False)          # EUP, not VPU divide
    poly = ((((a5 * t + a4) * t + a3) * t + a2) * t + a1) * t
    y = 1.0 - poly * jnp.exp(-ax * ax)
    return jnp.where(x >= 0.0, y, -y)


def _gelu_exact(x):
    # erf-based GELU, matching HF BERT's non-approximate "gelu" activation.
    return 0.5 * x * (1.0 + _erf(x * (1.0 / math.sqrt(2.0))))


# ------------------------- fused forward kernel -------------------------------
def _bert_fwd_kernel(x_ref, m_ref, eg_ref, eb_ref,
                     wqkv_ref, bqkv_ref, wo_ref, bo_ref,
                     ln1g_ref, ln1b_ref, w1_ref, b1_ref, w2_ref, b2_ref,
                     ln2g_ref, ln2b_ref,
                     pw_ref, pb_ref, cw_ref, cb_ref,
                     o_ref, *, scale):
    b = pl.program_id(0)
    mask = m_ref[b]                                        # [1, S] additive mask

    # Embedding LayerNorm (no residual); dropout(0.1) is identity at inference.
    x = _layernorm(x_ref[0], eg_ref[...], eb_ref[...])     # [S, H]
    S = x.shape[0]

    for li in range(N_LAYERS):                             # static unroll; weights VMEM-resident
        # Fused QKV projection: one lane-dense N = 3H matmul.
        qkv = jnp.dot(x, wqkv_ref[li], preferred_element_type=jnp.float32)
        qkv = qkv + bqkv_ref[li]                           # [S, 3H]

        wo_l = wo_ref[li]                                  # [H, H]
        attn = jnp.zeros((S, HIDDEN), jnp.float32)
        for h in range(N_HEADS):
            lo = h * HEAD_DIM
            # NOTE: 16-lane-wide static slices of a [S,3H] tile; acceptable at
            # these sizes (XLU has slack), revisit with a sublane-head layout
            # if this is ever scaled up.
            qh = qkv[:, lo:lo + HEAD_DIM]
            kh = qkv[:, HIDDEN + lo:HIDDEN + lo + HEAD_DIM]
            vh = qkv[:, 2 * HIDDEN + lo:2 * HIDDEN + lo + HEAD_DIM]
            # q @ k^T without materializing an XLU transpose: contract dim 1 of both.
            s = jax.lax.dot_general(
                qh, kh, (((1,), (1,)), ((), ())),
                preferred_element_type=jnp.float32) * scale + mask
            s_max = jnp.max(s, axis=-1, keepdims=True)
            p = jnp.exp(s - s_max)
            p = p * pl.reciprocal(jnp.sum(p, axis=-1, keepdims=True), approx=True)
            ctx_h = jnp.dot(p, vh, preferred_element_type=jnp.float32)   # [S, Dh]
            # Per-head accumulation into the output projection (no lane concat);
            # wo row slices at multiples of 16 are sublane-aligned.
            attn = attn + jnp.dot(ctx_h, wo_l[lo:lo + HEAD_DIM, :],
                                  preferred_element_type=jnp.float32)
        attn = attn + bo_ref[li]
        x = _layernorm(attn + x, ln1g_ref[li], ln1b_ref[li])

        # FFN: up-proj + exact-erf GELU + down-proj + residual + LayerNorm.
        hmid = jnp.dot(x, w1_ref[li], preferred_element_type=jnp.float32)
        hmid = _gelu_exact(hmid + b1_ref[li])
        ffn = jnp.dot(hmid, w2_ref[li], preferred_element_type=jnp.float32)
        ffn = ffn + b2_ref[li]
        x = _layernorm(ffn + x, ln2g_ref[li], ln2b_ref[li])

    # Pooler: tanh(W * h_[CLS] + b); classifier dropout(0.1) is identity at inference.
    cls_tok = x[0:1, :]                                    # [1, H]
    pooled = jnp.tanh(
        jnp.dot(cls_tok, pw_ref[...], preferred_element_type=jnp.float32)
        + pb_ref[...])
    o_ref[0] = (jnp.dot(pooled, cw_ref[...], preferred_element_type=jnp.float32)
                + cb_ref[...])                             # [1, LOGIT_PAD]


def bert_fused_forward(emb, mask_add, pp):
    """Full BERT encoder + pooler + classifier in one pallas_call.

    emb:      [B, S, H] summed embeddings (pre-LayerNorm)
    mask_add: [B, 1, S] additive attention mask (0 or -1e9)
    returns logits [B, NUM_CLASSES].
    """
    B, S, H = emb.shape

    def rep(a):  # weight replicated across the batch grid (DMA'd once)
        nd = a.ndim
        return pl.BlockSpec(a.shape, lambda b, nd=nd: (0,) * nd)

    weights = (
        pp["emb_ln_g"], pp["emb_ln_b"],
        pp["wqkv"], pp["bqkv"], pp["wo"], pp["bo"],
        pp["ln1_g"], pp["ln1_b"],
        pp["w1"], pp["b1"], pp["w2"], pp["b2"],
        pp["ln2_g"], pp["ln2_b"],
        pp["pool_w"], pp["pool_b"], pp["cls_w_pad"], pp["cls_b_pad"],
    )
    out = pl.pallas_call(
        functools.partial(_bert_fwd_kernel, scale=1.0 / math.sqrt(HEAD_DIM)),
        out_shape=jax.ShapeDtypeStruct((B, 1, LOGIT_PAD), jnp.float32),
        grid=(B,),
        in_specs=[
            pl.BlockSpec((1, S, H), lambda b: (b, 0, 0)),   # per-example activations
            rep(mask_add),                                  # mask resident for all B
        ] + [rep(a) for a in weights],
        out_specs=pl.BlockSpec((1, 1, LOGIT_PAD), lambda b: (b, 0, 0)),
        compiler_params=pltpu.CompilerParams(
            dimension_semantics=("parallel",)),             # one example per TC on v7x
    )(emb, mask_add, *weights)
    return out[:, 0, :NUM_CLASSES]


# --------------------------- model (glue) ------------------------------------
def forward(pp, input_ids, attention_mask=None, labels=None):
    B, S = input_ids.shape
    if attention_mask is None:
        attention_mask = jnp.ones((B, S), jnp.float32)
    mask_add = ((1.0 - attention_mask.astype(jnp.float32)) * -1e9).reshape(B, 1, S)

    # Embeddings (word + position + token-type 0); dropout is identity at inference.
    # TODO(synk): embedding-table gather stays in plain JAX (jnp.take); a
    # scalar-prefetch gather kernel is not worth it at these sizes.
    we = jnp.take(pp["word_emb"], input_ids, axis=0)        # [B, S, H]
    pe = pp["pos_emb"][:S][None, :, :]                      # [1, S, H]
    te = pp["tok_emb"][0][None, None, :]                    # token_type_ids = 0
    emb = we + pe + te

    logits = bert_fused_forward(emb, mask_add, pp)

    loss = None
    if labels is not None:
        lse = jax.nn.logsumexp(logits, axis=-1)
        picked = jnp.take_along_axis(logits, labels[:, None], axis=-1)[:, 0]
        loss = jnp.mean(lse - picked)  # nn.CrossEntropyLoss (mean reduction)
    return loss, logits


# ------------------------- deterministic params ------------------------------
def init_params(key):
    keys = iter(jax.random.split(key, 64))

    def w(shape):
        return jax.random.normal(next(keys), shape, dtype=jnp.float32) * 0.02

    def zeros(*shape):
        return jnp.zeros(shape, jnp.float32)

    def ones(*shape):
        return jnp.ones(shape, jnp.float32)

    p = {
        "word_emb": w((VOCAB, HIDDEN)),
        "pos_emb": w((MAX_POS, HIDDEN)),
        "tok_emb": w((TYPE_VOCAB, HIDDEN)),
        "emb_ln_g": ones(HIDDEN),
        "emb_ln_b": zeros(HIDDEN),
        "pool_w": w((HIDDEN, HIDDEN)),
        "pool_b": zeros(HIDDEN),
        "cls_w": w((HIDDEN, NUM_CLASSES)),
        "cls_b": zeros(NUM_CLASSES),
    }
    for li in range(N_LAYERS):
        wq, wk, wv = w((HIDDEN, HIDDEN)), w((HIDDEN, HIDDEN)), w((HIDDEN, HIDDEN))
        p[f"l{li}_wqkv"] = jnp.concatenate([wq, wk, wv], axis=1)   # [H, 3H]
        p[f"l{li}_bqkv"] = zeros(3 * HIDDEN)
        p[f"l{li}_wo"] = w((HIDDEN, HIDDEN)); p[f"l{li}_bo"] = zeros(HIDDEN)
        p[f"l{li}_ln1_g"] = ones(HIDDEN); p[f"l{li}_ln1_b"] = zeros(HIDDEN)
        p[f"l{li}_w1"] = w((HIDDEN, INTERMEDIATE)); p[f"l{li}_b1"] = zeros(INTERMEDIATE)
        p[f"l{li}_w2"] = w((INTERMEDIATE, HIDDEN)); p[f"l{li}_b2"] = zeros(HIDDEN)
        p[f"l{li}_ln2_g"] = ones(HIDDEN); p[f"l{li}_ln2_b"] = zeros(HIDDEN)
    return p


def pack_params(p):
    """One-time packing: stack per-layer weights on a [N_LAYERS, ...] axis,
    pre-reshape 1-D biases/LN params to (·, 1, H)/(1, H), and pad the
    classifier to 128 lanes — so no reshape/pad ops run per forward."""
    L, H, I = N_LAYERS, HIDDEN, INTERMEDIATE

    def stack(name):
        return jnp.stack([p[f"l{li}_{name}"] for li in range(L)], axis=0)

    return {
        "word_emb": p["word_emb"],
        "pos_emb": p["pos_emb"],
        "tok_emb": p["tok_emb"],
        "emb_ln_g": p["emb_ln_g"].reshape(1, H),
        "emb_ln_b": p["emb_ln_b"].reshape(1, H),
        "wqkv": stack("wqkv"),                               # [L, H, 3H]
        "bqkv": stack("bqkv").reshape(L, 1, 3 * H),
        "wo": stack("wo"),                                   # [L, H, H]
        "bo": stack("bo").reshape(L, 1, H),
        "ln1_g": stack("ln1_g").reshape(L, 1, H),
        "ln1_b": stack("ln1_b").reshape(L, 1, H),
        "w1": stack("w1"),                                   # [L, H, I]
        "b1": stack("b1").reshape(L, 1, I),
        "w2": stack("w2"),                                   # [L, I, H]
        "b2": stack("b2").reshape(L, 1, H),
        "ln2_g": stack("ln2_g").reshape(L, 1, H),
        "ln2_b": stack("ln2_b").reshape(L, 1, H),
        "pool_w": p["pool_w"],
        "pool_b": p["pool_b"].reshape(1, H),
        "cls_w_pad": jnp.pad(p["cls_w"], ((0, 0), (0, LOGIT_PAD - NUM_CLASSES))),
        "cls_b_pad": jnp.pad(p["cls_b"],
                             (0, LOGIT_PAD - NUM_CLASSES)).reshape(1, LOGIT_PAD),
    }


# --------------------------------- main --------------------------------------
if __name__ == "__main__":
    key = jax.random.PRNGKey(0)
    pkey, ikey = jax.random.split(key)
    params = init_params(pkey)
    packed = jax.tree_util.tree_map(jax.block_until_ready, pack_params(params))

    B, S = 2, 16
    input_ids = jax.random.randint(ikey, (B, S), 0, VOCAB, dtype=jnp.int32)
    attention_mask = jnp.ones((B, S), dtype=jnp.int32)
    labels = jnp.array([0, 1], dtype=jnp.int32)

    fwd = jax.jit(forward)
    loss, logits = fwd(packed, input_ids, attention_mask, labels)
    jax.block_until_ready((loss, logits))
    assert logits.shape == (B, NUM_CLASSES)
    assert loss.shape == ()
    print("KERNEL_OK")
</pallas_src>

<mosaic_0001>
module attributes {stable_mosaic.version = 11 : i64} {
  func.func @_bert_fwd_kernel(%arg0: i32, %arg1: memref<1x16x64xf32, #tpu.memory_space<vmem>>, %arg2: memref<2x1x16xf32, #tpu.memory_space<vmem>>, %arg3: memref<1x64xf32, #tpu.memory_space<vmem>>, %arg4: memref<1x64xf32, #tpu.memory_space<vmem>>, %arg5: memref<2x64x192xf32, #tpu.memory_space<vmem>>, %arg6: memref<2x1x192xf32, #tpu.memory_space<vmem>>, %arg7: memref<2x64x64xf32, #tpu.memory_space<vmem>>, %arg8: memref<2x1x64xf32, #tpu.memory_space<vmem>>, %arg9: memref<2x1x64xf32, #tpu.memory_space<vmem>>, %arg10: memref<2x1x64xf32, #tpu.memory_space<vmem>>, %arg11: memref<2x64x256xf32, #tpu.memory_space<vmem>>, %arg12: memref<2x1x256xf32, #tpu.memory_space<vmem>>, %arg13: memref<2x256x64xf32, #tpu.memory_space<vmem>>, %arg14: memref<2x1x64xf32, #tpu.memory_space<vmem>>, %arg15: memref<2x1x64xf32, #tpu.memory_space<vmem>>, %arg16: memref<2x1x64xf32, #tpu.memory_space<vmem>>, %arg17: memref<64x64xf32, #tpu.memory_space<vmem>>, %arg18: memref<1x64xf32, #tpu.memory_space<vmem>>, %arg19: memref<64x128xf32, #tpu.memory_space<vmem>>, %arg20: memref<1x128xf32, #tpu.memory_space<vmem>>, %arg21: memref<1x1x128xf32, #tpu.memory_space<vmem>>) attributes {dimension_semantics = [#tpu.dimension_semantics<parallel>], iteration_bounds = array<i64: 2>, scalar_prefetch = 0 : i64, scratch_operands = 0 : i64, tpu.core_type = #tpu.core_type<tc>, window_params = [{transform_indices = @transform_0, window_bounds = array<i64: 1, 16, 64>}, {pipeline_mode = #tpu.pipeline_mode<synchronous>, transform_indices = @transform_1, window_bounds = array<i64: 2, 1, 16>}, {pipeline_mode = #tpu.pipeline_mode<synchronous>, transform_indices = @transform_2, window_bounds = array<i64: 1, 64>}, {pipeline_mode = #tpu.pipeline_mode<synchronous>, transform_indices = @transform_3, window_bounds = array<i64: 1, 64>}, {pipeline_mode = #tpu.pipeline_mode<synchronous>, transform_indices = @transform_4, window_bounds = array<i64: 2, 64, 192>}, {pipeline_mode = #tpu.pipeline_mode<synchronous>, transform_indices = @transform_5, window_bounds = array<i64: 2, 1, 192>}, {pipeline_mode = #tpu.pipeline_mode<synchronous>, transform_indices = @transform_6, window_bounds = array<i64: 2, 64, 64>}, {pipeline_mode = #tpu.pipeline_mode<synchronous>, transform_indices = @transform_7, window_bounds = array<i64: 2, 1, 64>}, {pipeline_mode = #tpu.pipeline_mode<synchronous>, transform_indices = @transform_8, window_bounds = array<i64: 2, 1, 64>}, {pipeline_mode = #tpu.pipeline_mode<synchronous>, transform_indices = @transform_9, window_bounds = array<i64: 2, 1, 64>}, {pipeline_mode = #tpu.pipeline_mode<synchronous>, transform_indices = @transform_10, window_bounds = array<i64: 2, 64, 256>}, {pipeline_mode = #tpu.pipeline_mode<synchronous>, transform_indices = @transform_11, window_bounds = array<i64: 2, 1, 256>}, {pipeline_mode = #tpu.pipeline_mode<synchronous>, transform_indices = @transform_12, window_bounds = array<i64: 2, 256, 64>}, {pipeline_mode = #tpu.pipeline_mode<synchronous>, transform_indices = @transform_13, window_bounds = array<i64: 2, 1, 64>}, {pipeline_mode = #tpu.pipeline_mode<synchronous>, transform_indices = @transform_14, window_bounds = array<i64: 2, 1, 64>}, {pipeline_mode = #tpu.pipeline_mode<synchronous>, transform_indices = @transform_15, window_bounds = array<i64: 2, 1, 64>}, {pipeline_mode = #tpu.pipeline_mode<synchronous>, transform_indices = @transform_16, window_bounds = array<i64: 64, 64>}, {pipeline_mode = #tpu.pipeline_mode<synchronous>, transform_indices = @transform_17, window_bounds = array<i64: 1, 64>}, {pipeline_mode = #tpu.pipeline_mode<synchronous>, transform_indices = @transform_18, window_bounds = array<i64: 64, 128>}, {pipeline_mode = #tpu.pipeline_mode<synchronous>, transform_indices = @transform_19, window_bounds = array<i64: 1, 128>}, {transform_indices = @transform_20, window_bounds = array<i64: 1, 1, 128>}]} {
    %0 = arith.index_cast %arg0 : i32 to index
    %c0 = arith.constant 0 : index
    %c0_0 = arith.constant 0 : index
    %1 = vector.load %arg2[%0, %c0, %c0_0] : memref<2x1x16xf32, #tpu.memory_space<vmem>>, vector<1x1x16xf32>
    %2 = vector.shape_cast %1 : vector<1x1x16xf32> to vector<1x16xf32>
    %c0_1 = arith.constant 0 : index
    %c0_2 = arith.constant 0 : index
    %c0_3 = arith.constant 0 : index
    %3 = vector.load %arg1[%c0_1, %c0_2, %c0_3] : memref<1x16x64xf32, #tpu.memory_space<vmem>>, vector<1x16x64xf32>
    %4 = vector.shape_cast %3 : vector<1x16x64xf32> to vector<16x64xf32>
    %c0_4 = arith.constant 0 : index
    %c0_5 = arith.constant 0 : index
    %5 = vector.load %arg3[%c0_4, %c0_5] : memref<1x64xf32, #tpu.memory_space<vmem>>, vector<1x64xf32>
    %c0_6 = arith.constant 0 : index
    %c0_7 = arith.constant 0 : index
    %6 = vector.load %arg4[%c0_6, %c0_7] : memref<1x64xf32, #tpu.memory_space<vmem>>, vector<1x64xf32>
    %cst = arith.constant dense<0.000000e+00> : vector<16xf32>
    %7 = vector.multi_reduction <add>, %4, %cst [1] : vector<16x64xf32> to vector<16xf32>
    %8 = vector.shape_cast %7 : vector<16xf32> to vector<16x1xf32>
    %cst_8 = arith.constant 6.400000e+01 : f32
    %9 = vector.broadcast %cst_8 : f32 to vector<16x1xf32>
    %10 = arith.divf %8, %9 : vector<16x1xf32>
    %11 = vector.broadcast %10 : vector<16x1xf32> to vector<16x64xf32>
    %12 = arith.subf %4, %11 : vector<16x64xf32>
    %13 = arith.mulf %12, %12 : vector<16x64xf32>
    %cst_9 = arith.constant dense<0.000000e+00> : vector<16xf32>
    %14 = vector.multi_reduction <add>, %13, %cst_9 [1] : vector<16x64xf32> to vector<16xf32>
    %15 = vector.shape_cast %14 : vector<16xf32> to vector<16x1xf32>
    %cst_10 = arith.constant 6.400000e+01 : f32
    %16 = vector.broadcast %cst_10 : f32 to vector<16x1xf32>
    %17 = arith.divf %15, %16 : vector<16x1xf32>
    %cst_11 = arith.constant 9.99999996E-13 : f32
    %18 = vector.broadcast %cst_11 : f32 to vector<16x1xf32>
    %19 = arith.addf %17, %18 : vector<16x1xf32>
    %20 = math.rsqrt %19 : vector<16x1xf32>
    %21 = vector.broadcast %20 : vector<16x1xf32> to vector<16x64xf32>
    %22 = arith.mulf %12, %21 : vector<16x64xf32>
    %23 = vector.broadcast %5 : vector<1x64xf32> to vector<16x64xf32>
    %24 = arith.mulf %22, %23 : vector<16x64xf32>
    %25 = vector.broadcast %6 : vector<1x64xf32> to vector<16x64xf32>
    %26 = arith.addf %24, %25 : vector<16x64xf32>
    %c0_12 = arith.constant 0 : index
    %c0_13 = arith.constant 0 : index
    %c0_14 = arith.constant 0 : index
    %27 = vector.load %arg5[%c0_12, %c0_13, %c0_14] : memref<2x64x192xf32, #tpu.memory_space<vmem>>, vector<1x64x192xf32>
    %28 = vector.shape_cast %27 : vector<1x64x192xf32> to vector<64x192xf32>
    %cst_15 = arith.constant dense<0.000000e+00> : vector<16x192xf32>
    %29 = tpu.matmul %26, %28, %cst_15 {dimension_numbers = #tpu.dot_dimension_numbers<[1], [0], [0], [1], [0, 0, 1, 1], [], []>} : vector<16x64xf32>, vector<64x192xf32>, vector<16x192xf32> -> vector<16x192xf32>
    %c0_16 = arith.constant 0 : index
    %c0_17 = arith.constant 0 : index
    %c0_18 = arith.constant 0 : index
    %30 = vector.load %arg6[%c0_16, %c0_17, %c0_18] : memref<2x1x192xf32, #tpu.memory_space<vmem>>, vector<1x1x192xf32>
    %31 = vector.shape_cast %30 : vector<1x1x192xf32> to vector<1x192xf32>
    %32 = vector.broadcast %31 : vector<1x192xf32> to vector<16x192xf32>
    %33 = arith.addf %29, %32 : vector<16x192xf32>
    %c0_19 = arith.constant 0 : index
    %c0_20 = arith.constant 0 : index
    %c0_21 = arith.constant 0 : index
    %34 = vector.load %arg7[%c0_19, %c0_20, %c0_21] : memref<2x64x64xf32, #tpu.memory_space<vmem>>, vector<1x64x64xf32>
    %35 = vector.shape_cast %34 : vector<1x64x64xf32> to vector<64x64xf32>
    %cst_22 = arith.constant 0.000000e+00 : f32
    %36 = vector.broadcast %cst_22 : f32 to vector<16x64xf32>
    %37 = vector.extract_strided_slice %33 {offsets = [0, 0], sizes = [16, 16], strides = [1, 1]} : vector<16x192xf32> to vector<16x16xf32>
    %38 = vector.extract_strided_slice %33 {offsets = [0, 64], sizes = [16, 16], strides = [1, 1]} : vector<16x192xf32> to vector<16x16xf32>
    %39 = vector.extract_strided_slice %33 {offsets = [0, 128], sizes = [16, 16], strides = [1, 1]} : vector<16x192xf32> to vector<16x16xf32>
    %cst_23 = arith.constant dense<0.000000e+00> : vector<16x16xf32>
    %40 = tpu.matmul %37, %38, %cst_23 {dimension_numbers = #tpu.dot_dimension_numbers<[1], [1], [0], [0], [0, 0, 1, 0], [], []>} : vector<16x16xf32>, vector<16x16xf32>, vector<16x16xf32> -> vector<16x16xf32>
    %cst_24 = arith.constant 2.500000e-01 : f32
    %41 = vector.broadcast %cst_24 : f32 to vector<16x16xf32>
    %42 = arith.mulf %40, %41 : vector<16x16xf32>
    %43 = vector.broadcast %2 : vector<1x16xf32> to vector<16x16xf32>
    %44 = arith.addf %42, %43 : vector<16x16xf32>
    %cst_25 = arith.constant dense<0xFF800000> : vector<16xf32>
    %45 = vector.multi_reduction <maximumf>, %44, %cst_25 [1] : vector<16x16xf32> to vector<16xf32>
    %46 = vector.shape_cast %45 : vector<16xf32> to vector<16x1xf32>
    %47 = vector.broadcast %46 : vector<16x1xf32> to vector<16x16xf32>
    %48 = arith.subf %44, %47 : vector<16x16xf32>
    %49 = math.exp %48 : vector<16x16xf32>
    %cst_26 = arith.constant dense<0.000000e+00> : vector<16xf32>
    %50 = vector.multi_reduction <add>, %49, %cst_26 [1] : vector<16x16xf32> to vector<16xf32>
    %51 = vector.shape_cast %50 : vector<16xf32> to vector<16x1xf32>
    %52 = tpu.reciprocal %51 {approx = true} : vector<16x1xf32> -> vector<16x1xf32>
    %53 = vector.broadcast %52 : vector<16x1xf32> to vector<16x16xf32>
    %54 = arith.mulf %49, %53 : vector<16x16xf32>
    %cst_27 = arith.constant dense<0.000000e+00> : vector<16x16xf32>
    %55 = tpu.matmul %54, %39, %cst_27 {dimension_numbers = #tpu.dot_dimension_numbers<[1], [0], [0], [1], [0, 0, 1, 1], [], []>} : vector<16x16xf32>, vector<16x16xf32>, vector<16x16xf32> -> vector<16x16xf32>
    %56 = vector.extract_strided_slice %35 {offsets = [0, 0], sizes = [16, 64], strides = [1, 1]} : vector<64x64xf32> to vector<16x64xf32>
    %cst_28 = arith.constant dense<0.000000e+00> : vector<16x64xf32>
    %57 = tpu.matmul %55, %56, %cst_28 {dimension_numbers = #tpu.dot_dimension_numbers<[1], [0], [0], [1], [0, 0, 1, 1], [], []>} : vector<16x16xf32>, vector<16x64xf32>, vector<16x64xf32> -> vector<16x64xf32>
    %58 = arith.addf %36, %57 : vector<16x64xf32>
    %59 = vector.extract_strided_slice %33 {offsets = [0, 16], sizes = [16, 16], strides = [1, 1]} : vector<16x192xf32> to vector<16x16xf32>
    %60 = vector.extract_strided_slice %33 {offsets = [0, 80], sizes = [16, 16], strides = [1, 1]} : vector<16x192xf32> to vector<16x16xf32>
    %61 = vector.extract_strided_slice %33 {offsets = [0, 144], sizes = [16, 16], strides = [1, 1]} : vector<16x192xf32> to vector<16x16xf32>
    %cst_29 = arith.constant dense<0.000000e+00> : vector<16x16xf32>
    %62 = tpu.matmul %59, %60, %cst_29 {dimension_numbers = #tpu.dot_dimension_numbers<[1], [1], [0], [0], [0, 0, 1, 0], [], []>} : vector<16x16xf32>, vector<16x16xf32>, vector<16x16xf32> -> vector<16x16xf32>
    %cst_30 = arith.constant 2.500000e-01 : f32
    %63 = vector.broadcast %cst_30 : f32 to vector<16x16xf32>
    %64 = arith.mulf %62, %63 : vector<16x16xf32>
    %65 = vector.broadcast %2 : vector<1x16xf32> to vector<16x16xf32>
    %66 = arith.addf %64, %65 : vector<16x16xf32>
    %cst_31 = arith.constant dense<0xFF800000> : vector<16xf32>
    %67 = vector.multi_reduction <maximumf>, %66, %cst_31 [1] : vector<16x16xf32> to vector<16xf32>
    %68 = vector.shape_cast %67 : vector<16xf32> to vector<16x1xf32>
    %69 = vector.broadcast %68 : vector<16x1xf32> to vector<16x16xf32>
    %70 = arith.subf %66, %69 : vector<16x16xf32>
    %71 = math.exp %70 : vector<16x16xf32>
    %cst_32 = arith.constant dense<0.000000e+00> : vector<16xf32>
    %72 = vector.multi_reduction <add>, %71, %cst_32 [1] : vector<16x16xf32> to vector<16xf32>
    %73 = vector.shape_cast %72 : vector<16xf32> to vector<16x1xf32>
    %74 = tpu.reciprocal %73 {approx = true} : vector<16x1xf32> -> vector<16x1xf32>
    %75 = vector.broadcast %74 : vector<16x1xf32> to vector<16x16xf32>
    %76 = arith.mulf %71, %75 : vector<16x16xf32>
    %cst_33 = arith.constant dense<0.000000e+00> : vector<16x16xf32>
    %77 = tpu.matmul %76, %61, %cst_33 {dimension_numbers = #tpu.dot_dimension_numbers<[1], [0], [0], [1], [0, 0, 1, 1], [], []>} : vector<16x16xf32>, vector<16x16xf32>, vector<16x16xf32> -> vector<16x16xf32>
    %78 = vector.extract_strided_slice %35 {offsets = [16, 0], sizes = [16, 64], strides = [1, 1]} : vector<64x64xf32> to vector<16x64xf32>
    %cst_34 = arith.constant dense<0.000000e+00> : vector<16x64xf32>
    %79 = tpu.matmul %77, %78, %cst_34 {dimension_numbers = #tpu.dot_dimension_numbers<[1], [0], [0], [1], [0, 0, 1, 1], [], []>} : vector<16x16xf32>, vector<16x64xf32>, vector<16x64xf32> -> vector<16x64xf32>
    %80 = arith.addf %58, %79 : vector<16x64xf32>
    %81 = vector.extract_strided_slice %33 {offsets = [0, 32], sizes = [16, 16], strides = [1, 1]} : vector<16x192xf32> to vector<16x16xf32>
    %82 = vector.extract_strided_slice %33 {offsets = [0, 96], sizes = [16, 16], strides = [1, 1]} : vector<16x192xf32> to vector<16x16xf32>
    %83 = vector.extract_strided_slice %33 {offsets = [0, 160], sizes = [16, 16], strides = [1, 1]} : vector<16x192xf32> to vector<16x16xf32>
    %cst_35 = arith.constant dense<0.000000e+00> : vector<16x16xf32>
    %84 = tpu.matmul %81, %82, %cst_35 {dimension_numbers = #tpu.dot_dimension_numbers<[1], [1], [0], [0], [0, 0, 1, 0], [], []>} : vector<16x16xf32>, vector<16x16xf32>, vector<16x16xf32> -> vector<16x16xf32>
    %cst_36 = arith.constant 2.500000e-01 : f32
    %85 = vector.broadcast %cst_36 : f32 to vector<16x16xf32>
    %86 = arith.mulf %84, %85 : vector<16x16xf32>
    %87 = vector.broadcast %2 : vector<1x16xf32> to vector<16x16xf32>
    %88 = arith.addf %86, %87 : vector<16x16xf32>
    %cst_37 = arith.constant dense<0xFF800000> : vector<16xf32>
    %89 = vector.multi_reduction <maximumf>, %88, %cst_37 [1] : vector<16x16xf32> to vector<16xf32>
    %90 = vector.shape_cast %89 : vector<16xf32> to vector<16x1xf32>
    %91 = vector.broadcast %90 : vector<16x1xf32> to vector<16x16xf32>
    %92 = arith.subf %88, %91 : vector<16x16xf32>
    %93 = math.exp %92 : vector<16x16xf32>
    %cst_38 = arith.constant dense<0.000000e+00> : vector<16xf32>
    %94 = vector.multi_reduction <add>, %93, %cst_38 [1] : vector<16x16xf32> to vector<16xf32>
    %95 = vector.shape_cast %94 : vector<16xf32> to vector<16x1xf32>
    %96 = tpu.reciprocal %95 {approx = true} : vector<16x1xf32> -> vector<16x1xf32>
    %97 = vector.broadcast %96 : vector<16x1xf32> to vector<16x16xf32>
    %98 = arith.mulf %93, %97 : vector<16x16xf32>
    %cst_39 = arith.constant dense<0.000000e+00> : vector<16x16xf32>
    %99 = tpu.matmul %98, %83, %cst_39 {dimension_numbers = #tpu.dot_dimension_numbers<[1], [0], [0], [1], [0, 0, 1, 1], [], []>} : vector<16x16xf32>, vector<16x16xf32>, vector<16x16xf32> -> vector<16x16xf32>
    %100 = vector.extract_strided_slice %35 {offsets = [32, 0], sizes = [16, 64], strides = [1, 1]} : vector<64x64xf32> to vector<16x64xf32>
    %cst_40 = arith.constant dense<0.000000e+00> : vector<16x64xf32>
    %101 = tpu.matmul %99, %100, %cst_40 {dimension_numbers = #tpu.dot_dimension_numbers<[1], [0], [0], [1], [0, 0, 1, 1], [], []>} : vector<16x16xf32>, vector<16x64xf32>, vector<16x64xf32> -> vector<16x64xf32>
    %102 = arith.addf %80, %101 : vector<16x64xf32>
    %103 = vector.extract_strided_slice %33 {offsets = [0, 48], sizes = [16, 16], strides = [1, 1]} : vector<16x192xf32> to vector<16x16xf32>
    %104 = vector.extract_strided_slice %33 {offsets = [0, 112], sizes = [16, 16], strides = [1, 1]} : vector<16x192xf32> to vector<16x16xf32>
    %105 = vector.extract_strided_slice %33 {offsets = [0, 176], sizes = [16, 16], strides = [1, 1]} : vector<16x192xf32> to vector<16x16xf32>
    %cst_41 = arith.constant dense<0.000000e+00> : vector<16x16xf32>
    %106 = tpu.matmul %103, %104, %cst_41 {dimension_numbers = #tpu.dot_dimension_numbers<[1], [1], [0], [0], [0, 0, 1, 0], [], []>} : vector<16x16xf32>, vector<16x16xf32>, vector<16x16xf32> -> vector<16x16xf32>
    %cst_42 = arith.constant 2.500000e-01 : f32
    %107 = vector.broadcast %cst_42 : f32 to vector<16x16xf32>
    %108 = arith.mulf %106, %107 : vector<16x16xf32>
    %109 = vector.broadcast %2 : vector<1x16xf32> to vector<16x16xf32>
    %110 = arith.addf %108, %109 : vector<16x16xf32>
    %cst_43 = arith.constant dense<0xFF800000> : vector<16xf32>
    %111 = vector.multi_reduction <maximumf>, %110, %cst_43 [1] : vector<16x16xf32> to vector<16xf32>
    %112 = vector.shape_cast %111 : vector<16xf32> to vector<16x1xf32>
    %113 = vector.broadcast %112 : vector<16x1xf32> to vector<16x16xf32>
    %114 = arith.subf %110, %113 : vector<16x16xf32>
    %115 = math.exp %114 : vector<16x16xf32>
    %cst_44 = arith.constant dense<0.000000e+00> : vector<16xf32>
    %116 = vector.multi_reduction <add>, %115, %cst_44 [1] : vector<16x16xf32> to vector<16xf32>
    %117 = vector.shape_cast %116 : vector<16xf32> to vector<16x1xf32>
    %118 = tpu.reciprocal %117 {approx = true} : vector<16x1xf32> -> vector<16x1xf32>
    %119 = vector.broadcast %118 : vector<16x1xf32> to vector<16x16xf32>
    %120 = arith.mulf %115, %119 : vector<16x16xf32>
    %cst_45 = arith.constant dense<0.000000e+00> : vector<16x16xf32>
    %121 = tpu.matmul %120, %105, %cst_45 {dimension_numbers = #tpu.dot_dimension_numbers<[1], [0], [0], [1], [0, 0, 1, 1], [], []>} : vector<16x16xf32>, vector<16x16xf32>, vector<16x16xf32> -> vector<16x16xf32>
    %122 = vector.extract_strided_slice %35 {offsets = [48, 0], sizes = [16, 64], strides = [1, 1]} : vector<64x64xf32> to vector<16x64xf32>
    %cst_46 = arith.constant dense<0.000000e+00> : vector<16x64xf32>
    %123 = tpu.matmul %121, %122, %cst_46 {dimension_numbers = #tpu.dot_dimension_numbers<[1], [0], [0], [1], [0, 0, 1, 1], [], []>} : vector<16x16xf32>, vector<16x64xf32>, vector<16x64xf32> -> vector<16x64xf32>
    %124 = arith.addf %102, %123 : vector<16x64xf32>
    %c0_47 = arith.constant 0 : index
    %c0_48 = arith.constant 0 : index
    %c0_49 = arith.constant 0 : index
    %125 = vector.load %arg8[%c0_47, %c0_48, %c0_49] : memref<2x1x64xf32, #tpu.memory_space<vmem>>, vector<1x1x64xf32>
    %126 = vector.shape_cast %125 : vector<1x1x64xf32> to vector<1x64xf32>
    %127 = vector.broadcast %126 : vector<1x64xf32> to vector<16x64xf32>
    %128 = arith.addf %124, %127 : vector<16x64xf32>
    %129 = arith.addf %128, %26 : vector<16x64xf32>
    %c0_50 = arith.constant 0 : index
    %c0_51 = arith.constant 0 : index
    %c0_52 = arith.constant 0 : index
    %130 = vector.load %arg9[%c0_50, %c0_51, %c0_52] : memref<2x1x64xf32, #tpu.memory_space<vmem>>, vector<1x1x64xf32>
    %131 = vector.shape_cast %130 : vector<1x1x64xf32> to vector<1x64xf32>
    %c0_53 = arith.constant 0 : index
    %c0_54 = arith.constant 0 : index
    %c0_55 = arith.constant 0 : index
    %132 = vector.load %arg10[%c0_53, %c0_54, %c0_55] : memref<2x1x64xf32, #tpu.memory_space<vmem>>, vector<1x1x64xf32>
    %133 = vector.shape_cast %132 : vector<1x1x64xf32> to vector<1x64xf32>
    %cst_56 = arith.constant dense<0.000000e+00> : vector<16xf32>
    %134 = vector.multi_reduction <add>, %129, %cst_56 [1] : vector<16x64xf32> to vector<16xf32>
    %135 = vector.shape_cast %134 : vector<16xf32> to vector<16x1xf32>
    %cst_57 = arith.constant 6.400000e+01 : f32
    %136 = vector.broadcast %cst_57 : f32 to vector<16x1xf32>
    %137 = arith.divf %135, %136 : vector<16x1xf32>
    %138 = vector.broadcast %137 : vector<16x1xf32> to vector<16x64xf32>
    %139 = arith.subf %129, %138 : vector<16x64xf32>
    %140 = arith.mulf %139, %139 : vector<16x64xf32>
    %cst_58 = arith.constant dense<0.000000e+00> : vector<16xf32>
    %141 = vector.multi_reduction <add>, %140, %cst_58 [1] : vector<16x64xf32> to vector<16xf32>
    %142 = vector.shape_cast %141 : vector<16xf32> to vector<16x1xf32>
    %cst_59 = arith.constant 6.400000e+01 : f32
    %143 = vector.broadcast %cst_59 : f32 to vector<16x1xf32>
    %144 = arith.divf %142, %143 : vector<16x1xf32>
    %cst_60 = arith.constant 9.99999996E-13 : f32
    %145 = vector.broadcast %cst_60 : f32 to vector<16x1xf32>
    %146 = arith.addf %144, %145 : vector<16x1xf32>
    %147 = math.rsqrt %146 : vector<16x1xf32>
    %148 = vector.broadcast %147 : vector<16x1xf32> to vector<16x64xf32>
    %149 = arith.mulf %139, %148 : vector<16x64xf32>
    %150 = vector.broadcast %131 : vector<1x64xf32> to vector<16x64xf32>
    %151 = arith.mulf %149, %150 : vector<16x64xf32>
    %152 = vector.broadcast %133 : vector<1x64xf32> to vector<16x64xf32>
    %153 = arith.addf %151, %152 : vector<16x64xf32>
    %c0_61 = arith.constant 0 : index
    %c0_62 = arith.constant 0 : index
    %c0_63 = arith.constant 0 : index
    %154 = vector.load %arg11[%c0_61, %c0_62, %c0_63] : memref<2x64x256xf32, #tpu.memory_space<vmem>>, vector<1x64x256xf32>
    %155 = vector.shape_cast %154 : vector<1x64x256xf32> to vector<64x256xf32>
    %cst_64 = arith.constant dense<0.000000e+00> : vector<16x256xf32>
    %156 = tpu.matmul %153, %155, %cst_64 {dimension_numbers = #tpu.dot_dimension_numbers<[1], [0], [0], [1], [0, 0, 1, 1], [], []>} : vector<16x64xf32>, vector<64x256xf32>, vector<16x256xf32> -> vector<16x256xf32>
    %c0_65 = arith.constant 0 : index
    %c0_66 = arith.constant 0 : index
    %c0_67 = arith.constant 0 : index
    %157 = vector.load %arg12[%c0_65, %c0_66, %c0_67] : memref<2x1x256xf32, #tpu.memory_space<vmem>>, vector<1x1x256xf32>
    %158 = vector.shape_cast %157 : vector<1x1x256xf32> to vector<1x256xf32>
    %159 = vector.broadcast %158 : vector<1x256xf32> to vector<16x256xf32>
    %160 = arith.addf %156, %159 : vector<16x256xf32>
    %cst_68 = arith.constant 5.000000e-01 : f32
    %161 = vector.broadcast %cst_68 : f32 to vector<16x256xf32>
    %162 = arith.mulf %161, %160 : vector<16x256xf32>
    %cst_69 = arith.constant 0.707106769 : f32
    %163 = vector.broadcast %cst_69 : f32 to vector<16x256xf32>
    %164 = arith.mulf %160, %163 : vector<16x256xf32>
    %165 = math.absf %164 : vector<16x256xf32>
    %cst_70 = arith.constant 0.327591091 : f32
    %166 = vector.broadcast %cst_70 : f32 to vector<16x256xf32>
    %167 = arith.mulf %166, %165 : vector<16x256xf32>
    %cst_71 = arith.constant 1.000000e+00 : f32
    %168 = vector.broadcast %cst_71 : f32 to vector<16x256xf32>
    %169 = arith.addf %168, %167 : vector<16x256xf32>
    %170 = tpu.reciprocal %169 : vector<16x256xf32> -> vector<16x256xf32>
    %cst_72 = arith.constant 1.06140542 : f32
    %171 = vector.broadcast %cst_72 : f32 to vector<16x256xf32>
    %172 = arith.mulf %171, %170 : vector<16x256xf32>
    %cst_73 = arith.constant -1.45315206 : f32
    %173 = vector.broadcast %cst_73 : f32 to vector<16x256xf32>
    %174 = arith.addf %172, %173 : vector<16x256xf32>
    %175 = arith.mulf %174, %170 : vector<16x256xf32>
    %cst_74 = arith.constant 1.42141378 : f32
    %176 = vector.broadcast %cst_74 : f32 to vector<16x256xf32>
    %177 = arith.addf %175, %176 : vector<16x256xf32>
    %178 = arith.mulf %177, %170 : vector<16x256xf32>
    %cst_75 = arith.constant -0.284496725 : f32
    %179 = vector.broadcast %cst_75 : f32 to vector<16x256xf32>
    %180 = arith.addf %178, %179 : vector<16x256xf32>
    %181 = arith.mulf %180, %170 : vector<16x256xf32>
    %cst_76 = arith.constant 0.254829586 : f32
    %182 = vector.broadcast %cst_76 : f32 to vector<16x256xf32>
    %183 = arith.addf %181, %182 : vector<16x256xf32>
    %184 = arith.mulf %183, %170 : vector<16x256xf32>
    %cst_77 = arith.constant 0.000000e+00 : f32
    %185 = vector.broadcast %cst_77 : f32 to vector<16x256xf32>
    %186 = arith.subf %185, %165 : vector<16x256xf32>
    %187 = arith.mulf %186, %165 : vector<16x256xf32>
    %188 = math.exp %187 : vector<16x256xf32>
    %189 = arith.mulf %184, %188 : vector<16x256xf32>
    %cst_78 = arith.constant 1.000000e+00 : f32
    %190 = vector.broadcast %cst_78 : f32 to vector<16x256xf32>
    %191 = arith.subf %190, %189 : vector<16x256xf32>
    %cst_79 = arith.constant 0.000000e+00 : f32
    %192 = vector.broadcast %cst_79 : f32 to vector<16x256xf32>
    %193 = arith.cmpf oge, %164, %192 : vector<16x256xf32>
    %cst_80 = arith.constant 0.000000e+00 : f32
    %194 = vector.broadcast %cst_80 : f32 to vector<16x256xf32>
    %195 = arith.subf %194, %191 : vector<16x256xf32>
    %196 = arith.select %193, %191, %195 : vector<16x256xi1>, vector<16x256xf32>
    %cst_81 = arith.constant 1.000000e+00 : f32
    %197 = vector.broadcast %cst_81 : f32 to vector<16x256xf32>
    %198 = arith.addf %197, %196 : vector<16x256xf32>
    %199 = arith.mulf %162, %198 : vector<16x256xf32>
    %c0_82 = arith.constant 0 : index
    %c0_83 = arith.constant 0 : index
    %c0_84 = arith.constant 0 : index
    %200 = vector.load %arg13[%c0_82, %c0_83, %c0_84] : memref<2x256x64xf32, #tpu.memory_space<vmem>>, vector<1x256x64xf32>
    %201 = vector.shape_cast %200 : vector<1x256x64xf32> to vector<256x64xf32>
    %cst_85 = arith.constant dense<0.000000e+00> : vector<16x64xf32>
    %202 = tpu.matmul %199, %201, %cst_85 {dimension_numbers = #tpu.dot_dimension_numbers<[1], [0], [0], [1], [0, 0, 1, 1], [], []>} : vector<16x256xf32>, vector<256x64xf32>, vector<16x64xf32> -> vector<16x64xf32>
    %c0_86 = arith.constant 0 : index
    %c0_87 = arith.constant 0 : index
    %c0_88 = arith.constant 0 : index
    %203 = vector.load %arg14[%c0_86, %c0_87, %c0_88] : memref<2x1x64xf32, #tpu.memory_space<vmem>>, vector<1x1x64xf32>
    %204 = vector.shape_cast %203 : vector<1x1x64xf32> to vector<1x64xf32>
    %205 = vector.broadcast %204 : vector<1x64xf32> to vector<16x64xf32>
    %206 = arith.addf %202, %205 : vector<16x64xf32>
    %207 = arith.addf %206, %153 : vector<16x64xf32>
    %c0_89 = arith.constant 0 : index
    %c0_90 = arith.constant 0 : index
    %c0_91 = arith.constant 0 : index
    %208 = vector.load %arg15[%c0_89, %c0_90, %c0_91] : memref<2x1x64xf32, #tpu.memory_space<vmem>>, vector<1x1x64xf32>
    %209 = vector.shape_cast %208 : vector<1x1x64xf32> to vector<1x64xf32>
    %c0_92 = arith.constant 0 : index
    %c0_93 = arith.constant 0 : index
    %c0_94 = arith.constant 0 : index
    %210 = vector.load %arg16[%c0_92, %c0_93, %c0_94] : memref<2x1x64xf32, #tpu.memory_space<vmem>>, vector<1x1x64xf32>
    %211 = vector.shape_cast %210 : vector<1x1x64xf32> to vector<1x64xf32>
    %cst_95 = arith.constant dense<0.000000e+00> : vector<16xf32>
    %212 = vector.multi_reduction <add>, %207, %cst_95 [1] : vector<16x64xf32> to vector<16xf32>
    %213 = vector.shape_cast %212 : vector<16xf32> to vector<16x1xf32>
    %cst_96 = arith.constant 6.400000e+01 : f32
    %214 = vector.broadcast %cst_96 : f32 to vector<16x1xf32>
    %215 = arith.divf %213, %214 : vector<16x1xf32>
    %216 = vector.broadcast %215 : vector<16x1xf32> to vector<16x64xf32>
    %217 = arith.subf %207, %216 : vector<16x64xf32>
    %218 = arith.mulf %217, %217 : vector<16x64xf32>
    %cst_97 = arith.constant dense<0.000000e+00> : vector<16xf32>
    %219 = vector.multi_reduction <add>, %218, %cst_97 [1] : vector<16x64xf32> to vector<16xf32>
    %220 = vector.shape_cast %219 : vector<16xf32> to vector<16x1xf32>
    %cst_98 = arith.constant 6.400000e+01 : f32
    %221 = vector.broadcast %cst_98 : f32 to vector<16x1xf32>
    %222 = arith.divf %220, %221 : vector<16x1xf32>
    %cst_99 = arith.constant 9.99999996E-13 : f32
    %223 = vector.broadcast %cst_99 : f32 to vector<16x1xf32>
    %224 = arith.addf %222, %223 : vector<16x1xf32>
    %225 = math.rsqrt %224 : vector<16x1xf32>
    %226 = vector.broadcast %225 : vector<16x1xf32> to vector<16x64xf32>
    %227 = arith.mulf %217, %226 : vector<16x64xf32>
    %228 = vector.broadcast %209 : vector<1x64xf32> to vector<16x64xf32>
    %229 = arith.mulf %227, %228 : vector<16x64xf32>
    %230 = vector.broadcast %211 : vector<1x64xf32> to vector<16x64xf32>
    %231 = arith.addf %229, %230 : vector<16x64xf32>
    %c1 = arith.constant 1 : index
    %c0_100 = arith.constant 0 : index
    %c0_101 = arith.constant 0 : index
    %232 = vector.load %arg5[%c1, %c0_100, %c0_101] : memref<2x64x192xf32, #tpu.memory_space<vmem>>, vector<1x64x192xf32>
    %233 = vector.shape_cast %232 : vector<1x64x192xf32> to vector<64x192xf32>
    %cst_102 = arith.constant dense<0.000000e+00> : vector<16x192xf32>
    %234 = tpu.matmul %231, %233, %cst_102 {dimension_numbers = #tpu.dot_dimension_numbers<[1], [0], [0], [1], [0, 0, 1, 1], [], []>} : vector<16x64xf32>, vector<64x192xf32>, vector<16x192xf32> -> vector<16x192xf32>
    %c1_103 = arith.constant 1 : index
    %c0_104 = arith.constant 0 : index
    %c0_105 = arith.constant 0 : index
    %235 = vector.load %arg6[%c1_103, %c0_104, %c0_105] : memref<2x1x192xf32, #tpu.memory_space<vmem>>, vector<1x1x192xf32>
    %236 = vector.shape_cast %235 : vector<1x1x192xf32> to vector<1x192xf32>
    %237 = vector.broadcast %236 : vector<1x192xf32> to vector<16x192xf32>
    %238 = arith.addf %234, %237 : vector<16x192xf32>
    %c1_106 = arith.constant 1 : index
    %c0_107 = arith.constant 0 : index
    %c0_108 = arith.constant 0 : index
    %239 = vector.load %arg7[%c1_106, %c0_107, %c0_108] : memref<2x64x64xf32, #tpu.memory_space<vmem>>, vector<1x64x64xf32>
    %240 = vector.shape_cast %239 : vector<1x64x64xf32> to vector<64x64xf32>
    %cst_109 = arith.constant 0.000000e+00 : f32
    %241 = vector.broadcast %cst_109 : f32 to vector<16x64xf32>
    %242 = vector.extract_strided_slice %238 {offsets = [0, 0], sizes = [16, 16], strides = [1, 1]} : vector<16x192xf32> to vector<16x16xf32>
    %243 = vector.extract_strided_slice %238 {offsets = [0, 64], sizes = [16, 16], strides = [1, 1]} : vector<16x192xf32> to vector<16x16xf32>
    %244 = vector.extract_strided_slice %238 {offsets = [0, 128], sizes = [16, 16], strides = [1, 1]} : vector<16x192xf32> to vector<16x16xf32>
    %cst_110 = arith.constant dense<0.000000e+00> : vector<16x16xf32>
    %245 = tpu.matmul %242, %243, %cst_110 {dimension_numbers = #tpu.dot_dimension_numbers<[1], [1], [0], [0], [0, 0, 1, 0], [], []>} : vector<16x16xf32>, vector<16x16xf32>, vector<16x16xf32> -> vector<16x16xf32>
    %cst_111 = arith.constant 2.500000e-01 : f32
    %246 = vector.broadcast %cst_111 : f32 to vector<16x16xf32>
    %247 = arith.mulf %245, %246 : vector<16x16xf32>
    %248 = vector.broadcast %2 : vector<1x16xf32> to vector<16x16xf32>
    %249 = arith.addf %247, %248 : vector<16x16xf32>
    %cst_112 = arith.constant dense<0xFF800000> : vector<16xf32>
    %250 = vector.multi_reduction <maximumf>, %249, %cst_112 [1] : vector<16x16xf32> to vector<16xf32>
    %251 = vector.shape_cast %250 : vector<16xf32> to vector<16x1xf32>
    %252 = vector.broadcast %251 : vector<16x1xf32> to vector<16x16xf32>
    %253 = arith.subf %249, %252 : vector<16x16xf32>
    %254 = math.exp %253 : vector<16x16xf32>
    %cst_113 = arith.constant dense<0.000000e+00> : vector<16xf32>
    %255 = vector.multi_reduction <add>, %254, %cst_113 [1] : vector<16x16xf32> to vector<16xf32>
    %256 = vector.shape_cast %255 : vector<16xf32> to vector<16x1xf32>
    %257 = tpu.reciprocal %256 {approx = true} : vector<16x1xf32> -> vector<16x1xf32>
    %258 = vector.broadcast %257 : vector<16x1xf32> to vector<16x16xf32>
    %259 = arith.mulf %254, %258 : vector<16x16xf32>
    %cst_114 = arith.constant dense<0.000000e+00> : vector<16x16xf32>
    %260 = tpu.matmul %259, %244, %cst_114 {dimension_numbers = #tpu.dot_dimension_numbers<[1], [0], [0], [1], [0, 0, 1, 1], [], []>} : vector<16x16xf32>, vector<16x16xf32>, vector<16x16xf32> -> vector<16x16xf32>
    %261 = vector.extract_strided_slice %240 {offsets = [0, 0], sizes = [16, 64], strides = [1, 1]} : vector<64x64xf32> to vector<16x64xf32>
    %cst_115 = arith.constant dense<0.000000e+00> : vector<16x64xf32>
    %262 = tpu.matmul %260, %261, %cst_115 {dimension_numbers = #tpu.dot_dimension_numbers<[1], [0], [0], [1], [0, 0, 1, 1], [], []>} : vector<16x16xf32>, vector<16x64xf32>, vector<16x64xf32> -> vector<16x64xf32>
    %263 = arith.addf %241, %262 : vector<16x64xf32>
    %264 = vector.extract_strided_slice %238 {offsets = [0, 16], sizes = [16, 16], strides = [1, 1]} : vector<16x192xf32> to vector<16x16xf32>
    %265 = vector.extract_strided_slice %238 {offsets = [0, 80], sizes = [16, 16], strides = [1, 1]} : vector<16x192xf32> to vector<16x16xf32>
    %266 = vector.extract_strided_slice %238 {offsets = [0, 144], sizes = [16, 16], strides = [1, 1]} : vector<16x192xf32> to vector<16x16xf32>
    %cst_116 = arith.constant dense<0.000000e+00> : vector<16x16xf32>
    %267 = tpu.matmul %264, %265, %cst_116 {dimension_numbers = #tpu.dot_dimension_numbers<[1], [1], [0], [0], [0, 0, 1, 0], [], []>} : vector<16x16xf32>, vector<16x16xf32>, vector<16x16xf32> -> vector<16x16xf32>
    %cst_117 = arith.constant 2.500000e-01 : f32
    %268 = vector.broadcast %cst_117 : f32 to vector<16x16xf32>
    %269 = arith.mulf %267, %268 : vector<16x16xf32>
    %270 = vector.broadcast %2 : vector<1x16xf32> to vector<16x16xf32>
    %271 = arith.addf %269, %270 : vector<16x16xf32>
    %cst_118 = arith.constant dense<0xFF800000> : vector<16xf32>
    %272 = vector.multi_reduction <maximumf>, %271, %cst_118 [1] : vector<16x16xf32> to vector<16xf32>
    %273 = vector.shape_cast %272 : vector<16xf32> to vector<16x1xf32>
    %274 = vector.broadcast %273 : vector<16x1xf32> to vector<16x16xf32>
    %275 = arith.subf %271, %274 : vector<16x16xf32>
    %276 = math.exp %275 : vector<16x16xf32>
    %cst_119 = arith.constant dense<0.000000e+00> : vector<16xf32>
    %277 = vector.multi_reduction <add>, %276, %cst_119 [1] : vector<16x16xf32> to vector<16xf32>
    %278 = vector.shape_cast %277 : vector<16xf32> to vector<16x1xf32>
    %279 = tpu.reciprocal %278 {approx = true} : vector<16x1xf32> -> vector<16x1xf32>
    %280 = vector.broadcast %279 : vector<16x1xf32> to vector<16x16xf32>
    %281 = arith.mulf %276, %280 : vector<16x16xf32>
    %cst_120 = arith.constant dense<0.000000e+00> : vector<16x16xf32>
    %282 = tpu.matmul %281, %266, %cst_120 {dimension_numbers = #tpu.dot_dimension_numbers<[1], [0], [0], [1], [0, 0, 1, 1], [], []>} : vector<16x16xf32>, vector<16x16xf32>, vector<16x16xf32> -> vector<16x16xf32>
    %283 = vector.extract_strided_slice %240 {offsets = [16, 0], sizes = [16, 64], strides = [1, 1]} : vector<64x64xf32> to vector<16x64xf32>
    %cst_121 = arith.constant dense<0.000000e+00> : vector<16x64xf32>
    %284 = tpu.matmul %282, %283, %cst_121 {dimension_numbers = #tpu.dot_dimension_numbers<[1], [0], [0], [1], [0, 0, 1, 1], [], []>} : vector<16x16xf32>, vector<16x64xf32>, vector<16x64xf32> -> vector<16x64xf32>
    %285 = arith.addf %263, %284 : vector<16x64xf32>
    %286 = vector.extract_strided_slice %238 {offsets = [0, 32], sizes = [16, 16], strides = [1, 1]} : vector<16x192xf32> to vector<16x16xf32>
    %287 = vector.extract_strided_slice %238 {offsets = [0, 96], sizes = [16, 16], strides = [1, 1]} : vector<16x192xf32> to vector<16x16xf32>
    %288 = vector.extract_strided_slice %238 {offsets = [0, 160], sizes = [16, 16], strides = [1, 1]} : vector<16x192xf32> to vector<16x16xf32>
    %cst_122 = arith.constant dense<0.000000e+00> : vector<16x16xf32>
    %289 = tpu.matmul %286, %287, %cst_122 {dimension_numbers = #tpu.dot_dimension_numbers<[1], [1], [0], [0], [0, 0, 1, 0], [], []>} : vector<16x16xf32>, vector<16x16xf32>, vector<16x16xf32> -> vector<16x16xf32>
    %cst_123 = arith.constant 2.500000e-01 : f32
    %290 = vector.broadcast %cst_123 : f32 to vector<16x16xf32>
    %291 = arith.mulf %289, %290 : vector<16x16xf32>
    %292 = vector.broadcast %2 : vector<1x16xf32> to vector<16x16xf32>
    %293 = arith.addf %291, %292 : vector<16x16xf32>
    %cst_124 = arith.constant dense<0xFF800000> : vector<16xf32>
    %294 = vector.multi_reduction <maximumf>, %293, %cst_124 [1] : vector<16x16xf32> to vector<16xf32>
    %295 = vector.shape_cast %294 : vector<16xf32> to vector<16x1xf32>
    %296 = vector.broadcast %295 : vector<16x1xf32> to vector<16x16xf32>
    %297 = arith.subf %293, %296 : vector<16x16xf32>
    %298 = math.exp %297 : vector<16x16xf32>
    %cst_125 = arith.constant dense<0.000000e+00> : vector<16xf32>
    %299 = vector.multi_reduction <add>, %298, %cst_125 [1] : vector<16x16xf32> to vector<16xf32>
    %300 = vector.shape_cast %299 : vector<16xf32> to vector<16x1xf32>
    %301 = tpu.reciprocal %300 {approx = true} : vector<16x1xf32> -> vector<16x1xf32>
    %302 = vector.broadcast %301 : vector<16x1xf32> to vector<16x16xf32>
    %303 = arith.mulf %298, %302 : vector<16x16xf32>
    %cst_126 = arith.constant dense<0.000000e+00> : vector<16x16xf32>
    %304 = tpu.matmul %303, %288, %cst_126 {dimension_numbers = #tpu.dot_dimension_numbers<[1], [0], [0], [1], [0, 0, 1, 1], [], []>} : vector<16x16xf32>, vector<16x16xf32>, vector<16x16xf32> -> vector<16x16xf32>
    %305 = vector.extract_strided_slice %240 {offsets = [32, 0], sizes = [16, 64], strides = [1, 1]} : vector<64x64xf32> to vector<16x64xf32>
    %cst_127 = arith.constant dense<0.000000e+00> : vector<16x64xf32>
    %306 = tpu.matmul %304, %305, %cst_127 {dimension_numbers = #tpu.dot_dimension_numbers<[1], [0], [0], [1], [0, 0, 1, 1], [], []>} : vector<16x16xf32>, vector<16x64xf32>, vector<16x64xf32> -> vector<16x64xf32>
    %307 = arith.addf %285, %306 : vector<16x64xf32>
    %308 = vector.extract_strided_slice %238 {offsets = [0, 48], sizes = [16, 16], strides = [1, 1]} : vector<16x192xf32> to vector<16x16xf32>
    %309 = vector.extract_strided_slice %238 {offsets = [0, 112], sizes = [16, 16], strides = [1, 1]} : vector<16x192xf32> to vector<16x16xf32>
    %310 = vector.extract_strided_slice %238 {offsets = [0, 176], sizes = [16, 16], strides = [1, 1]} : vector<16x192xf32> to vector<16x16xf32>
    %cst_128 = arith.constant dense<0.000000e+00> : vector<16x16xf32>
    %311 = tpu.matmul %308, %309, %cst_128 {dimension_numbers = #tpu.dot_dimension_numbers<[1], [1], [0], [0], [0, 0, 1, 0], [], []>} : vector<16x16xf32>, vector<16x16xf32>, vector<16x16xf32> -> vector<16x16xf32>
    %cst_129 = arith.constant 2.500000e-01 : f32
    %312 = vector.broadcast %cst_129 : f32 to vector<16x16xf32>
    %313 = arith.mulf %311, %312 : vector<16x16xf32>
    %314 = vector.broadcast %2 : vector<1x16xf32> to vector<16x16xf32>
    %315 = arith.addf %313, %314 : vector<16x16xf32>
    %cst_130 = arith.constant dense<0xFF800000> : vector<16xf32>
    %316 = vector.multi_reduction <maximumf>, %315, %cst_130 [1] : vector<16x16xf32> to vector<16xf32>
    %317 = vector.shape_cast %316 : vector<16xf32> to vector<16x1xf32>
    %318 = vector.broadcast %317 : vector<16x1xf32> to vector<16x16xf32>
    %319 = arith.subf %315, %318 : vector<16x16xf32>
    %320 = math.exp %319 : vector<16x16xf32>
    %cst_131 = arith.constant dense<0.000000e+00> : vector<16xf32>
    %321 = vector.multi_reduction <add>, %320, %cst_131 [1] : vector<16x16xf32> to vector<16xf32>
    %322 = vector.shape_cast %321 : vector<16xf32> to vector<16x1xf32>
    %323 = tpu.reciprocal %322 {approx = true} : vector<16x1xf32> -> vector<16x1xf32>
    %324 = vector.broadcast %323 : vector<16x1xf32> to vector<16x16xf32>
    %325 = arith.mulf %320, %324 : vector<16x16xf32>
    %cst_132 = arith.constant dense<0.000000e+00> : vector<16x16xf32>
    %326 = tpu.matmul %325, %310, %cst_132 {dimension_numbers = #tpu.dot_dimension_numbers<[1], [0], [0], [1], [0, 0, 1, 1], [], []>} : vector<16x16xf32>, vector<16x16xf32>, vector<16x16xf32> -> vector<16x16xf32>
    %327 = vector.extract_strided_slice %240 {offsets = [48, 0], sizes = [16, 64], strides = [1, 1]} : vector<64x64xf32> to vector<16x64xf32>
    %cst_133 = arith.constant dense<0.000000e+00> : vector<16x64xf32>
    %328 = tpu.matmul %326, %327, %cst_133 {dimension_numbers = #tpu.dot_dimension_numbers<[1], [0], [0], [1], [0, 0, 1, 1], [], []>} : vector<16x16xf32>, vector<16x64xf32>, vector<16x64xf32> -> vector<16x64xf32>
    %329 = arith.addf %307, %328 : vector<16x64xf32>
    %c1_134 = arith.constant 1 : index
    %c0_135 = arith.constant 0 : index
    %c0_136 = arith.constant 0 : index
    %330 = vector.load %arg8[%c1_134, %c0_135, %c0_136] : memref<2x1x64xf32, #tpu.memory_space<vmem>>, vector<1x1x64xf32>
    %331 = vector.shape_cast %330 : vector<1x1x64xf32> to vector<1x64xf32>
    %332 = vector.broadcast %331 : vector<1x64xf32> to vector<16x64xf32>
    %333 = arith.addf %329, %332 : vector<16x64xf32>
    %334 = arith.addf %333, %231 : vector<16x64xf32>
    %c1_137 = arith.constant 1 : index
    %c0_138 = arith.constant 0 : index
    %c0_139 = arith.constant 0 : index
    %335 = vector.load %arg9[%c1_137, %c0_138, %c0_139] : memref<2x1x64xf32, #tpu.memory_space<vmem>>, vector<1x1x64xf32>
    %336 = vector.shape_cast %335 : vector<1x1x64xf32> to vector<1x64xf32>
    %c1_140 = arith.constant 1 : index
    %c0_141 = arith.constant 0 : index
    %c0_142 = arith.constant 0 : index
    %337 = vector.load %arg10[%c1_140, %c0_141, %c0_142] : memref<2x1x64xf32, #tpu.memory_space<vmem>>, vector<1x1x64xf32>
    %338 = vector.shape_cast %337 : vector<1x1x64xf32> to vector<1x64xf32>
    %cst_143 = arith.constant dense<0.000000e+00> : vector<16xf32>
    %339 = vector.multi_reduction <add>, %334, %cst_143 [1] : vector<16x64xf32> to vector<16xf32>
    %340 = vector.shape_cast %339 : vector<16xf32> to vector<16x1xf32>
    %cst_144 = arith.constant 6.400000e+01 : f32
    %341 = vector.broadcast %cst_144 : f32 to vector<16x1xf32>
    %342 = arith.divf %340, %341 : vector<16x1xf32>
    %343 = vector.broadcast %342 : vector<16x1xf32> to vector<16x64xf32>
    %344 = arith.subf %334, %343 : vector<16x64xf32>
    %345 = arith.mulf %344, %344 : vector<16x64xf32>
    %cst_145 = arith.constant dense<0.000000e+00> : vector<16xf32>
    %346 = vector.multi_reduction <add>, %345, %cst_145 [1] : vector<16x64xf32> to vector<16xf32>
    %347 = vector.shape_cast %346 : vector<16xf32> to vector<16x1xf32>
    %cst_146 = arith.constant 6.400000e+01 : f32
    %348 = vector.broadcast %cst_146 : f32 to vector<16x1xf32>
    %349 = arith.divf %347, %348 : vector<16x1xf32>
    %cst_147 = arith.constant 9.99999996E-13 : f32
    %350 = vector.broadcast %cst_147 : f32 to vector<16x1xf32>
    %351 = arith.addf %349, %350 : vector<16x1xf32>
    %352 = math.rsqrt %351 : vector<16x1xf32>
    %353 = vector.broadcast %352 : vector<16x1xf32> to vector<16x64xf32>
    %354 = arith.mulf %344, %353 : vector<16x64xf32>
    %355 = vector.broadcast %336 : vector<1x64xf32> to vector<16x64xf32>
    %356 = arith.mulf %354, %355 : vector<16x64xf32>
    %357 = vector.broadcast %338 : vector<1x64xf32> to vector<16x64xf32>
    %358 = arith.addf %356, %357 : vector<16x64xf32>
    %c1_148 = arith.constant 1 : index
    %c0_149 = arith.constant 0 : index
    %c0_150 = arith.constant 0 : index
    %359 = vector.load %arg11[%c1_148, %c0_149, %c0_150] : memref<2x64x256xf32, #tpu.memory_space<vmem>>, vector<1x64x256xf32>
    %360 = vector.shape_cast %359 : vector<1x64x256xf32> to vector<64x256xf32>
    %cst_151 = arith.constant dense<0.000000e+00> : vector<16x256xf32>
    %361 = tpu.matmul %358, %360, %cst_151 {dimension_numbers = #tpu.dot_dimension_numbers<[1], [0], [0], [1], [0, 0, 1, 1], [], []>} : vector<16x64xf32>, vector<64x256xf32>, vector<16x256xf32> -> vector<16x256xf32>
    %c1_152 = arith.constant 1 : index
    %c0_153 = arith.constant 0 : index
    %c0_154 = arith.constant 0 : index
    %362 = vector.load %arg12[%c1_152, %c0_153, %c0_154] : memref<2x1x256xf32, #tpu.memory_space<vmem>>, vector<1x1x256xf32>
    %363 = vector.shape_cast %362 : vector<1x1x256xf32> to vector<1x256xf32>
    %364 = vector.broadcast %363 : vector<1x256xf32> to vector<16x256xf32>
    %365 = arith.addf %361, %364 : vector<16x256xf32>
    %cst_155 = arith.constant 5.000000e-01 : f32
    %366 = vector.broadcast %cst_155 : f32 to vector<16x256xf32>
    %367 = arith.mulf %366, %365 : vector<16x256xf32>
    %cst_156 = arith.constant 0.707106769 : f32
    %368 = vector.broadcast %cst_156 : f32 to vector<16x256xf32>
    %369 = arith.mulf %365, %368 : vector<16x256xf32>
    %370 = math.absf %369 : vector<16x256xf32>
    %cst_157 = arith.constant 0.327591091 : f32
    %371 = vector.broadcast %cst_157 : f32 to vector<16x256xf32>
    %372 = arith.mulf %371, %370 : vector<16x256xf32>
    %cst_158 = arith.constant 1.000000e+00 : f32
    %373 = vector.broadcast %cst_158 : f32 to vector<16x256xf32>
    %374 = arith.addf %373, %372 : vector<16x256xf32>
    %375 = tpu.reciprocal %374 : vector<16x256xf32> -> vector<16x256xf32>
    %cst_159 = arith.constant 1.06140542 : f32
    %376 = vector.broadcast %cst_159 : f32 to vector<16x256xf32>
    %377 = arith.mulf %376, %375 : vector<16x256xf32>
    %cst_160 = arith.constant -1.45315206 : f32
    %378 = vector.broadcast %cst_160 : f32 to vector<16x256xf32>
    %379 = arith.addf %377, %378 : vector<16x256xf32>
    %380 = arith.mulf %379, %375 : vector<16x256xf32>
    %cst_161 = arith.constant 1.42141378 : f32
    %381 = vector.broadcast %cst_161 : f32 to vector<16x256xf32>
    %382 = arith.addf %380, %381 : vector<16x256xf32>
    %383 = arith.mulf %382, %375 : vector<16x256xf32>
    %cst_162 = arith.constant -0.284496725 : f32
    %384 = vector.broadcast %cst_162 : f32 to vector<16x256xf32>
    %385 = arith.addf %383, %384 : vector<16x256xf32>
    %386 = arith.mulf %385, %375 : vector<16x256xf32>
    %cst_163 = arith.constant 0.254829586 : f32
    %387 = vector.broadcast %cst_163 : f32 to vector<16x256xf32>
    %388 = arith.addf %386, %387 : vector<16x256xf32>
    %389 = arith.mulf %388, %375 : vector<16x256xf32>
    %cst_164 = arith.constant 0.000000e+00 : f32
    %390 = vector.broadcast %cst_164 : f32 to vector<16x256xf32>
    %391 = arith.subf %390, %370 : vector<16x256xf32>
    %392 = arith.mulf %391, %370 : vector<16x256xf32>
    %393 = math.exp %392 : vector<16x256xf32>
    %394 = arith.mulf %389, %393 : vector<16x256xf32>
    %cst_165 = arith.constant 1.000000e+00 : f32
    %395 = vector.broadcast %cst_165 : f32 to vector<16x256xf32>
    %396 = arith.subf %395, %394 : vector<16x256xf32>
    %cst_166 = arith.constant 0.000000e+00 : f32
    %397 = vector.broadcast %cst_166 : f32 to vector<16x256xf32>
    %398 = arith.cmpf oge, %369, %397 : vector<16x256xf32>
    %cst_167 = arith.constant 0.000000e+00 : f32
    %399 = vector.broadcast %cst_167 : f32 to vector<16x256xf32>
    %400 = arith.subf %399, %396 : vector<16x256xf32>
    %401 = arith.select %398, %396, %400 : vector<16x256xi1>, vector<16x256xf32>
    %cst_168 = arith.constant 1.000000e+00 : f32
    %402 = vector.broadcast %cst_168 : f32 to vector<16x256xf32>
    %403 = arith.addf %402, %401 : vector<16x256xf32>
    %404 = arith.mulf %367, %403 : vector<16x256xf32>
    %c1_169 = arith.constant 1 : index
    %c0_170 = arith.constant 0 : index
    %c0_171 = arith.constant 0 : index
    %405 = vector.load %arg13[%c1_169, %c0_170, %c0_171] : memref<2x256x64xf32, #tpu.memory_space<vmem>>, vector<1x256x64xf32>
    %406 = vector.shape_cast %405 : vector<1x256x64xf32> to vector<256x64xf32>
    %cst_172 = arith.constant dense<0.000000e+00> : vector<16x64xf32>
    %407 = tpu.matmul %404, %406, %cst_172 {dimension_numbers = #tpu.dot_dimension_numbers<[1], [0], [0], [1], [0, 0, 1, 1], [], []>} : vector<16x256xf32>, vector<256x64xf32>, vector<16x64xf32> -> vector<16x64xf32>
    %c1_173 = arith.constant 1 : index
    %c0_174 = arith.constant 0 : index
    %c0_175 = arith.constant 0 : index
    %408 = vector.load %arg14[%c1_173, %c0_174, %c0_175] : memref<2x1x64xf32, #tpu.memory_space<vmem>>, vector<1x1x64xf32>
    %409 = vector.shape_cast %408 : vector<1x1x64xf32> to vector<1x64xf32>
    %410 = vector.broadcast %409 : vector<1x64xf32> to vector<16x64xf32>
    %411 = arith.addf %407, %410 : vector<16x64xf32>
    %412 = arith.addf %411, %358 : vector<16x64xf32>
    %c1_176 = arith.constant 1 : index
    %c0_177 = arith.constant 0 : index
    %c0_178 = arith.constant 0 : index
    %413 = vector.load %arg15[%c1_176, %c0_177, %c0_178] : memref<2x1x64xf32, #tpu.memory_space<vmem>>, vector<1x1x64xf32>
    %414 = vector.shape_cast %413 : vector<1x1x64xf32> to vector<1x64xf32>
    %c1_179 = arith.constant 1 : index
    %c0_180 = arith.constant 0 : index
    %c0_181 = arith.constant 0 : index
    %415 = vector.load %arg16[%c1_179, %c0_180, %c0_181] : memref<2x1x64xf32, #tpu.memory_space<vmem>>, vector<1x1x64xf32>
    %416 = vector.shape_cast %415 : vector<1x1x64xf32> to vector<1x64xf32>
    %cst_182 = arith.constant dense<0.000000e+00> : vector<16xf32>
    %417 = vector.multi_reduction <add>, %412, %cst_182 [1] : vector<16x64xf32> to vector<16xf32>
    %418 = vector.shape_cast %417 : vector<16xf32> to vector<16x1xf32>
    %cst_183 = arith.constant 6.400000e+01 : f32
    %419 = vector.broadcast %cst_183 : f32 to vector<16x1xf32>
    %420 = arith.divf %418, %419 : vector<16x1xf32>
    %421 = vector.broadcast %420 : vector<16x1xf32> to vector<16x64xf32>
    %422 = arith.subf %412, %421 : vector<16x64xf32>
    %423 = arith.mulf %422, %422 : vector<16x64xf32>
    %cst_184 = arith.constant dense<0.000000e+00> : vector<16xf32>
    %424 = vector.multi_reduction <add>, %423, %cst_184 [1] : vector<16x64xf32> to vector<16xf32>
    %425 = vector.shape_cast %424 : vector<16xf32> to vector<16x1xf32>
    %cst_185 = arith.constant 6.400000e+01 : f32
    %426 = vector.broadcast %cst_185 : f32 to vector<16x1xf32>
    %427 = arith.divf %425, %426 : vector<16x1xf32>
    %cst_186 = arith.constant 9.99999996E-13 : f32
    %428 = vector.broadcast %cst_186 : f32 to vector<16x1xf32>
    %429 = arith.addf %427, %428 : vector<16x1xf32>
    %430 = math.rsqrt %429 : vector<16x1xf32>
    %431 = vector.broadcast %430 : vector<16x1xf32> to vector<16x64xf32>
    %432 = arith.mulf %422, %431 : vector<16x64xf32>
    %433 = vector.broadcast %414 : vector<1x64xf32> to vector<16x64xf32>
    %434 = arith.mulf %432, %433 : vector<16x64xf32>
    %435 = vector.broadcast %416 : vector<1x64xf32> to vector<16x64xf32>
    %436 = arith.addf %434, %435 : vector<16x64xf32>
    %437 = vector.extract_strided_slice %436 {offsets = [0, 0], sizes = [1, 64], strides = [1, 1]} : vector<16x64xf32> to vector<1x64xf32>
    %c0_187 = arith.constant 0 : index
    %c0_188 = arith.constant 0 : index
    %438 = vector.load %arg17[%c0_187, %c0_188] : memref<64x64xf32, #tpu.memory_space<vmem>>, vector<64x64xf32>
    %cst_189 = arith.constant dense<0.000000e+00> : vector<1x64xf32>
    %439 = tpu.matmul %437, %438, %cst_189 {dimension_numbers = #tpu.dot_dimension_numbers<[1], [0], [0], [1], [0, 0, 1, 1], [], []>} : vector<1x64xf32>, vector<64x64xf32>, vector<1x64xf32> -> vector<1x64xf32>
    %c0_190 = arith.constant 0 : index
    %c0_191 = arith.constant 0 : index
    %440 = vector.load %arg18[%c0_190, %c0_191] : memref<1x64xf32, #tpu.memory_space<vmem>>, vector<1x64xf32>
    %441 = arith.addf %439, %440 : vector<1x64xf32>
    %442 = math.tanh %441 : vector<1x64xf32>
    %c0_192 = arith.constant 0 : index
    %c0_193 = arith.constant 0 : index
    %443 = vector.load %arg19[%c0_192, %c0_193] : memref<64x128xf32, #tpu.memory_space<vmem>>, vector<64x128xf32>
    %cst_194 = arith.constant dense<0.000000e+00> : vector<1x128xf32>
    %444 = tpu.matmul %442, %443, %cst_194 {dimension_numbers = #tpu.dot_dimension_numbers<[1], [0], [0], [1], [0, 0, 1, 1], [], []>} : vector<1x64xf32>, vector<64x128xf32>, vector<1x128xf32> -> vector<1x128xf32>
    %c0_195 = arith.constant 0 : index
    %c0_196 = arith.constant 0 : index
    %445 = vector.load %arg20[%c0_195, %c0_196] : memref<1x128xf32, #tpu.memory_space<vmem>>, vector<1x128xf32>
    %446 = arith.addf %444, %445 : vector<1x128xf32>
    %c0_197 = arith.constant 0 : index
    %c0_198 = arith.constant 0 : index
    %c0_199 = arith.constant 0 : index
    %447 = vector.load %arg21[%c0_197, %c0_198, %c0_199] : memref<1x1x128xf32, #tpu.memory_space<vmem>>, vector<1x1x128xf32>
    %448 = vector.shape_cast %447 : vector<1x1x128xf32> to vector<1x128xf32>
    %449 = vector.shape_cast %446 : vector<1x128xf32> to vector<1x1x128xf32>
    tpu.vector_store %arg21[%c0_197, %c0_198, %c0_199], %449 {strides = array<i32>} : memref<1x1x128xf32, #tpu.memory_space<vmem>>, vector<1x1x128xf32>,
    return
  }
  func.func @transform_0(%arg0: i32) -> (i32, i32, i32) {
    %c0_i32 = arith.constant 0 : i32
    %c0_i32_0 = arith.constant 0 : i32
    %c0_i32_1 = arith.constant 0 : i32
    return %arg0, %c0_i32, %c0_i32_0 : i32, i32, i32
  }
  func.func @transform_1(%arg0: i32) -> (i32, i32, i32) {
    %c0_i32 = arith.constant 0 : i32
    %c0_i32_0 = arith.constant 0 : i32
    %c0_i32_1 = arith.constant 0 : i32
    %c0_i32_2 = arith.constant 0 : i32
    return %c0_i32, %c0_i32_0, %c0_i32_1 : i32, i32, i32
  }
  func.func @transform_2(%arg0: i32) -> (i32, i32) {
    %c0_i32 = arith.constant 0 : i32
    %c0_i32_0 = arith.constant 0 : i32
    %c0_i32_1 = arith.constant 0 : i32
    return %c0_i32, %c0_i32_0 : i32, i32
  }
  func.func @transform_3(%arg0: i32) -> (i32, i32) {
    %c0_i32 = arith.constant 0 : i32
    %c0_i32_0 = arith.constant 0 : i32
    %c0_i32_1 = arith.constant 0 : i32
    return %c0_i32, %c0_i32_0 : i32, i32
  }
  func.func @transform_4(%arg0: i32) -> (i32, i32, i32) {
    %c0_i32 = arith.constant 0 : i32
    %c0_i32_0 = arith.constant 0 : i32
    %c0_i32_1 = arith.constant 0 : i32
    %c0_i32_2 = arith.constant 0 : i32
    return %c0_i32, %c0_i32_0, %c0_i32_1 : i32, i32, i32
  }
  func.func @transform_5(%arg0: i32) -> (i32, i32, i32) {
    %c0_i32 = arith.constant 0 : i32
    %c0_i32_0 = arith.constant 0 : i32
    %c0_i32_1 = arith.constant 0 : i32
    %c0_i32_2 = arith.constant 0 : i32
    return %c0_i32, %c0_i32_0, %c0_i32_1 : i32, i32, i32
  }
  func.func @transform_6(%arg0: i32) -> (i32, i32, i32) {
    %c0_i32 = arith.constant 0 : i32
    %c0_i32_0 = arith.constant 0 : i32
    %c0_i32_1 = arith.constant 0 : i32
    %c0_i32_2 = arith.constant 0 : i32
    return %c0_i32, %c0_i32_0, %c0_i32_1 : i32, i32, i32
  }
  func.func @transform_7(%arg0: i32) -> (i32, i32, i32) {
    %c0_i32 = arith.constant 0 : i32
    %c0_i32_0 = arith.constant 0 : i32
    %c0_i32_1 = arith.constant 0 : i32
    %c0_i32_2 = arith.constant 0 : i32
    return %c0_i32, %c0_i32_0, %c0_i32_1 : i32, i32, i32
  }
  func.func @transform_8(%arg0: i32) -> (i32, i32, i32) {
    %c0_i32 = arith.constant 0 : i32
    %c0_i32_0 = arith.constant 0 : i32
    %c0_i32_1 = arith.constant 0 : i32
    %c0_i32_2 = arith.constant 0 : i32
    return %c0_i32, %c0_i32_0, %c0_i32_1 : i32, i32, i32
  }
  func.func @transform_9(%arg0: i32) -> (i32, i32, i32) {
    %c0_i32 = arith.constant 0 : i32
    %c0_i32_0 = arith.constant 0 : i32
    %c0_i32_1 = arith.constant 0 : i32
    %c0_i32_2 = arith.constant 0 : i32
    return %c0_i32, %c0_i32_0, %c0_i32_1 : i32, i32, i32
  }
  func.func @transform_10(%arg0: i32) -> (i32, i32, i32) {
    %c0_i32 = arith.constant 0 : i32
    %c0_i32_0 = arith.constant 0 : i32
    %c0_i32_1 = arith.constant 0 : i32
    %c0_i32_2 = arith.constant 0 : i32
    return %c0_i32, %c0_i32_0, %c0_i32_1 : i32, i32, i32
  }
  func.func @transform_11(%arg0: i32) -> (i32, i32, i32) {
    %c0_i32 = arith.constant 0 : i32
    %c0_i32_0 = arith.constant 0 : i32
    %c0_i32_1 = arith.constant 0 : i32
    %c0_i32_2 = arith.constant 0 : i32
    return %c0_i32, %c0_i32_0, %c0_i32_1 : i32, i32, i32
  }
  func.func @transform_12(%arg0: i32) -> (i32, i32, i32) {
    %c0_i32 = arith.constant 0 : i32
    %c0_i32_0 = arith.constant 0 : i32
    %c0_i32_1 = arith.constant 0 : i32
    %c0_i32_2 = arith.constant 0 : i32
    return %c0_i32, %c0_i32_0, %c0_i32_1 : i32, i32, i32
  }
  func.func @transform_13(%arg0: i32) -> (i32, i32, i32) {
    %c0_i32 = arith.constant 0 : i32
    %c0_i32_0 = arith.constant 0 : i32
    %c0_i32_1 = arith.constant 0 : i32
    %c0_i32_2 = arith.constant 0 : i32
    return %c0_i32, %c0_i32_0, %c0_i32_1 : i32, i32, i32
  }
  func.func @transform_14(%arg0: i32) -> (i32, i32, i32) {
    %c0_i32 = arith.constant 0 : i32
    %c0_i32_0 = arith.constant 0 : i32
    %c0_i32_1 = arith.constant 0 : i32
    %c0_i32_2 = arith.constant 0 : i32
    return %c0_i32, %c0_i32_0, %c0_i32_1 : i32, i32, i32
  }
  func.func @transform_15(%arg0: i32) -> (i32, i32, i32) {
    %c0_i32 = arith.constant 0 : i32
    %c0_i32_0 = arith.constant 0 : i32
    %c0_i32_1 = arith.constant 0 : i32
    %c0_i32_2 = arith.constant 0 : i32
    return %c0_i32, %c0_i32_0, %c0_i32_1 : i32, i32, i32
  }
  func.func @transform_16(%arg0: i32) -> (i32, i32) {
    %c0_i32 = arith.constant 0 : i32
    %c0_i32_0 = arith.constant 0 : i32
    %c0_i32_1 = arith.constant 0 : i32
    return %c0_i32, %c0_i32_0 : i32, i32
  }
  func.func @transform_17(%arg0: i32) -> (i32, i32) {
    %c0_i32 = arith.constant 0 : i32
    %c0_i32_0 = arith.constant 0 : i32
    %c0_i32_1 = arith.constant 0 : i32
    return %c0_i32, %c0_i32_0 : i32, i32
  }
  func.func @transform_18(%arg0: i32) -> (i32, i32) {
    %c0_i32 = arith.constant 0 : i32
    %c0_i32_0 = arith.constant 0 : i32
    %c0_i32_1 = arith.constant 0 : i32
    return %c0_i32, %c0_i32_0 : i32, i32
  }
  func.func @transform_19(%arg0: i32) -> (i32, i32) {
    %c0_i32 = arith.constant 0 : i32
    %c0_i32_0 = arith.constant 0 : i32
    %c0_i32_1 = arith.constant 0 : i32
    return %c0_i32, %c0_i32_0 : i32, i32
  }
  func.func @transform_20(%arg0: i32) -> (i32, i32, i32) {
    %c0_i32 = arith.constant 0 : i32
    %c0_i32_0 = arith.constant 0 : i32
    %c0_i32_1 = arith.constant 0 : i32
    return %arg0, %c0_i32, %c0_i32_0 : i32, i32, i32
  }
}

</mosaic_0001>

<bundles_post_ra>
// kernel: forward.1
= control target key start
LH: loop header
LB: loop body
LE: loop exit
PB: predicated region body
PF: predicated region fallthrough
CT: control target
= control target key end

     0   :  { %s6398_s0 = inlined_call_operand.vmem [shape: f32[2,16,64], index: 0, kind: input, shape index: {}]   ;;  %s6399_s1 = inlined_call_operand.vmem [shape: f32[2,1,16], index: 1, kind: input, shape index: {}]   ;;  %s6400_s2 = inlined_call_operand.vmem [shape: f32[1,64], index: 2, kind: input, shape index: {}]   ;;  %s6401_s3 = inlined_call_operand.vmem [shape: f32[1,64], index: 3, kind: input, shape index: {}]   ;;  %s6402_s4 = inlined_call_operand.vmem [shape: f32[2,64,192], index: 4, kind: input, shape index: {}]   ;;  %s6403_s5 = inlined_call_operand.vmem [shape: f32[2,1,192], index: 5, kind: input, shape index: {}]   ;;  %s6404_s6 = inlined_call_operand.vmem [shape: f32[2,64,64], index: 6, kind: input, shape index: {}]   ;;  %s6405_s7 = inlined_call_operand.vmem [shape: f32[2,1,64], index: 7, kind: input, shape index: {}]   ;;  %s6406_s8 = inlined_call_operand.vmem [shape: f32[2,1,64], index: 8, kind: input, shape index: {}]   ;;  %s6407_s9 = inlined_call_operand.vmem [shape: f32[2,1,64], index: 9, kind: input, shape index: {}]   ;;  %s6408_s10 = inlined_call_operand.vmem [shape: f32[2,64,256], index: 10, kind: input, shape index: {}]   ;;  %s6409_s11 = inlined_call_operand.vmem [shape: f32[2,1,256], index: 11, kind: input, shape index: {}]   ;;  %s6410_s12 = inlined_call_operand.vmem [shape: f32[2,256,64], index: 12, kind: input, shape index: {}]   ;;  %s6411_s13 = inlined_call_operand.vmem [shape: f32[2,1,64], index: 13, kind: input, shape index: {}]   ;;  %s6412_s14 = inlined_call_operand.vmem [shape: f32[2,1,64], index: 14, kind: input, shape index: {}]   ;;  %s6413_s15 = inlined_call_operand.vmem [shape: f32[2,1,64], index: 15, kind: input, shape index: {}]   ;;  %s6414_s16 = inlined_call_operand.vmem [shape: f32[64,64], index: 16, kind: input, shape index: {}]   ;;  %s6415_s17 = inlined_call_operand.vmem [shape: f32[1,64], index: 17, kind: input, shape index: {}]   ;;  %s6416_s18 = inlined_call_operand.vmem [shape: f32[64,128], index: 18, kind: input, shape index: {}]   ;;  %s6417_s19 = inlined_call_operand.vmem [shape: f32[1,128], index: 19, kind: input, shape index: {}]   ;;  %s6418_s20 = inlined_call_operand.vmem [shape: f32[2,1,128], index: 20, kind: output, shape index: {}]  }
   0x1   :  { %6429 = sst [smem:[#allocation2_spill]] %s6398_s0 }
   0x2   :  { %6430 = sst [smem:[#allocation3_spill]] %s6399_s1  ;;  %s5445_s1 = smov 0  }
   0x3   :  { %6431 = sst [smem:[#allocation4_spill]] %s6400_s2 }
   0x4   :  { %6432 = sst [smem:[#allocation5_spill]] %s6401_s3 }
   0x5   :  { %6433 = sst [smem:[#allocation6_spill]] %s6402_s4 }
   0x6 LB: > { %s5451_s22 = sadd.s32 4294967295, %s5328_s1   ;;  %p4270_p0 = scmp.ge.s32.totalorder %s5328_s1, 1  ;;  %s5328_s1 = sphi %s5445_s1, %s30_s1  }
   0x7   : > { %p562_p1 = scmp.lt.s32.totalorder %s5328_s1, 3 }
   0x9   : > { %p563_p2 = pnand %p4270_p0, %p562_p1 }
   0xa   : > { %p618_p3 = scmp.lt.s32.totalorder (!%p563_p2), %s5451_s22, 1  ;;  %vm632_vm0 = vcmask (!%p563_p2), 523264   ;;  %s6434_s3 = sld [smem:[#allocation2_spill]] (!%p563_p2)  ;;  %v5330_v33 = vmov (!%p563_p2), 0.0   ;;  %v694_v55 = vlaneseq (!%p563_p2)  ;;  %v692_v58 = vld [vmem:[%s6403_s5] sm:$0x3] (!%p563_p2) }
   0xb   : > { %566 = sbr.rel (%p563_p2) target bundleno = 7473 (0x1d31), region = 100  ;;  %s6435_s4 = sld [smem:[#allocation6_spill]] (!%p563_p2)  ;;  %774 = vmatprep.mubr.f32.mxu0 (!%p563_p2), %v5330_v33  ;;  %vm801_vm1 = vcmask (!%p563_p2), 130048   ;;  %vm5339_vm9 = vmmov (!%p563_p2), 0  }
   0xc   : > { %s6436_s28 = sld [smem:[#allocation4_spill]] (!%p563_p2)  ;;  %s6437_s0 = sld [smem:[#allocation5_spill]] (!%p563_p2)  ;;  %v695_v56 = vshrl.u32 (!%p563_p2), %v694_v55, 7  ;;  %vm5564_vm2 = vmpackc.low (!%p563_p2), %vm801_vm1, %vm801_vm1 }
   0xd   : > { %s6428_s2 = smov (!%p563_p2), 64   ;;  %s6426_s25 = smov (!%p563_p2), 112  }
   0xe   : > { %v5531_v57 = vsub.s32 (!%p563_p2), 0, %v695_v56  ;;  %v5537_v60 = vsub.s32 (!%p563_p2), 1, %v695_v56  ;;  %s6440_s29 = sld [smem:[#allocation3_spill]] (!%p563_p2)  ;;  %s6422_s21 = smov (!%p563_p2), 16  }
   0xf   : > { %s6442_s27 = smov (!%p563_p2), 112  }
  0x10   : > { %v697_v59 = vrot.slane (!%p563_p2), %v692_v58, %v5531_v57 }
  0x11   : > { %v677_v14 = vld [vmem:[%s6435_s4 + $0x8] sm:$0xff] (!%p563_p2)  ;;  %v679_v15 = vld [vmem:[%s6435_s4 + $0x18] sm:$0xff] (!%p563_p2)  ;;  %v676_v17 = vld [vmem:[%s6435_s4] sm:$0xff] (!%p563_p2) }
  0x12   : > { %s5457_s23 = scalar_select %p618_p3, %s5451_s22, 1  ;;  %v4841_v16 = vpack.c.bf16 %v679_v15, %v677_v14  ;;  %v678_v18 = vld [vmem:[%s6435_s4 + $0x10] sm:$0xff]  ;;  %v681_v20 = vld [vmem:[%s6435_s4 + $0x28] sm:$0xff]  ;;  %v683_v21 = vld [vmem:[%s6435_s4 + $0x38] sm:$0xff] }
  0x13   : > { %v4843_v19 = vpack.c.bf16 %v678_v18, %v676_v17  ;;  %v4845_v22 = vpack.c.bf16 %v683_v21, %v681_v20  ;;  %v680_v23 = vld [vmem:[%s6435_s4 + $0x20] sm:$0xff]  ;;  %v682_v24 = vld [vmem:[%s6435_s4 + $0x30] sm:$0xff]  ;;  %v685_v26 = vld [vmem:[%s6435_s4 + $0x48] sm:$0xff] }
  0x14   : > { %s4444_s24 = sshll.u32 %s5457_s23, 4  ;;  %4842 = vmatprep.subr.bf16.mxu0 %v4841_v16  ;;  %v4847_v25 = vpack.c.bf16 %v682_v24, %v680_v23  ;;  %v687_v27 = vld [vmem:[%s6435_s4 + $0x58] sm:$0xff]  ;;  %v684_v28 = vld [vmem:[%s6435_s4 + $0x40] sm:$0xff]  ;;  %v686_v30 = vld [vmem:[%s6435_s4 + $0x50] sm:$0xff]  ;;  %s5582_s30 = scalar_lea.vmem %s6440_s29, %s5451_s22 }
  0x15   : > { %s622_s26 = scalar_lea.vmem %s6434_s3, %s4444_s24  ;;  %4844 = vmatpush1.bf16.msra.mxu0 %v4843_v19  ;;  %v4849_v29 = vpack.c.bf16 %v687_v27, %v685_v26  ;;  %v689_v31 = vld [vmem:[%s6435_s4 + $0x68] sm:$0xff]  ;;  %v691_v32 = vld [vmem:[%s6435_s4 + $0x78] sm:$0xff]  ;;  %v4851_v34 = vpack.c.bf16 %v686_v30, %v684_v28  ;;  %v688_v36 = vld [vmem:[%s6435_s4 + $0x60] sm:$0xff]  ;;  %s6425_s3 = smov 32  }
  0x16   : > { %v628_v0 = vld [vmem:[%s622_s26] sm:$0xff]  ;;  %v629_v1 = vld [vmem:[%s622_s26 + $0x8] sm:$0xff]  ;;  %4846 = vmatprep.subr.bf16.mxu0 %v4845_v22  ;;  %v4853_v35 = vpack.c.bf16 %v691_v32, %v689_v31  ;;  %v690_v37 = vld [vmem:[%s6435_s4 + $0x70] sm:$0xff]  ;;  %s6423_s26 = smov 96   ;;  %s5335_s22 = smov 48  }
  0x17   : > { %v633_v2 = vsel %vm632_vm0, %v628_v0, 0.0  ;;  %v636_v3 = vsel %vm632_vm0, %v629_v1, 0.0  ;;  %v4855_v38 = vpack.c.bf16 %v690_v37, %v688_v36  ;;  %v4273_v46 = vld [vmem:[%s6436_s28] ss:$0 sm:$0xff]  ;;  %s6441_s24 = smov 64   ;;  %s6445_s28 = smov 16  }
  0x18   : > { %634 = vadd.xlane.f32.xlu0 %v633_v2  ;;  %v4274_v48 = vld [vmem:[%s6437_s0] ss:$0 sm:$0xff]  ;;  %s6420_s0 = smov 80   ;;  %s6446_s29 = smov 80  }
  0x19   : > { %4848 = vmatpush1.bf16.msra.mxu0 %v4847_v25  ;;  %v5585_v22 = vld [vmem:[%s5582_s30] ss:$0 sm:$0xff] }
  0x1a   : > { %4850 = vmatprep.subr.bf16.mxu0 %v4849_v29 }
  0x1c   : > { %637 = vadd.xlane.f32.xlu0 %v636_v3 }
  0x1d   : > { %4852 = vmatpush1.bf16.msra.mxu0 %v4851_v34 }
  0x1e   : > { %4854 = vmatprep.subr.bf16.mxu0 %v4853_v35 }
  0x21   : > { %4856 = vmatpush1.bf16.msra.mxu0 %v4855_v38 }
  0xa5   : > { %v635_v4 = vpop.xlane.xlu0 %634 }
  0xa6   : > { %v640_v5 = vmul.f32 0.015625, %v635_v4 }
  0xa8   : > { %v642_v6 = vsub.f32 %v628_v0, %v640_v5  ;;  %v701_v0 = vrot.slane %v692_v58, %v5537_v60 }
  0xa9   : > { %v638_v7 = vpop.xlane.xlu0 %637 }
  0xaa   : > { %v641_v8 = vmul.f32 0.015625, %v638_v7  ;;  %v644_v9 = vmul.f32 %v642_v6, %v642_v6 }
  0xac   : > { %v643_v10 = vsub.f32 %v629_v1, %v641_v8  ;;  %v646_v11 = vsel %vm632_vm0, %v644_v9, 0.0 }
  0xad   : > { %647 = vadd.xlane.f32.xlu1 %v646_v11 }
  0xae   : > { %v645_v12 = vmul.f32 %v643_v10, %v643_v10 }
  0xb0   : > { %v649_v13 = vsel %vm632_vm0, %v645_v12, 0.0  ;;  %v4337_v12 = vld [vmem:[%s6404_s6 + $0x40] sm:$0xff] }
  0xb1   : > { %650 = vadd.xlane.f32.xlu1 %v649_v13 }
 0x13a   : > { %v648_v39 = vpop.xlane.xlu1 %647 }
 0x13b   : > { %v652_v40 = vmul.f32 0.015625, %v648_v39 }
 0x13d   : > { %v654_v41 = vadd.f32 1e-12, %v652_v40 }
 0x13e   : > { %v651_v42 = vpop.xlane.xlu1 %650 }
 0x13f   : > { %5205 = vrsqrt.f32 %v654_v41  ;;  %v653_v43 = vmul.f32 0.015625, %v651_v42 }
 0x141   : > { %v655_v44 = vadd.f32 1e-12, %v653_v43 }
 0x143   : > { %5207 = vrsqrt.f32 %v655_v44 }
 0x149   : > { %v5206_v45 = vpop.eup %5205 }
 0x14a   : > { %v658_v47 = vmul.f32 %v5206_v45, %v642_v6 }
 0x14c   : > { %v666_v49 = vmul.f32 %v4273_v46, %v658_v47 }
 0x14d   : > { %v5208_v50 = vpop.eup %5207 }
 0x14e   : > { %v5522_v51 = vadd.f32 %v4274_v48, %v666_v49  ;;  %v659_v52 = vmul.f32 %v5208_v50, %v643_v10 }
 0x150   : > { %4275 = vmatmul.mubr.msk.f32.vlgmr.msra.gmra.mrb[0].mxu0 %vm632_vm0, %v5522_v51  ;;  %v667_v53 = vmul.f32 %v4273_v46, %v659_v52 }
 0x151   : > { %780 = vmatprep.mubr.f32.mxu0 %v5330_v33 }
 0x152   : > { %v5527_v54 = vadd.f32 %v4274_v48, %v667_v53 }
 0x154   : > { %4276 = vmatmul.mubr.msk.f32.gmra.mrb[2].mxu0 %vm632_vm0, %v5527_v54 }
 0x223   : > { %v776_v61 = vpop.f32.mrb[0].mxu0 }
 0x224   : > { %v5539_v62 = vadd.f32 %v776_v61, %v697_v59  ;;  %v778_v63 = vpop.f32.mrb[1].mxu0 }
 0x225   : > { %v779_v4 = vadd.f32 %v778_v63, %v701_v0 }
 0x226   : > { %4639 = vmatprep.mubr.msk.f32.mxu1 %vm801_vm1, %v5539_v62 }
 0x227   : > { %v782_v1 = vpop.f32.mrb[2].mxu0 }
 0x228   : > { %v5544_v2 = vadd.f32 %v782_v1, %v697_v59  ;;  %v784_v3 = vpop.f32.mrb[3].mxu0 }
 0x229   : > { %v785_v5 = vadd.f32 %v784_v3, %v701_v0 }
 0x22a   : > { %v5548_v6 = vpack.i.bf16 %v5544_v2, %v5539_v62 }
 0x22b   : > { %v4863_v7 = vpack.c.bf16 %v785_v5, %v779_v4  ;;  %v5550_v8 = vpack.i.bf16 %v785_v5, %v779_v4 }
 0x22c   : > { %5136 = vrot.lane.b32.xlu0 %v5548_v6, %s6428_s2 }
 0x230   : > { %998 = vrot.lane.b32.xlu0 %v5539_v62, %s6426_s25 }
 0x234   : > { %1000 = vrot.lane.b32.xlu0 %v5544_v2, %s6426_s25 }
 0x238   : > { %5146 = vrot.lane.b32.xlu0 %v5548_v6, %s6425_s3 }
 0x23c   : > { %1368 = vrot.lane.b32.xlu0 %v5544_v2, %s6423_s26 }
 0x29e   : > { %v5137_v9 = vpop.permute.xlu0 %5136 }
 0x29f   : > { %v5139_v10 = vunpack.i.h.bf16 %v5137_v9  ;;  %v5138_v11 = vunpack.i.l.bf16 %v5137_v9 }
 0x2a1   : > { %v4857_v13 = vpack.c.bf16 %v5139_v10, %v5138_v11 }
 0x2a2   : > { %v999_v14 = vpop.permute.xlu0 %998 }
 0x2a3   : > { %4859 = vmatprep.subr.msk.bf16.mxu1 %vm5564_vm2, %v4857_v13 }
 0x2a4   : > { %4862 = vmatpush3.bf16.xpose.msk.msra.mxu1 %vm5564_vm2, %v4857_v13 }
 0x2a5   : > { %4864 = vmatprep.subr.bf16.mxu1 %v4863_v7 }
 0x2a6   : > { %v1001_v15 = vpop.permute.xlu0 %1000 }
 0x2aa   : > { %v5147_v16 = vpop.permute.xlu0 %5146 }
 0x2ab   : > { %v5149_v17 = vunpack.i.h.bf16 %v5147_v16  ;;  %v5148_v18 = vunpack.i.l.bf16 %v5147_v16  ;;  %4640 = vmatmul.mubr.msk.f32.vlgmr.msra.gmra.mrb[0].mxu1 %vm801_vm1, %v5544_v2 }
 0x2ac   : > { %4866 = vmatpush3.bf16.msra.mxu1 %v4863_v7 }
 0x2ad   : > { %v4885_v19 = vpack.c.bf16 %v5149_v17, %v5148_v18 }
 0x2ae   : > { %v1369_v47 = vpop.permute.xlu0 %1368 }
 0x2af   : > { %4887 = vmatprep.subr.msk.bf16.mxu0 %vm5564_vm2, %v4885_v19 }
 0x2b0   : > { %4890 = vmatpush3.bf16.xpose.msk.msra.mxu0 %vm5564_vm2, %v4885_v19 }
 0x37e   : > { %v4641_v20 = vpop.f32.mrb[0].mxu1 }
 0x37f   : > { %v876_v21 = vpop.f32.mrb[1].mxu1  ;;  %v886_v23 = vmul.f32 0.25, %v4641_v20 }
 0x380   : > { %v885_v24 = vmul.f32 0.25, %v876_v21 }
 0x381   : > { %v894_v27 = vadd.f32 %v5585_v22, %v886_v23 }
 0x382   : > { %v893_v25 = vadd.f32 %v5585_v22, %v885_v24 }
 0x383   : > { %v898_v28 = vsel %vm801_vm1, %v894_v27, -inf }
 0x384   : > { %v895_v26 = vsel %vm801_vm1, %v893_v25, -inf }
 0x385   : > { %896 = vmax.xlane.f32.xlu1 %v895_v26 }
 0x389   : > { %899 = vmax.xlane.f32.xlu1 %v898_v28 }
 0x412   : > { %v897_v29 = vpop.xlane.xlu1 %896 }
 0x413   : > { %v901_v30 = vsub.f32 %v893_v25, %v897_v29 }
 0x415   : > { %v903_v34 = vmul.f32 1.442695, %v901_v30 }
 0x416   : > { %v900_v31 = vpop.xlane.xlu1 %899 }
 0x417   : > { %v902_v32 = vsub.f32 %v894_v27, %v900_v31 }
 0x419   : > { %v905_v35 = vmul.f32 1.442695, %v902_v32 }
 0x41b   : > { %5209 = vpow2.f32 %v905_v35 }
 0x41c   : > { %5211 = vpow2.f32 %v903_v34 }
 0x425   : > { %v5210_v36 = vpop.eup %5209 }
 0x426   : > { %v910_v37 = vsel %vm801_vm1, %v5210_v36, 0.0  ;;  %v5212_v38 = vpop.eup %5211 }
 0x427   : > { %911 = vadd.xlane.f32.xlu1 %v910_v37  ;;  %v907_v39 = vsel %vm801_vm1, %v5212_v38, 0.0 }
 0x42b   : > { %908 = vadd.xlane.f32.xlu1 %v907_v39 }
 0x43c   : > { %5141 = vrot.lane.b32.xlu1 %v5548_v6, %s5335_s22 }
 0x440   : > { %1366 = vrot.lane.b32.xlu1 %v5539_v62, %s6423_s26 }
 0x4b4   : > { %v912_v40 = vpop.xlane.xlu1 %911 }
 0x4b5   : > { %5213 = vrcp.f32 %v912_v40 }
 0x4b8   : > { %v909_v41 = vpop.xlane.xlu1 %908 }
 0x4b9   : > { %5215 = vrcp.f32 %v909_v41 }
 0x4bc   : > { %v5142_v42 = vpop.permute.xlu1 %5141 }
 0x4bd   : > { %v5144_v43 = vunpack.i.h.bf16 %v5142_v42  ;;  %v5143_v44 = vunpack.i.l.bf16 %v5142_v42 }
 0x4bf   : > { %v4867_v45 = vpack.c.bf16 %v5144_v43, %v5143_v44  ;;  %v5214_v48 = vpop.eup %5213 }
 0x4c0   : > { %v1367_v46 = vpop.permute.xlu1 %1366  ;;  %v916_v52 = vmul.f32 %v5214_v48, %v5210_v36 }
 0x4c1   : > { %4869 = vmatprep.subr.msk.bf16.mxu1 %vm5564_vm2, %v4867_v45  ;;  %4681 = vmatprep.mubr.msk.f32.mxu0 %vm801_vm1, %v1367_v46 }
 0x4c2   : > { %4682 = vmatmul.mubr.msk.f32.vlgmr.msra.gmra.mrb[4].mxu0 %vm801_vm1, %v1369_v47 }
 0x4c3   : > { %v5216_v49 = vpop.eup %5215 }
 0x4c4   : > { %v915_v50 = vmul.f32 %v5216_v49, %v5212_v38  ;;  %v789_v49 = vld [vmem:[%s6404_s6 + $0x10] sm:$0xff] }
 0x4c6   : > { %4646 = vmatprep.mubr.msk.f32.mxu1 %vm801_vm1, %v915_v50  ;;  %v790_v50 = vld [vmem:[%s6404_s6 + $0x18] sm:$0xff] }
 0x4c7   : > { %4647 = vmatmul.mubr.msk.f32.vlgmr.msra.gmra.mrb[2].mxu1 %vm801_vm1, %v916_v52  ;;  %v4877_v52 = vpack.c.bf16 %v790_v50, %v789_v49 }
 0x4c8   : > { %4872 = vmatpush3.bf16.xpose.msk.msra.mxu1 %vm5564_vm2, %v4867_v45  ;;  %4653 = vmatprep.mubr.msk.f32.mxu1 %vm801_vm1, %v999_v14 }
 0x4cf   : > { %4654 = vmatmul.mubr.msk.f32.vlgmr.msra.gmra.mrb[4].mxu1 %vm801_vm1, %v1001_v15 }
 0x595   : > { %v4683_v53 = vpop.f32.mrb[4].mxu0 }
 0x596   : > { %v1448_v55 = vpop.f32.mrb[5].mxu0  ;;  %v1458_v29 = vmul.f32 0.25, %v4683_v53  ;;  %v787_v53 = vld [vmem:[%s6404_s6] sm:$0xff] }
 0x597   : > { %v1457_v7 = vmul.f32 0.25, %v1448_v55  ;;  %v788_v55 = vld [vmem:[%s6404_s6 + $0x8] sm:$0xff] }
 0x598   : > { %v1460_v30 = vadd.f32 %v5585_v22, %v1458_v29 }
 0x599   : > { %v1459_v9 = vadd.f32 %v5585_v22, %v1457_v7 }
 0x59a   : > { %v5607_v56 = vpop.f32.mrb[2].mxu1  ;;  %v1464_v31 = vsel %vm801_vm1, %v1460_v30, -inf }
 0x59b   : > { %v5609_v58 = vpop.f32.mrb[3].mxu1  ;;  %v1461_v10 = vsel %vm801_vm1, %v1459_v9, -inf }
 0x5a2   : > { %v4655_v59 = vpop.f32.mrb[4].mxu1 }
 0x5a3   : > { %v1090_v61 = vmul.f32 0.25, %v4655_v59  ;;  %v1080_v63 = vpop.f32.mrb[5].mxu1  ;;  %v4881_v59 = vpack.c.bf16 %v788_v55, %v787_v53 }
 0x5a4   : > { %v1089_v0 = vmul.f32 0.25, %v1080_v63 }
 0x5a5   : > { %v1092_v1 = vadd.f32 %v5585_v22, %v1090_v61 }
 0x5a6   : > { %v1091_v3 = vadd.f32 %v5585_v22, %v1089_v0 }
 0x5a7   : > { %v1096_v4 = vsel %vm801_vm1, %v1092_v1, -inf }
 0x5a8   : > { %1097 = vmax.xlane.f32.xlu0 %v1096_v4  ;;  %v1093_v5 = vsel %vm801_vm1, %v1091_v3, -inf }
 0x5a9   : > { %1094 = vmax.xlane.f32.xlu1 %v1093_v5 }
 0x5ba   : > { %5151 = vrot.lane.b32.xlu1 %v5550_v8, %s6426_s25 }
 0x5be   : > { %1653 = vrot.lane.b32.xlu1 %v5539_v62, %s6420_s0 }
 0x5c2   : > { %1655 = vrot.lane.b32.xlu1 %v5544_v2, %s6420_s0 }
 0x5e6   : > { %1462 = vmax.xlane.f32.xlu1 %v1461_v10 }
 0x5f7   : > { %5161 = vrot.lane.b32.xlu1 %v5550_v8, %s6423_s26 }
 0x5fb   : > { %5166 = vrot.lane.b32.xlu1 %v5550_v8, %s6420_s0 }
 0x635   : > { %v1098_v11 = vpop.xlane.xlu0 %1097 }
 0x636   : > { %v1100_v13 = vsub.f32 %v1092_v1, %v1098_v11  ;;  %v1095_v14 = vpop.xlane.xlu1 %1094 }
 0x637   : > { %v1099_v15 = vsub.f32 %v1091_v3, %v1095_v14  ;;  %v791_v14 = vld [vmem:[%s6404_s6 + $0x20] sm:$0xff] }
 0x638   : > { %v1103_v62 = vmul.f32 1.442695, %v1100_v13 }
 0x639   : > { %v1101_v16 = vmul.f32 1.442695, %v1099_v15  ;;  %v792_v15 = vld [vmem:[%s6404_s6 + $0x28] sm:$0xff] }
 0x63a   : > { %v5152_v17 = vpop.permute.xlu1 %5151 }
 0x63b   : > { %5217 = vpow2.f32 %v1101_v16  ;;  %v5154_v2 = vunpack.i.h.bf16 %v5152_v17  ;;  %v5153_v18 = vunpack.i.l.bf16 %v5152_v17 }
 0x63c   : > { %5219 = vpow2.f32 %v1103_v62 }
 0x63d   : > { %v4873_v19 = vpack.c.bf16 %v5154_v2, %v5153_v18  ;;  %v4895_v18 = vpack.c.bf16 %v792_v15, %v791_v14  ;;  %v1995_v14 = vld [vmem:[%s6408_s10] sm:$0xff]  ;;  %v1997_v15 = vld [vmem:[%s6408_s10 + $0x10] sm:$0xff] }
 0x63e   : > { %v1654_v20 = vpop.permute.xlu1 %1653 }
 0x63f   : > { %4874 = vmatprep.subr.bf16.mxu1 %v4873_v19  ;;  %4702 = vmatprep.mubr.msk.f32.mxu0 %vm801_vm1, %v1654_v20 }
 0x640   : > { %4876 = vmatpush3.bf16.msra.mxu1 %v4873_v19 }
 0x641   : > { %4878 = vmatprep.subr.bf16.mxu1 %v4877_v52 }
 0x642   : > { %v1656_v25 = vpop.permute.xlu1 %1655 }
 0x645   : > { %v5218_v21 = vpop.eup %5217 }
 0x646   : > { %v1105_v8 = vsel %vm801_vm1, %v5218_v21, 0.0  ;;  %v5220_v23 = vpop.eup %5219 }
 0x647   : > { %1106 = vadd.xlane.f32.xlu0 %v1105_v8  ;;  %v1108_v24 = vsel %vm801_vm1, %v5220_v23, 0.0 }
 0x64b   : > { %1109 = vadd.xlane.f32.xlu0 %v1108_v24 }
 0x661   : > { %5156 = vrot.lane.b32.xlu0 %v5548_v6, %s6422_s21 }
 0x673   : > { %v1463_v26 = vpop.xlane.xlu1 %1462 }
 0x674   : > { %v1467_v27 = vsub.f32 %v1459_v9, %v1463_v26 }
 0x676   : > { %v1469_v28 = vmul.f32 1.442695, %v1467_v27 }
 0x677   : > { %v5162_v63 = vpop.permute.xlu1 %5161 }
 0x678   : > { %5221 = vpow2.f32 %v1469_v28  ;;  %v5164_v1 = vunpack.i.h.bf16 %v5162_v63  ;;  %v5163_v3 = vunpack.i.l.bf16 %v5162_v63 }
 0x67a   : > { %v4891_v7 = vpack.c.bf16 %v5164_v1, %v5163_v3 }
 0x67b   : > { %v5167_v17 = vpop.permute.xlu1 %5166 }
 0x67c   : > { %v5168_v8 = vunpack.i.l.bf16 %v5167_v17 }
 0x680   : > { %1465 = vmax.xlane.f32.xlu0 %v1464_v31 }
 0x682   : > { %v5634_v32 = vpop.eup %5221 }
 0x683   : > { %v1473_v34 = vsel %vm801_vm1, %v5634_v32, 0.0 }
 0x684   : > { %1474 = vadd.xlane.f32.xlu0 %v1473_v34 }
 0x6d4   : > { %v1107_v35 = vpop.xlane.xlu0 %1106 }
 0x6d5   : > { %5223 = vrcp.f32 %v1107_v35  ;;  %v793_v35 = vld [vmem:[%s6404_s6 + $0x30] sm:$0xff] }
 0x6d8   : > { %v1110_v6 = vpop.xlane.xlu0 %1109 }
 0x6d9   : > { %5225 = vrcp.f32 %v1110_v6  ;;  %v794_v6 = vld [vmem:[%s6404_s6 + $0x38] sm:$0xff] }
 0x6dc   : > { %v5157_v36 = vpop.permute.xlu0 %5156 }
 0x6dd   : > { %v5159_v37 = vunpack.i.h.bf16 %v5157_v36  ;;  %v5158_v38 = vunpack.i.l.bf16 %v5157_v36 }
 0x6df   : > { %v5224_v39 = vpop.eup %5223  ;;  %v4899_v40 = vpack.c.bf16 %v5159_v37, %v5158_v38  ;;  %v4909_v38 = vpack.c.bf16 %v794_v6, %v793_v35 }
 0x6e0   : > { %v1113_v41 = vmul.f32 %v5224_v39, %v5218_v21  ;;  %v5169_v21 = vunpack.i.h.bf16 %v5167_v17  ;;  %v2002_v17 = vld [vmem:[%s6408_s10 + $0x38] sm:$0xff] }
 0x6e1   : > { %4901 = vmatprep.subr.msk.bf16.mxu0 %vm5564_vm2, %v4899_v40 }
 0x6e2   : > { %4660 = vmatprep.mubr.msk.f32.mxu1 %vm801_vm1, %v1113_v41  ;;  %4904 = vmatpush3.bf16.xpose.msk.msra.mxu0 %vm5564_vm2, %v4899_v40 }
 0x6e3   : > { %v5226_v42 = vpop.eup %5225 }
 0x6e4   : > { %v1114_v43 = vmul.f32 %v5226_v42, %v5220_v23 }
 0x6e6   : > { %4661 = vmatmul.mubr.msk.f32.vlgmr.msra.gmra.mrb[6].mxu1 %vm801_vm1, %v1114_v43 }
 0x6e7   : > { %4880 = vmatpush3.bf16.msra.mxu1 %v4877_v52 }
 0x6e8   : > { %4882 = vmatprep.subr.bf16.mxu1 %v4881_v59 }
 0x6e9   : > { %4703 = vmatmul.mubr.msk.f32.vlgmr.msra.gmra.mrb[6].mxu0 %vm801_vm1, %v1656_v25  ;;  %v4905_v25 = vpack.c.bf16 %v5169_v21, %v5168_v8  ;;  %v2006_v21 = vld [vmem:[%s6408_s10 + $0x58] sm:$0xff] }
 0x6ea   : > { %2093 = vmatprep.mubr.f32.mxu0 %v5330_v33 }
 0x70d   : > { %v1466_v44 = vpop.xlane.xlu0 %1465 }
 0x70e   : > { %v1468_v45 = vsub.f32 %v1460_v30, %v1466_v44 }
 0x710   : > { %v1471_v46 = vmul.f32 1.442695, %v1468_v45 }
 0x711   : > { %v1475_v61 = vpop.xlane.xlu0 %1474 }
 0x712   : > { %5227 = vpow2.f32 %v1471_v46 }
 0x713   : > { %5229 = vrcp.f32 %v1475_v61 }
 0x71c   : > { %v5228_v47 = vpop.eup %5227 }
 0x71d   : > { %v1476_v48 = vsel %vm801_vm1, %v5228_v47, 0.0  ;;  %v5230_v62 = vpop.eup %5229 }
 0x71e   : > { %1477 = vadd.xlane.f32.xlu0 %v1476_v48  ;;  %v1481_v20 = vmul.f32 %v5230_v62, %v5634_v32  ;;  %v4915_v62 = vpack.c.bf16 %v1997_v15, %v1995_v14  ;;  %v2234_v15 = vld [vmem:[%s6410_s12 + $0xc0] sm:$0xff] }
 0x7ab   : > { %v1478_v0 = vpop.xlane.xlu0 %1477 }
 0x7ac   : > { %5231 = vrcp.f32 %v1478_v0 }
 0x7b6   : > { %v5232_v19 = vpop.eup %5231 }
 0x7b7   : > { %v1482_v23 = vmul.f32 %v5232_v19, %v5228_v47  ;;  %v4310_v47 = vld [vmem:[%s6405_s7] ss:$0 sm:$0xff] }
 0x7b9   : > { %v4662_v4 = vpop.f32.mrb[6].mxu1 }
 0x7ba   : > { %v1195_v5 = vpop.f32.mrb[7].mxu1 }
 0x7bb   : > { %4667 = vmatprep.mubr.msk.f32.mxu1 %vm801_vm1, %v1195_v5 }
 0x7bc   : > { %4668 = vmatmul.mubr.msk.f32.vlgmr.msra.gmra.mrb[8].mxu1 %vm801_vm1, %v4662_v4  ;;  %v4704_v9 = vpop.f32.mrb[6].mxu0 }
 0x7bd   : > { %4884 = vmatpush3.bf16.msra.mxu1 %v4881_v59  ;;  %4674 = vmatprep.mubr.msk.f32.mxu1 %vm801_vm1, %v5609_v58  ;;  %v1735_v10 = vpop.f32.mrb[7].mxu0  ;;  %v1745_v11 = vmul.f32 0.25, %v4704_v9 }
 0x7be   : > { %4892 = vmatprep.subr.bf16.mxu1 %v4891_v7  ;;  %v1744_v13 = vmul.f32 0.25, %v1735_v10 }
 0x7bf   : > { %v1747_v58 = vadd.f32 %v5585_v22, %v1745_v11  ;;  %v1998_v11 = vld [vmem:[%s6408_s10 + $0x18] sm:$0xff] }
 0x7c0   : > { %v1746_v16 = vadd.f32 %v5585_v22, %v1744_v13 }
 0x7c1   : > { %v1751_v24 = vsel %vm801_vm1, %v1747_v58, -inf }
 0x7c2   : > { %v1748_v2 = vsel %vm801_vm1, %v1746_v16, -inf }
 0x7c3   : > { %1749 = vmax.xlane.f32.xlu0 %v1748_v2 }
 0x7c4   : > { %4675 = vmatmul.mubr.msk.f32.vlgmr.msra.gmra.mrb[8].mxu1 %vm801_vm1, %v5607_v56 }
 0x7c5   : > { %4894 = vmatpush3.bf16.msra.mxu1 %v4891_v7  ;;  %4688 = vmatprep.mubr.msk.f32.mxu1 %vm801_vm1, %v1481_v20  ;;  %v2004_v20 = vld [vmem:[%s6408_s10 + $0x48] sm:$0xff] }
 0x7c6   : > { %4896 = vmatprep.subr.bf16.mxu1 %v4895_v18  ;;  %v4921_v8 = vpack.c.bf16 %v2006_v21, %v2004_v20  ;;  %v2220_v21 = vld [vmem:[%s6410_s12 + $0x50] sm:$0xff] }
 0x7c7   : > { %1752 = vmax.xlane.f32.xlu0 %v1751_v24  ;;  %v2005_v24 = vld [vmem:[%s6408_s10 + $0x50] sm:$0xff] }
 0x7c8   : > { %4689 = vmatmul.mubr.msk.f32.vlgmr.msra.gmra.mrb[10].mxu1 %vm801_vm1, %v1482_v23  ;;  %v2003_v23 = vld [vmem:[%s6408_s10 + $0x40] sm:$0xff] }
 0x7c9   : > { %4898 = vmatpush3.bf16.msra.mxu1 %v4895_v18  ;;  %v2001_v18 = vld [vmem:[%s6408_s10 + $0x30] sm:$0xff] }
 0x7ca   : > { %4906 = vmatprep.subr.bf16.mxu1 %v4905_v25 }
 0x850   : > { %v1750_v22 = vpop.xlane.xlu0 %1749 }
 0x851   : > { %v1754_v26 = vsub.f32 %v1746_v16, %v1750_v22  ;;  %v2000_v16 = vld [vmem:[%s6408_s10 + $0x28] sm:$0xff] }
 0x852   : > { %v4917_v2 = vpack.c.bf16 %v2002_v17, %v2000_v16  ;;  %v2008_v22 = vld [vmem:[%s6408_s10 + $0x68] sm:$0xff]  ;;  %v2218_v17 = vld [vmem:[%s6410_s12 + $0x40] sm:$0xff] }
 0x853   : > { %v1756_v27 = vmul.f32 1.442695, %v1754_v26  ;;  %v2010_v26 = vld [vmem:[%s6408_s10 + $0x78] sm:$0xff] }
 0x854   : > { %v1753_v28 = vpop.xlane.xlu0 %1752 }
 0x855   : > { %5233 = vpow2.f32 %v1756_v27  ;;  %v1755_v29 = vsub.f32 %v1747_v58, %v1753_v28  ;;  %v1999_v58 = vld [vmem:[%s6408_s10 + $0x20] sm:$0xff]  ;;  %v4925_v28 = vpack.c.bf16 %v2010_v26, %v2008_v22 }
 0x856   : > { %v4919_v19 = vpack.c.bf16 %v2001_v18, %v1999_v58  ;;  %v2007_v27 = vld [vmem:[%s6408_s10 + $0x60] sm:$0xff]  ;;  %v2236_v18 = vld [vmem:[%s6410_s12 + $0xd0] sm:$0xff] }
 0x857   : > { %v1758_v56 = vmul.f32 1.442695, %v1755_v29  ;;  %v2009_v29 = vld [vmem:[%s6408_s10 + $0x70] sm:$0xff]  ;;  %v2222_v26 = vld [vmem:[%s6410_s12 + $0x60] sm:$0xff] }
 0x859   : > { %5235 = vpow2.f32 %v1758_v56  ;;  %v4927_v56 = vpack.c.bf16 %v2009_v29, %v2007_v27  ;;  %v2223_v27 = vld [vmem:[%s6410_s12 + $0x68] sm:$0xff]  ;;  %v2240_v29 = vld [vmem:[%s6410_s12 + $0xf0] sm:$0xff] }
 0x85f   : > { %v5234_v30 = vpop.eup %5233 }
 0x860   : > { %v1760_v31 = vsel %vm801_vm1, %v5234_v30, 0.0 }
 0x861   : > { %1761 = vadd.xlane.f32.xlu0 %v1760_v31 }
 0x863   : > { %v5236_v32 = vpop.eup %5235 }
 0x864   : > { %v1763_v34 = vsel %vm801_vm1, %v5236_v32, 0.0 }
 0x865   : > { %1764 = vadd.xlane.f32.xlu0 %v1763_v34 }
 0x89b   : > { %v4690_v36 = vpop.f32.mrb[10].mxu1 }
 0x89c   : > { %v1561_v37 = vpop.f32.mrb[11].mxu1 }
 0x89d   : > { %4695 = vmatprep.mubr.msk.f32.mxu1 %vm801_vm1, %v1561_v37  ;;  %v4311_v37 = vld [vmem:[%s6406_s8] ss:$0 sm:$0xff] }
 0x89e   : > { %4696 = vmatmul.mubr.msk.f32.vlgmr.msra.gmra.mrb[8].mxu1 %vm801_vm1, %v4690_v36 }
 0x89f   : > { %4908 = vmatpush3.bf16.msra.mxu1 %v4905_v25  ;;  %v4923_v25 = vpack.c.bf16 %v2005_v24, %v2003_v23  ;;  %v2238_v24 = vld [vmem:[%s6410_s12 + $0xe0] sm:$0xff] }
 0x8a0   : > { %4910 = vmatprep.subr.bf16.mxu1 %v4909_v38 }
 0x8ee   : > { %v1762_v39 = vpop.xlane.xlu0 %1761 }
 0x8ef   : > { %5237 = vrcp.f32 %v1762_v39  ;;  %v4312_v39 = vld [vmem:[%s6407_s9] ss:$0 sm:$0xff] }
 0x8f2   : > { %v1765_v40 = vpop.xlane.xlu0 %1764 }
 0x8f3   : > { %5239 = vrcp.f32 %v1765_v40 }
 0x8f9   : > { %v5238_v41 = vpop.eup %5237 }
 0x8fa   : > { %v1768_v42 = vmul.f32 %v5238_v41, %v5234_v30 }
 0x8fc   : > { %4709 = vmatprep.mubr.msk.f32.mxu1 %vm801_vm1, %v1768_v42 }
 0x8fd   : > { %v5240_v43 = vpop.eup %5239 }
 0x8fe   : > { %v1769_v44 = vmul.f32 %v5240_v43, %v5236_v32 }
 0x900   : > { %4710 = vmatmul.mubr.msk.f32.vlgmr.msra.gmra.mrb[12].mxu1 %vm801_vm1, %v1769_v44 }
 0x901   : > { %4912 = vmatpush3.bf16.msra.mxu1 %v4909_v38 }
 0x9d3   : > { %v4711_v45 = vpop.f32.mrb[12].mxu1 }
 0x9d4   : > { %v1848_v46 = vpop.f32.mrb[13].mxu1 }
 0x9d5   : > { %4716 = vmatprep.mubr.msk.f32.mxu1 %vm801_vm1, %v1848_v46  ;;  %v2226_v46 = vld [vmem:[%s6410_s12 + $0x80] sm:$0xff] }
 0x9d6   : > { %4717 = vmatmul.mubr.msk.f32.vlgmr.msra.gmra.mrb[8].mxu1 %vm801_vm1, %v4711_v45 }
 0xaa9   : > { %v4718_v48 = vpop.f32.mrb[8].mxu1 }
 0xaaa   : > { %v1948_v49 = vadd.f32 %v4718_v48, %v4310_v47  ;;  %v1929_v50 = vpop.f32.mrb[9].mxu1 }
 0xaab   : > { %v1947_v52 = vadd.f32 %v4310_v47, %v1929_v50  ;;  %v2227_v47 = vld [vmem:[%s6410_s12 + $0x88] sm:$0xff] }
 0xaac   : > { %v1950_v53 = vadd.f32 %v1948_v49, %v5527_v54  ;;  %v4929_v48 = vpack.c.bf16 %v2227_v47, %v2226_v46  ;;  %v2210_v49 = vld [vmem:[%s6410_s12] sm:$0xff]  ;;  %v2211_v50 = vld [vmem:[%s6410_s12 + $0x8] sm:$0xff] }
 0xaad   : > { %v1949_v55 = vadd.f32 %v1947_v52, %v5522_v51  ;;  %v1996_v51 = vld [vmem:[%s6408_s10 + $0x8] sm:$0xff]  ;;  %v4931_v52 = vpack.c.bf16 %v2211_v50, %v2210_v49 }
 0xaae   : > { %v1956_v59 = vsel %vm632_vm0, %v1950_v53, 0.0  ;;  %v4913_v13 = vpack.c.bf16 %v1998_v11, %v1996_v51  ;;  %4930 = vmatprep.subr.bf16.mxu1 %v4929_v48  ;;  %v2216_v11 = vld [vmem:[%s6410_s12 + $0x30] sm:$0xff] }
 0xaaf   : > { %1957 = vadd.xlane.f32.xlu1 %v1956_v59  ;;  %v1953_v61 = vsel %vm632_vm0, %v1949_v55, 0.0  ;;  %4932 = vmatpush3.bf16.msra.mxu1 %v4931_v52 }
 0xab0   : > { %1954 = vadd.xlane.f32.xlu0 %v1953_v61  ;;  %4914 = vmatprep.subr.bf16.mxu0 %v4913_v13  ;;  %v2212_v61 = vld [vmem:[%s6410_s12 + $0x10] sm:$0xff]  ;;  %v2217_v13 = vld [vmem:[%s6410_s12 + $0x38] sm:$0xff] }
 0xab1   : > { %4916 = vmatpush1.bf16.msra.mxu0 %v4915_v62  ;;  %v4943_v14 = vpack.c.bf16 %v2217_v13, %v2216_v11  ;;  %v2235_v62 = vld [vmem:[%s6410_s12 + $0xc8] sm:$0xff] }
 0xab2   : > { %4918 = vmatprep.subr.bf16.mxu0 %v4917_v2  ;;  %v4945_v16 = vpack.c.bf16 %v2235_v62, %v2234_v15  ;;  %v2219_v2 = vld [vmem:[%s6410_s12 + $0x48] sm:$0xff] }
 0xab3   : > { %v4947_v58 = vpack.c.bf16 %v2219_v2, %v2218_v17 }
 0xab5   : > { %4920 = vmatpush1.bf16.msra.mxu0 %v4919_v19  ;;  %v2237_v19 = vld [vmem:[%s6410_s12 + $0xd8] sm:$0xff] }
 0xab6   : > { %4922 = vmatprep.subr.bf16.mxu0 %v4921_v8  ;;  %v4949_v20 = vpack.c.bf16 %v2237_v19, %v2236_v18  ;;  %v2221_v8 = vld [vmem:[%s6410_s12 + $0x58] sm:$0xff] }
 0xab7   : > { %v4951_v23 = vpack.c.bf16 %v2221_v8, %v2220_v21 }
 0xab9   : > { %4924 = vmatpush1.bf16.msra.mxu0 %v4923_v25  ;;  %v2239_v25 = vld [vmem:[%s6410_s12 + $0xe8] sm:$0xff] }
 0xaba   : > { %4926 = vmatprep.subr.bf16.mxu0 %v4925_v28  ;;  %v4953_v22 = vpack.c.bf16 %v2239_v25, %v2238_v24  ;;  %v4955_v28 = vpack.c.bf16 %v2223_v27, %v2222_v26 }
 0xabd   : > { %4928 = vmatpush1.bf16.msra.mxu0 %v4927_v56  ;;  %v2241_v56 = vld [vmem:[%s6410_s12 + $0xf8] sm:$0xff] }
 0xb3c   : > { %v1958_v63 = vpop.xlane.xlu1 %1957 }
 0xb3d   : > { %v1960_v0 = vmul.f32 0.015625, %v1958_v63  ;;  %v1955_v1 = vpop.xlane.xlu0 %1954  ;;  %v2213_v63 = vld [vmem:[%s6410_s12 + $0x18] sm:$0xff] }
 0xb3e   : > { %v1959_v3 = vmul.f32 0.015625, %v1955_v1  ;;  %v2230_v1 = vld [vmem:[%s6410_s12 + $0xa0] sm:$0xff] }
 0xb3f   : > { %v1962_v4 = vsub.f32 %v1950_v53, %v1960_v0  ;;  %v2228_v53 = vld [vmem:[%s6410_s12 + $0x90] sm:$0xff]  ;;  %v4935_v0 = vpack.c.bf16 %v2213_v63, %v2212_v61 }
 0xb40   : > { %v1961_v5 = vsub.f32 %v1949_v55, %v1959_v3  ;;  %v2229_v55 = vld [vmem:[%s6410_s12 + $0x98] sm:$0xff]  ;;  %v2231_v3 = vld [vmem:[%s6410_s12 + $0xa8] sm:$0xff] }
 0xb41   : > { %v1964_v10 = vmul.f32 %v1962_v4, %v1962_v4  ;;  %v4933_v59 = vpack.c.bf16 %v2229_v55, %v2228_v53 }
 0xb42   : > { %v1963_v7 = vmul.f32 %v1961_v5, %v1961_v5 }
 0xb43   : > { %v1968_v54 = vsel %vm632_vm0, %v1964_v10, 0.0  ;;  %4934 = vmatprep.subr.bf16.mxu1 %v4933_v59  ;;  %v2232_v10 = vld [vmem:[%s6410_s12 + $0xb0] sm:$0xff] }
 0xb44   : > { %v1965_v9 = vsel %vm632_vm0, %v1963_v7, 0.0  ;;  %4936 = vmatpush3.bf16.msra.mxu1 %v4935_v0  ;;  %v2215_v7 = vld [vmem:[%s6410_s12 + $0x28] sm:$0xff] }
 0xb45   : > { %1966 = vadd.xlane.f32.xlu0 %v1965_v9 }
 0xb49   : > { %1969 = vadd.xlane.f32.xlu0 %v1968_v54  ;;  %v2233_v54 = vld [vmem:[%s6410_s12 + $0xb8] sm:$0xff] }
 0xb4a   : > { %v4941_v51 = vpack.c.bf16 %v2233_v54, %v2232_v10 }
 0xbd2   : > { %v1967_v30 = vpop.xlane.xlu0 %1966 }
 0xbd3   : > { %v1971_v31 = vmul.f32 0.015625, %v1967_v30  ;;  %v4957_v30 = vpack.c.bf16 %v2241_v56, %v2240_v29 }
 0xbd5   : > { %v1973_v32 = vadd.f32 1e-12, %v1971_v31  ;;  %v2224_v31 = vld [vmem:[%s6410_s12 + $0x70] sm:$0xff] }
 0xbd6   : > { %v1970_v34 = vpop.xlane.xlu0 %1969 }
 0xbd7   : > { %5241 = vrsqrt.f32 %v1973_v32  ;;  %v1972_v35 = vmul.f32 0.015625, %v1970_v34  ;;  %v2225_v32 = vld [vmem:[%s6410_s12 + $0x78] sm:$0xff] }
 0xbd8   : > { %v4959_v34 = vpack.c.bf16 %v2225_v32, %v2224_v31 }
 0xbd9   : > { %v1974_v6 = vadd.f32 1e-12, %v1972_v35  ;;  %v2011_v35 = vld [vmem:[%s6409_s11] sm:$0x3] }
 0xbdb   : > { %5243 = vrsqrt.f32 %v1974_v6  ;;  %v2016_v6 = vrot.slane %v2011_v35, %v5531_v57 }
 0xbe1   : > { %v5242_v36 = vpop.eup %5241 }
 0xbe2   : > { %v1977_v38 = vmul.f32 %v5242_v36, %v1961_v5  ;;  %v2214_v5 = vld [vmem:[%s6410_s12 + $0x20] sm:$0xff]  ;;  %v2020_v36 = vrot.slane %v2011_v35, %v5537_v60 }
 0xbe3   : > { %v4939_v9 = vpack.c.bf16 %v2215_v7, %v2214_v5 }
 0xbe4   : > { %v1985_v40 = vmul.f32 %v4311_v37, %v1977_v38 }
 0xbe5   : > { %v5244_v41 = vpop.eup %5243 }
 0xbe6   : > { %v5755_v42 = vadd.f32 %v4312_v39, %v1985_v40  ;;  %v1978_v43 = vmul.f32 %v5244_v41, %v1962_v4  ;;  %v4937_v4 = vpack.c.bf16 %v2231_v3, %v2230_v1 }
 0xbe8   : > { %4313 = vmatmul.mubr.msk.f32.vlgmr.msra.gmra.mrb[8].mxu0 %vm632_vm0, %v5755_v42  ;;  %v1986_v44 = vmul.f32 %v4311_v37, %v1978_v43  ;;  %4938 = vmatprep.subr.bf16.mxu1 %v4937_v4 }
 0xbe9   : > { %2099 = vmatprep.mubr.f32.mxu0 %v5330_v33  ;;  %4940 = vmatpush3.bf16.msra.mxu1 %v4939_v9 }
 0xbea   : > { %v5760_v45 = vadd.f32 %v4312_v39, %v1986_v44  ;;  %4942 = vmatprep.subr.bf16.mxu1 %v4941_v51 }
 0xbec   : > { %4314 = vmatmul.mubr.msk.f32.gmra.mrb[10].mxu0 %vm632_vm0, %v5760_v45 }
 0xbed   : > { %2470 = vmatprep.mubr.f32.mxu0 %v5330_v33  ;;  %4944 = vmatpush3.bf16.msra.mxu1 %v4943_v14 }
 0xbee   : > { %4946 = vmatprep.subr.bf16.mxu1 %v4945_v16 }
 0xbf1   : > { %4948 = vmatpush3.bf16.msra.mxu1 %v4947_v58 }
 0xbf2   : > { %4950 = vmatprep.subr.bf16.mxu1 %v4949_v20 }
 0xbf5   : > { %4952 = vmatpush3.bf16.msra.mxu1 %v4951_v23 }
 0xbf6   : > { %4954 = vmatprep.subr.bf16.mxu1 %v4953_v22 }
 0xbf9   : > { %4956 = vmatpush3.bf16.msra.mxu1 %v4955_v28 }
 0xbfa   : > { %4958 = vmatprep.subr.bf16.mxu1 %v4957_v30 }
 0xbfd   : > { %4960 = vmatpush3.bf16.msra.mxu1 %v4959_v34 }
 0xcbb   : > { %v2095_v37 = vpop.f32.mrb[8].mxu0 }
 0xcbc   : > { %v5866_v38 = vadd.f32 %v2095_v37, %v2016_v6  ;;  %v2097_v39 = vpop.f32.mrb[9].mxu0 }
 0xcbd   : > { %v5868_v40 = vadd.f32 %v2097_v39, %v2020_v36 }
 0xcbe   : > { %v5871_v41 = vmul.f32 0.70710677, %v5866_v38 }
 0xcbf   : > { %v5874_v43 = vmul.f32 0.70710677, %v5868_v40  ;;  %v2101_v44 = vpop.f32.mrb[10].mxu0 }
 0xcc0   : > { %v2114_v46 = vand.u32 2147483647, %v5871_v41  ;;  %v5877_v47 = vadd.f32 %v2101_v44, %v2016_v6  ;;  %v2103_v48 = vpop.f32.mrb[11].mxu0  ;;  %vm2190_vm3 = vcmp.ge.f32.partialorder %v5871_v41, 0.0 }
 0xcc1   : > { %v2115_v49 = vand.u32 2147483647, %v5874_v43  ;;  %v5880_v50 = vadd.f32 %v2103_v48, %v2020_v36  ;;  %vm2191_vm4 = vcmp.ge.f32.partialorder %v5874_v43, 0.0 }
 0xcc2   : > { %v2118_v52 = vmul.f32 0.3275911, %v2114_v46  ;;  %v5883_v53 = vmul.f32 0.70710677, %v5877_v47  ;;  %v2166_v9 = vsub.f32 0.0, %v2114_v46 }
 0xcc3   : > { %v2119_v55 = vmul.f32 0.3275911, %v2115_v49  ;;  %v5886_v59 = vmul.f32 0.70710677, %v5880_v50  ;;  %v2167_v10 = vsub.f32 0.0, %v2115_v49 }
 0xcc4   : > { %v2122_v61 = vadd.f32 1.0, %v2118_v52  ;;  %v2116_v63 = vand.u32 2147483647, %v5883_v53  ;;  %v2170_v51 = vmul.f32 %v2166_v9, %v2114_v46  ;;  %vm2192_vm5 = vcmp.ge.f32.partialorder %v5883_v53, 0.0  ;;  %v4315_v53 = vld [vmem:[%s6411_s13] ss:$0 sm:$0xff] }
 0xcc5   : > { %v2123_v0 = vadd.f32 1.0, %v2119_v55  ;;  %v2117_v1 = vand.u32 2147483647, %v5886_v59  ;;  %v2171_v15 = vmul.f32 %v2167_v10, %v2115_v49  ;;  %vm2193_vm6 = vcmp.ge.f32.partialorder %v5886_v59, 0.0 }
 0xcc6   : > { %5245 = vrcp.f32 %v2122_v61  ;;  %v2120_v3 = vmul.f32 0.3275911, %v2116_v63  ;;  %v2168_v11 = vsub.f32 0.0, %v2116_v63  ;;  %v2174_v58 = vmul.f32 1.442695, %v2170_v51 }
 0xcc7   : > { %5247 = vrcp.f32 %v2123_v0  ;;  %v2121_v4 = vmul.f32 0.3275911, %v2117_v1  ;;  %v2169_v62 = vsub.f32 0.0, %v2117_v1  ;;  %v2176_v8 = vmul.f32 1.442695, %v2171_v15 }
 0xcc8   : > { %v2124_v5 = vadd.f32 1.0, %v2120_v3  ;;  %v2172_v18 = vmul.f32 %v2168_v11, %v2116_v63 }
 0xcc9   : > { %v2125_v7 = vadd.f32 1.0, %v2121_v4  ;;  %v2173_v23 = vmul.f32 %v2169_v62, %v2117_v1 }
 0xcca   : > { %5249 = vrcp.f32 %v2124_v5  ;;  %v2178_v28 = vmul.f32 1.442695, %v2172_v18 }
 0xccb   : > { %5251 = vrcp.f32 %v2125_v7  ;;  %v2180_v31 = vmul.f32 1.442695, %v2173_v23 }
 0xccc   : > { %5253 = vpow2.f32 %v2174_v58 }
 0xccd   : > { %5255 = vpow2.f32 %v2176_v8 }
 0xcce   : > { %5257 = vpow2.f32 %v2178_v28 }
 0xccf   : > { %5259 = vpow2.f32 %v2180_v31 }
 0xcd0   : > { %v5246_v54 = vpop.eup %5245 }
 0xcd1   : > { %v5248_v13 = vpop.eup %5247  ;;  %v2130_v14 = vmul.f32 1.0614054, %v5246_v54 }
 0xcd2   : > { %v2131_v16 = vmul.f32 1.0614054, %v5248_v13 }
 0xcd3   : > { %v2134_v17 = vadd.f32 -1.4531521, %v2130_v14 }
 0xcd4   : > { %v5250_v2 = vpop.eup %5249  ;;  %v2135_v19 = vadd.f32 -1.4531521, %v2131_v16 }
 0xcd5   : > { %v5252_v20 = vpop.eup %5251  ;;  %v2138_v21 = vmul.f32 %v5246_v54, %v2134_v17  ;;  %v2132_v24 = vmul.f32 1.0614054, %v5250_v2 }
 0xcd6   : > { %v2139_v25 = vmul.f32 %v5248_v13, %v2135_v19  ;;  %v2133_v22 = vmul.f32 1.0614054, %v5252_v20  ;;  %v5254_v3 = vpop.eup %5253 }
 0xcd7   : > { %v2142_v26 = vadd.f32 1.4214138, %v2138_v21  ;;  %v2136_v27 = vadd.f32 -1.4531521, %v2132_v24  ;;  %v5256_v7 = vpop.eup %5255 }
 0xcd8   : > { %v2143_v29 = vadd.f32 1.4214138, %v2139_v25  ;;  %v2137_v56 = vadd.f32 -1.4531521, %v2133_v22  ;;  %v5258_v62 = vpop.eup %5257  ;;  %v2107_v22 = vmul.f32 0.5, %v5868_v40  ;;  %v2108_v40 = vmul.f32 0.5, %v5877_v47 }
 0xcd9   : > { %v2146_v30 = vmul.f32 %v5246_v54, %v2142_v26  ;;  %v2140_v32 = vmul.f32 %v5250_v2, %v2136_v27  ;;  %v5260_v58 = vpop.eup %5259 }
 0xcda   : > { %v2147_v34 = vmul.f32 %v5248_v13, %v2143_v29  ;;  %v2141_v35 = vmul.f32 %v5252_v20, %v2137_v56 }
 0xcdb   : > { %v2150_v6 = vadd.f32 -0.28449672, %v2146_v30  ;;  %v2144_v36 = vadd.f32 1.4214138, %v2140_v32  ;;  %v2109_v30 = vmul.f32 0.5, %v5880_v50 }
 0xcdc   : > { %v2151_v37 = vadd.f32 -0.28449672, %v2147_v34  ;;  %v2145_v39 = vadd.f32 1.4214138, %v2141_v35 }
 0xcdd   : > { %v2154_v44 = vmul.f32 %v5246_v54, %v2150_v6  ;;  %v2148_v46 = vmul.f32 %v5250_v2, %v2144_v36 }
 0xcde   : > { %v2155_v48 = vmul.f32 %v5248_v13, %v2151_v37  ;;  %v2149_v49 = vmul.f32 %v5252_v20, %v2145_v39 }
 0xcdf   : > { %v2158_v52 = vadd.f32 0.2548296, %v2154_v44  ;;  %v2152_v55 = vadd.f32 -0.28449672, %v2148_v46 }
 0xce0   : > { %v2159_v61 = vadd.f32 0.2548296, %v2155_v48  ;;  %v2153_v63 = vadd.f32 -0.28449672, %v2149_v49 }
 0xce1   : > { %v2162_v0 = vmul.f32 %v5246_v54, %v2158_v52  ;;  %v2156_v1 = vmul.f32 %v5250_v2, %v2152_v55 }
 0xce2   : > { %v2163_v4 = vmul.f32 %v5248_v13, %v2159_v61  ;;  %v2157_v5 = vmul.f32 %v5252_v20, %v2153_v63 }
 0xce3   : > { %v2182_v9 = vmul.f32 %v5254_v3, %v2162_v0  ;;  %v2160_v10 = vadd.f32 0.2548296, %v2156_v1 }
 0xce4   : > { %v2183_v51 = vmul.f32 %v5256_v7, %v2163_v4  ;;  %v2161_v11 = vadd.f32 0.2548296, %v2157_v5  ;;  %v4321_v5 = vld [vmem:[%s6435_s4 + $0x98] sm:$0xff] }
 0xce5   : > { %v2186_v14 = vsub.f32 1.0, %v2182_v9  ;;  %v2164_v15 = vmul.f32 %v5250_v2, %v2160_v10  ;;  %v4318_v9 = vld [vmem:[%s6435_s4 + $0x80] sm:$0xff]  ;;  %v4320_v10 = vld [vmem:[%s6435_s4 + $0x90] sm:$0xff] }
 0xce6   : > { %v2187_v16 = vsub.f32 1.0, %v2183_v51  ;;  %v2165_v17 = vmul.f32 %v5252_v20, %v2161_v11  ;;  %v2106_v20 = vmul.f32 0.5, %v5866_v38  ;;  %v4963_v51 = vpack.c.bf16 %v4320_v10, %v4318_v9  ;;  %v4323_v11 = vld [vmem:[%s6435_s4 + $0xa8] sm:$0xff] }
 0xce7   : > { %v2194_v18 = vsub.f32 0.0, %v2186_v14  ;;  %v2184_v19 = vmul.f32 %v5258_v62, %v2164_v15  ;;  %v4322_v62 = vld [vmem:[%s6435_s4 + $0xa0] sm:$0xff] }
 0xce8   : > { %v2195_v54 = vsub.f32 0.0, %v2187_v16  ;;  %v2185_v21 = vmul.f32 %v5260_v58, %v2165_v17  ;;  %v4327_v58 = vld [vmem:[%s6435_s4 + $0xc8] sm:$0xff] }
 0xce9   : > { %v2198_v8 = vsel %vm2190_vm3, %v2186_v14, %v2194_v18  ;;  %v2188_v13 = vsub.f32 1.0, %v2184_v19  ;;  %v4325_v14 = vld [vmem:[%s6435_s4 + $0xb8] sm:$0xff] }
 0xcea   : > { %v2202_v23 = vadd.f32 1.0, %v2198_v8  ;;  %v2199_v24 = vsel %vm2191_vm4, %v2187_v16, %v2195_v54  ;;  %v2189_v25 = vsub.f32 1.0, %v2185_v21  ;;  %v4965_v15 = vpack.c.bf16 %v4325_v14, %v4323_v11  ;;  %v4324_v16 = vld [vmem:[%s6435_s4 + $0xb0] sm:$0xff]  ;;  %v4329_v18 = vld [vmem:[%s6435_s4 + $0xd8] sm:$0xff]  ;;  %v4326_v54 = vld [vmem:[%s6435_s4 + $0xc0] sm:$0xff] }
 0xceb   : > { %v2203_v2 = vadd.f32 1.0, %v2199_v24  ;;  %v2196_v26 = vsub.f32 0.0, %v2188_v13  ;;  %v4967_v17 = vpack.c.bf16 %v4324_v16, %v4322_v62  ;;  %v4969_v19 = vpack.c.bf16 %v4329_v18, %v4327_v58  ;;  %v4328_v21 = vld [vmem:[%s6435_s4 + $0xd0] sm:$0xff]  ;;  %v6008_v58 = vld [vmem:[%s5582_s30] ss:$0 sm:$0xff]  ;;  %s6443_s30 = smov 32  }
 0xcec   : > { %v2197_v27 = vsub.f32 0.0, %v2189_v25  ;;  %v2206_v29 = vmul.f32 %v2202_v23, %v2106_v20  ;;  %v4971_v8 = vpack.c.bf16 %v4328_v21, %v4326_v54  ;;  %v4333_v23 = vld [vmem:[%s6435_s4 + $0xf8] sm:$0xff] }
 0xced   : > { %v2207_v41 = vmul.f32 %v2203_v2, %v2107_v22  ;;  %v2200_v28 = vsel %vm2192_vm5, %v2188_v13, %v2196_v26  ;;  %v4331_v13 = vld [vmem:[%s6435_s4 + $0xe8] sm:$0xff]  ;;  %v4332_v22 = vld [vmem:[%s6435_s4 + $0xf0] sm:$0xff] }
 0xcee   : > { %v2201_v56 = vsel %vm2193_vm6, %v2189_v25, %v2197_v27  ;;  %v2204_v43 = vadd.f32 1.0, %v2200_v28  ;;  %v4973_v24 = vpack.c.bf16 %v4333_v23, %v4331_v13  ;;  %v4330_v25 = vld [vmem:[%s6435_s4 + $0xe0] sm:$0xff] }
 0xcef   : > { %2313 = vmatprep.mubr.f32.mxu1 %v2207_v41  ;;  %v2205_v31 = vadd.f32 1.0, %v2201_v56  ;;  %v4975_v2 = vpack.c.bf16 %v4332_v22, %v4330_v25 }
 0xcf0   : > { %2314 = vmatmul.mubr.f32.vlgmr.msra.gmra.mrb[14].mxu1 %v2206_v29  ;;  %v2208_v34 = vmul.f32 %v2204_v43, %v2108_v40  ;;  %v4316_v43 = vld [vmem:[%s6412_s14] ss:$0 sm:$0xff] }
 0xcf1   : > { %v2209_v32 = vmul.f32 %v2205_v31, %v2109_v30  ;;  %v4317_v31 = vld [vmem:[%s6413_s15] ss:$0 sm:$0xff] }
 0xcf3   : > { %2318 = vmatprep.mubr.f32.mxu1 %v2209_v32 }
 0xcf4   : > { %2319 = vmatmul.mubr.f32.gmra.mrb[16].mxu1 %v2208_v34 }
 0xdc3   : > { %v4525_v38 = vpop.f32.mrb[14].mxu1 }
 0xdc4   : > { %v4526_v59 = vpop.f32.mrb[15].mxu1 }
 0xdc5   : > { %v4527_v35 = vadd.f32 %v4526_v59, %v4525_v38 }
 0xdc7   : > { %v2316_v6 = vadd.f32 %v4527_v35, %v4315_v53  ;;  %v4528_v36 = vpop.f32.mrb[16].mxu1  ;;  %v4334_v35 = vld [vmem:[%s6403_s5 + $0x2] sm:$0x3] }
 0xdc8   : > { %v4529_v37 = vpop.f32.mrb[17].mxu1 }
 0xdc9   : > { %v4530_v50 = vadd.f32 %v4529_v37, %v4528_v36  ;;  %v2324_v39 = vadd.f32 %v2316_v6, %v5755_v42  ;;  %v2393_v6 = vrot.slane %v4334_v35, %v5531_v57 }
 0xdcb   : > { %v2321_v44 = vadd.f32 %v4530_v50, %v4315_v53  ;;  %v2328_v47 = vsel %vm632_vm0, %v2324_v39, 0.0 }
 0xdcc   : > { %2329 = vadd.xlane.f32.xlu0 %v2328_v47 }
 0xdcd   : > { %v2325_v46 = vadd.f32 %v2321_v44, %v5760_v45  ;;  %v4319_v45 = vld [vmem:[%s6435_s4 + $0x88] sm:$0xff] }
 0xdce   : > { %v4961_v7 = vpack.c.bf16 %v4321_v5, %v4319_v45 }
 0xdcf   : > { %v2331_v48 = vsel %vm632_vm0, %v2325_v46, 0.0 }
 0xdd0   : > { %2332 = vadd.xlane.f32.xlu0 %v2331_v48  ;;  %4962 = vmatprep.subr.bf16.mxu0 %v4961_v7 }
 0xdd1   : > { %4964 = vmatpush1.bf16.msra.mxu0 %v4963_v51 }
 0xdd2   : > { %4966 = vmatprep.subr.bf16.mxu0 %v4965_v15 }
 0xdd5   : > { %4968 = vmatpush1.bf16.msra.mxu0 %v4967_v17 }
 0xdd6   : > { %4970 = vmatprep.subr.bf16.mxu0 %v4969_v19 }
 0xdd9   : > { %4972 = vmatpush1.bf16.msra.mxu0 %v4971_v8 }
 0xdda   : > { %4974 = vmatprep.subr.bf16.mxu0 %v4973_v24 }
 0xddd   : > { %4976 = vmatpush1.bf16.msra.mxu0 %v4975_v2 }
 0xe59   : > { %v2330_v49 = vpop.xlane.xlu0 %2329 }
 0xe5a   : > { %v2334_v52 = vmul.f32 0.015625, %v2330_v49 }
 0xe5c   : > { %v2336_v55 = vsub.f32 %v2324_v39, %v2334_v52  ;;  %v2397_v39 = vrot.slane %v4334_v35, %v5537_v60 }
 0xe5d   : > { %v2333_v61 = vpop.xlane.xlu0 %2332 }
 0xe5e   : > { %v2335_v63 = vmul.f32 0.015625, %v2333_v61  ;;  %v2338_v0 = vmul.f32 %v2336_v55, %v2336_v55 }
 0xe60   : > { %v2337_v1 = vsub.f32 %v2325_v46, %v2335_v63  ;;  %v2340_v3 = vsel %vm632_vm0, %v2338_v0, 0.0 }
 0xe61   : > { %2341 = vadd.xlane.f32.xlu0 %v2340_v3 }
 0xe62   : > { %v2339_v42 = vmul.f32 %v2337_v1, %v2337_v1 }
 0xe64   : > { %v2343_v4 = vsel %vm632_vm0, %v2339_v42, 0.0 }
 0xe65   : > { %2344 = vadd.xlane.f32.xlu0 %v2343_v4 }
 0xeee   : > { %v2342_v26 = vpop.xlane.xlu0 %2341 }
 0xeef   : > { %v2346_v20 = vmul.f32 0.015625, %v2342_v26 }
 0xef1   : > { %v2348_v27 = vadd.f32 1e-12, %v2346_v20 }
 0xef2   : > { %v2345_v41 = vpop.xlane.xlu0 %2344 }
 0xef3   : > { %5261 = vrsqrt.f32 %v2348_v27  ;;  %v2347_v28 = vmul.f32 0.015625, %v2345_v41 }
 0xef5   : > { %v2349_v29 = vadd.f32 1e-12, %v2347_v28 }
 0xef7   : > { %5263 = vrsqrt.f32 %v2349_v29 }
 0xefd   : > { %v5262_v56 = vpop.eup %5261 }
 0xefe   : > { %v2352_v30 = vmul.f32 %v5262_v56, %v2336_v55 }
 0xf00   : > { %v2360_v40 = vmul.f32 %v4316_v43, %v2352_v30 }
 0xf01   : > { %v5264_v32 = vpop.eup %5263 }
 0xf02   : > { %v5961_v34 = vadd.f32 %v4317_v31, %v2360_v40  ;;  %v2353_v38 = vmul.f32 %v5264_v32, %v2337_v1 }
 0xf04   : > { %4335 = vmatmul.mubr.msk.f32.vlgmr.msra.gmra.mrb[12].mxu0 %vm632_vm0, %v5961_v34  ;;  %v2361_v53 = vmul.f32 %v4316_v43, %v2353_v38 }
 0xf05   : > { %2476 = vmatprep.mubr.f32.mxu0 %v5330_v33 }
 0xf06   : > { %v5966_v59 = vadd.f32 %v4317_v31, %v2361_v53 }
 0xf08   : > { %4336 = vmatmul.mubr.msk.f32.gmra.mrb[14].mxu0 %vm632_vm0, %v5966_v59 }
 0xfd7   : > { %v2472_v36 = vpop.f32.mrb[12].mxu0 }
 0xfd8   : > { %v5974_v37 = vadd.f32 %v2472_v36, %v2393_v6  ;;  %v2474_v50 = vpop.f32.mrb[13].mxu0 }
 0xfd9   : > { %v2475_v48 = vadd.f32 %v2474_v50, %v2397_v39 }
 0xfda   : > { %4723 = vmatprep.mubr.msk.f32.mxu0 %vm801_vm1, %v5974_v37 }
 0xfdb   : > { %v2478_v44 = vpop.f32.mrb[14].mxu0 }
 0xfdc   : > { %v5979_v47 = vadd.f32 %v2478_v44, %v2393_v6  ;;  %v2480_v46 = vpop.f32.mrb[15].mxu0 }
 0xfdd   : > { %v2481_v49 = vadd.f32 %v2480_v46, %v2397_v39 }
 0xfde   : > { %v5983_v52 = vpack.i.bf16 %v5979_v47, %v5974_v37 }
 0xfdf   : > { %v4983_v55 = vpack.c.bf16 %v2481_v49, %v2475_v48  ;;  %v5985_v61 = vpack.i.bf16 %v2481_v49, %v2475_v48 }
 0xfe0   : > { %5176 = vrot.lane.b32.xlu1 %v5983_v52, %s5335_s22  ;;  %5171 = vrot.lane.b32.xlu0 %v5983_v52, %s6441_s24  ;;  %s6444_s22 = smov 96  }
 0xfe4   : > { %2688 = vrot.lane.b32.xlu0 %v5974_v37, %s6442_s27 }
 0xfe8   : > { %2690 = vrot.lane.b32.xlu0 %v5979_v47, %s6442_s27 }
0x1052   : > { %v5177_v63 = vpop.permute.xlu1 %5176  ;;  %v5172_v0 = vpop.permute.xlu0 %5171 }
0x1053   : > { %v5179_v1 = vunpack.i.h.bf16 %v5177_v63  ;;  %v5178_v3 = vunpack.i.l.bf16 %v5177_v63  ;;  %v5174_v42 = vunpack.i.h.bf16 %v5172_v0  ;;  %v5173_v4 = vunpack.i.l.bf16 %v5172_v0 }
0x1055   : > { %v4987_v45 = vpack.c.bf16 %v5179_v1, %v5178_v3  ;;  %v4977_v5 = vpack.c.bf16 %v5174_v42, %v5173_v4 }
0x1056   : > { %v2689_v7 = vpop.permute.xlu0 %2688 }
0x1057   : > { %4979 = vmatprep.subr.msk.bf16.mxu0 %vm5564_vm2, %v4977_v5  ;;  %4989 = vmatprep.subr.msk.bf16.mxu1 %vm5564_vm2, %v4987_v45 }
0x1058   : > { %4737 = vmatprep.mubr.msk.f32.mxu1 %vm801_vm1, %v2689_v7  ;;  %4982 = vmatpush3.bf16.xpose.msk.msra.mxu0 %vm5564_vm2, %v4977_v5 }
0x1059   : > { %4992 = vmatpush3.bf16.xpose.msk.msra.mxu1 %vm5564_vm2, %v4987_v45  ;;  %4984 = vmatprep.subr.bf16.mxu0 %v4983_v55 }
0x105a   : > { %v2691_v9 = vpop.permute.xlu0 %2690 }
0x105f   : > { %4724 = vmatmul.mubr.msk.f32.vlgmr.msra.gmra.mrb[16].mxu0 %vm801_vm1, %v5979_v47 }
0x1060   : > { %4738 = vmatmul.mubr.msk.f32.vlgmr.msra.gmra.mrb[18].mxu1 %vm801_vm1, %v2691_v9  ;;  %4986 = vmatpush3.bf16.msra.mxu0 %v4983_v55 }
0x1132   : > { %v4725_v10 = vpop.f32.mrb[16].mxu0 }
0x1133   : > { %v2582_v51 = vmul.f32 0.25, %v4725_v10  ;;  %v4739_v11 = vpop.f32.mrb[18].mxu1  ;;  %v2572_v14 = vpop.f32.mrb[17].mxu0 }
0x1134   : > { %v2780_v15 = vmul.f32 0.25, %v4739_v11  ;;  %v2581_v62 = vmul.f32 0.25, %v2572_v14  ;;  %v2770_v16 = vpop.f32.mrb[19].mxu1 }
0x1135   : > { %v2779_v17 = vmul.f32 0.25, %v2770_v16  ;;  %v2584_v18 = vadd.f32 %v6008_v58, %v2582_v51 }
0x1136   : > { %v2583_v19 = vadd.f32 %v6008_v58, %v2581_v62  ;;  %v2782_v13 = vadd.f32 %v6008_v58, %v2780_v15 }
0x1137   : > { %v2588_v54 = vsel %vm801_vm1, %v2584_v18, -inf  ;;  %v2781_v21 = vadd.f32 %v6008_v58, %v2779_v17 }
0x1138   : > { %2589 = vmax.xlane.f32.xlu0 %v2588_v54  ;;  %v2585_v8 = vsel %vm801_vm1, %v2583_v19, -inf  ;;  %v2786_v24 = vsel %vm801_vm1, %v2782_v13, -inf }
0x1139   : > { %2586 = vmax.xlane.f32.xlu1 %v2585_v8  ;;  %v2783_v23 = vsel %vm801_vm1, %v2781_v21, -inf }
0x113c   : > { %2784 = vmax.xlane.f32.xlu0 %v2783_v23 }
0x113d   : > { %2787 = vmax.xlane.f32.xlu1 %v2786_v24 }
0x11c5   : > { %v2590_v25 = vpop.xlane.xlu0 %2589 }
0x11c6   : > { %v2592_v22 = vsub.f32 %v2584_v18, %v2590_v25  ;;  %v2587_v2 = vpop.xlane.xlu1 %2586  ;;  %v4339_v18 = vld [vmem:[%s6404_s6 + $0x50] sm:$0xff] }
0x11c7   : > { %v2591_v26 = vsub.f32 %v2583_v19, %v2587_v2  ;;  %v4340_v19 = vld [vmem:[%s6404_s6 + $0x58] sm:$0xff] }
0x11c8   : > { %v2595_v20 = vmul.f32 1.442695, %v2592_v22  ;;  %v4997_v54 = vpack.c.bf16 %v4340_v19, %v4339_v18 }
0x11c9   : > { %v2593_v27 = vmul.f32 1.442695, %v2591_v26  ;;  %v2785_v41 = vpop.xlane.xlu0 %2784 }
0x11ca   : > { %5265 = vpow2.f32 %v2595_v20  ;;  %v2789_v28 = vsub.f32 %v2781_v21, %v2785_v41  ;;  %v2788_v29 = vpop.xlane.xlu1 %2787  ;;  %4998 = vmatprep.subr.bf16.mxu1 %v4997_v54  ;;  %v4338_v21 = vld [vmem:[%s6404_s6 + $0x48] sm:$0xff] }
0x11cb   : > { %5267 = vpow2.f32 %v2593_v27  ;;  %v2790_v56 = vsub.f32 %v2782_v13, %v2788_v29  ;;  %5000 = vmatpush3.bf16.msra.mxu1 %v4997_v54  ;;  %v5001_v8 = vpack.c.bf16 %v4338_v21, %v4337_v12 }
0x11cc   : > { %v2791_v43 = vmul.f32 1.442695, %v2789_v28 }
0x11cd   : > { %v2793_v30 = vmul.f32 1.442695, %v2790_v56  ;;  %5002 = vmatprep.subr.bf16.mxu1 %v5001_v8 }
0x11ce   : > { %5269 = vpow2.f32 %v2791_v43 }
0x11cf   : > { %5271 = vpow2.f32 %v2793_v30 }
0x11d4   : > { %v5266_v31 = vpop.eup %5265 }
0x11d5   : > { %v5268_v40 = vpop.eup %5267  ;;  %v2600_v32 = vsel %vm801_vm1, %v5266_v31, 0.0 }
0x11d6   : > { %2601 = vadd.xlane.f32.xlu1 %v2600_v32  ;;  %v2597_v38 = vsel %vm801_vm1, %v5268_v40, 0.0 }
0x11d7   : > { %2598 = vadd.xlane.f32.xlu0 %v2597_v38 }
0x11d8   : > { %v5270_v53 = vpop.eup %5269 }
0x11d9   : > { %v5272_v35 = vpop.eup %5271  ;;  %v2795_v6 = vsel %vm801_vm1, %v5270_v53, 0.0 }
0x11da   : > { %v2798_v36 = vsel %vm801_vm1, %v5272_v35, 0.0 }
0x11db   : > { %2796 = vadd.xlane.f32.xlu0 %v2795_v6  ;;  %2799 = vadd.xlane.f32.xlu1 %v2798_v36 }
0x11ec   : > { %5186 = vrot.lane.b32.xlu1 %v5983_v52, %s6443_s30  ;;  %s625_s30 = scalar_lea.vmem %s6418_s20, %s5457_s23 }
0x11f0   : > { %3056 = vrot.lane.b32.xlu1 %v5974_v37, %s6444_s22 }
0x11f1   : > { %5181 = vrot.lane.b32.xlu0 %v5985_v61, %s6442_s27 }
0x11f4   : > { %5191 = vrot.lane.b32.xlu1 %v5983_v52, %s6445_s28 }
0x11f5   : > { %3058 = vrot.lane.b32.xlu0 %v5979_v47, %s6444_s22 }
0x11f8   : > { %3345 = vrot.lane.b32.xlu1 %v5979_v47, %s6446_s29 }
0x11f9   : > { %3343 = vrot.lane.b32.xlu0 %v5974_v37, %s6446_s29 }
0x1263   : > { %v2602_v50 = vpop.xlane.xlu1 %2601 }
0x1264   : > { %5273 = vrcp.f32 %v2602_v50  ;;  %v2599_v39 = vpop.xlane.xlu0 %2598 }
0x1265   : > { %5275 = vrcp.f32 %v2599_v39 }
0x1268   : > { %v2797_v44 = vpop.xlane.xlu0 %2796  ;;  %v2800_v46 = vpop.xlane.xlu1 %2799 }
0x1269   : > { %5277 = vrcp.f32 %v2797_v44 }
0x126a   : > { %5279 = vrcp.f32 %v2800_v46 }
0x126c   : > { %v5182_v48 = vpop.permute.xlu0 %5181  ;;  %v5187_v49 = vpop.permute.xlu1 %5186 }
0x126d   : > { %v5184_v52 = vunpack.i.h.bf16 %v5182_v48  ;;  %v5183_v55 = vunpack.i.l.bf16 %v5182_v48  ;;  %v5189_v3 = vunpack.i.h.bf16 %v5187_v49  ;;  %v5188_v47 = vunpack.i.l.bf16 %v5187_v49 }
0x126e   : > { %v5274_v63 = vpop.eup %5273 }
0x126f   : > { %v5276_v0 = vpop.eup %5275  ;;  %v4993_v1 = vpack.c.bf16 %v5184_v52, %v5183_v55  ;;  %v2606_v37 = vmul.f32 %v5274_v63, %v5266_v31  ;;  %v5005_v5 = vpack.c.bf16 %v5189_v3, %v5188_v47  ;;  %v4342_v3 = vld [vmem:[%s6404_s6 + $0x68] sm:$0xff] }
0x1270   : > { %v3057_v42 = vpop.permute.xlu1 %3056  ;;  %v2605_v4 = vmul.f32 %v5276_v0, %v5268_v40  ;;  %v3059_v62 = vpop.permute.xlu0 %3058 }
0x1271   : > { %4994 = vmatprep.subr.bf16.mxu0 %v4993_v1 }
0x1272   : > { %4730 = vmatprep.mubr.msk.f32.mxu0 %vm801_vm1, %v2605_v4 }
0x1273   : > { %v5278_v45 = vpop.eup %5277  ;;  %4731 = vmatmul.mubr.msk.f32.vlgmr.msra.gmra.mrb[18].mxu0 %vm801_vm1, %v2606_v37 }
0x1274   : > { %v5280_v7 = vpop.eup %5279  ;;  %4996 = vmatpush3.bf16.msra.mxu0 %v4993_v1  ;;  %v2803_v9 = vmul.f32 %v5278_v45, %v5270_v53  ;;  %v5192_v51 = vpop.permute.xlu1 %5191  ;;  %v4341_v1 = vld [vmem:[%s6404_s6 + $0x60] sm:$0xff] }
0x1275   : > { %v2804_v10 = vmul.f32 %v5280_v7, %v5272_v35  ;;  %5007 = vmatprep.subr.msk.bf16.mxu0 %vm5564_vm2, %v5005_v5  ;;  %v5194_v11 = vunpack.i.h.bf16 %v5192_v51  ;;  %v5193_v14 = vunpack.i.l.bf16 %v5192_v51  ;;  %v3344_v16 = vpop.permute.xlu0 %3343  ;;  %v5015_v47 = vpack.c.bf16 %v4342_v3, %v4341_v1  ;;  %v4392_v3 = vld [vmem:[%s6408_s10 + $0xc8] sm:$0xff] }
0x1276   : > { %4744 = vmatprep.mubr.msk.f32.mxu0 %vm801_vm1, %v2803_v9 }
0x1277   : > { %4745 = vmatmul.mubr.msk.f32.vlgmr.msra.gmra.mrb[20].mxu0 %vm801_vm1, %v2804_v10  ;;  %v5019_v15 = vpack.c.bf16 %v5194_v11, %v5193_v14 }
0x1278   : > { %4765 = vmatprep.mubr.msk.f32.mxu0 %vm801_vm1, %v3057_v42  ;;  %v3346_v17 = vpop.permute.xlu1 %3345 }
0x127d   : > { %5010 = vmatpush3.bf16.xpose.msk.msra.mxu0 %vm5564_vm2, %v5005_v5 }
0x127e   : > { %5021 = vmatprep.subr.msk.bf16.mxu0 %vm5564_vm2, %v5019_v15 }
0x1284   : > { %4766 = vmatmul.mubr.msk.f32.vlgmr.msra.gmra.mrb[22].mxu0 %vm801_vm1, %v3059_v62 }
0x1285   : > { %5024 = vmatpush3.bf16.xpose.msk.msra.mxu0 %vm5564_vm2, %v5019_v15  ;;  %4786 = vmatprep.mubr.msk.f32.mxu0 %vm801_vm1, %v3344_v16 }
0x128c   : > { %4787 = vmatmul.mubr.msk.f32.vlgmr.msra.gmra.mrb[24].mxu0 %vm801_vm1, %v3346_v17 }
0x128d   : > { %3788 = vmatprep.mubr.f32.mxu0 %v5330_v33 }
0x1346   : > { %v4732_v13 = vpop.f32.mrb[18].mxu0 }
0x1347   : > { %v2679_v23 = vpop.f32.mrb[19].mxu0 }
0x134a   : > { %v4746_v24 = vpop.f32.mrb[20].mxu0 }
0x134b   : > { %v2885_v25 = vpop.f32.mrb[21].mxu0 }
0x134c   : > { %4751 = vmatprep.mubr.msk.f32.mxu1 %vm801_vm1, %v2885_v25 }
0x134d   : > { %4752 = vmatmul.mubr.msk.f32.vlgmr.msra.gmra.mrb[20].mxu1 %vm801_vm1, %v4746_v24 }
0x134e   : > { %4758 = vmatprep.mubr.msk.f32.mxu1 %vm801_vm1, %v2679_v23  ;;  %5004 = vmatpush3.bf16.msra.mxu1 %v5001_v8  ;;  %v4344_v23 = vld [vmem:[%s6404_s6 + $0x78] sm:$0xff] }
0x1355   : > { %4759 = vmatmul.mubr.msk.f32.vlgmr.msra.gmra.mrb[20].mxu1 %vm801_vm1, %v4732_v13  ;;  %v4343_v13 = vld [vmem:[%s6404_s6 + $0x70] sm:$0xff] }
0x1357   : > { %v4767_v22 = vpop.f32.mrb[22].mxu0 }
0x1358   : > { %v3148_v2 = vmul.f32 0.25, %v4767_v22  ;;  %v3138_v26 = vpop.f32.mrb[23].mxu0 }
0x1359   : > { %v3147_v20 = vmul.f32 0.25, %v3138_v26 }
0x135a   : > { %v3150_v27 = vadd.f32 %v6008_v58, %v3148_v2  ;;  %v5029_v2 = vpack.c.bf16 %v4344_v23, %v4343_v13  ;;  %v4402_v13 = vld [vmem:[%s6410_s12 + $0x100] sm:$0xff]  ;;  %v4403_v23 = vld [vmem:[%s6410_s12 + $0x108] sm:$0xff] }
0x135b   : > { %v3149_v41 = vadd.f32 %v6008_v58, %v3147_v20 }
0x135c   : > { %v3154_v28 = vsel %vm801_vm1, %v3150_v27, -inf }
0x135d   : > { %3155 = vmax.xlane.f32.xlu1 %v3154_v28  ;;  %v3151_v29 = vsel %vm801_vm1, %v3149_v41, -inf }
0x135e   : > { %3152 = vmax.xlane.f32.xlu0 %v3151_v29  ;;  %v4378_v29 = vld [vmem:[%s6405_s7 + $0x1] ss:$0 sm:$0xff] }
0x135f   : > { %v4788_v56 = vpop.f32.mrb[24].mxu0 }
0x1360   : > { %v3425_v43 = vpop.f32.mrb[25].mxu0 }
0x1361   : > { %v3434_v44 = vmul.f32 0.25, %v3425_v43 }
0x1363   : > { %v3436_v52 = vadd.f32 %v6008_v58, %v3434_v44 }
0x1365   : > { %v3438_v55 = vsel %vm801_vm1, %v3436_v52, -inf }
0x136e   : > { %5196 = vrot.lane.b32.xlu1 %v5985_v61, %s6444_s22 }
0x1372   : > { %5201 = vrot.lane.b32.xlu1 %v5985_v61, %s6446_s29  ;;  %v3435_v61 = vmul.f32 0.25, %v4788_v56 }
0x1374   : > { %v3437_v63 = vadd.f32 %v6008_v58, %v3435_v61 }
0x1376   : > { %v3441_v0 = vsel %vm801_vm1, %v3437_v63, -inf }
0x13ea   : > { %v3156_v30 = vpop.xlane.xlu1 %3155 }
0x13eb   : > { %v3158_v31 = vsub.f32 %v3150_v27, %v3156_v30  ;;  %v3153_v40 = vpop.xlane.xlu0 %3152 }
0x13ec   : > { %v3157_v32 = vsub.f32 %v3149_v41, %v3153_v40 }
0x13ed   : > { %v3161_v38 = vmul.f32 1.442695, %v3158_v31 }
0x13ee   : > { %v3159_v53 = vmul.f32 1.442695, %v3157_v32  ;;  %v5197_v35 = vpop.permute.xlu1 %5196 }
0x13ef   : > { %v5199_v6 = vunpack.i.h.bf16 %v5197_v35  ;;  %v5198_v36 = vunpack.i.l.bf16 %v5197_v35 }
0x13f0   : > { %5281 = vpow2.f32 %v3159_v53 }
0x13f1   : > { %v5011_v50 = vpack.c.bf16 %v5199_v6, %v5198_v36  ;;  %5283 = vpow2.f32 %v3161_v38 }
0x13f2   : > { %v5202_v5 = vpop.permute.xlu1 %5201 }
0x13f3   : > { %5012 = vmatprep.subr.bf16.mxu1 %v5011_v50  ;;  %v5204_v11 = vunpack.i.h.bf16 %v5202_v5  ;;  %v5203_v14 = vunpack.i.l.bf16 %v5202_v5  ;;  %v4398_v5 = vld [vmem:[%s6408_s10 + $0xf8] sm:$0xff] }
0x13f4   : > { %5014 = vmatpush3.bf16.msra.mxu1 %v5011_v50 }
0x13f5   : > { %5016 = vmatprep.subr.bf16.mxu1 %v5015_v47  ;;  %v5025_v17 = vpack.c.bf16 %v5204_v11, %v5203_v14 }
0x13fa   : > { %v5282_v39 = vpop.eup %5281 }
0x13fb   : > { %v3163_v46 = vsel %vm801_vm1, %v5282_v39, 0.0  ;;  %v5284_v48 = vpop.eup %5283 }
0x13fc   : > { %3164 = vadd.xlane.f32.xlu0 %v3163_v46  ;;  %v3166_v49 = vsel %vm801_vm1, %v5284_v48, 0.0  ;;  %v4383_v46 = vld [vmem:[%s6408_s10 + $0x80] sm:$0xff] }
0x1400   : > { %3167 = vadd.xlane.f32.xlu0 %v3166_v49  ;;  %v4388_v49 = vld [vmem:[%s6408_s10 + $0xa8] sm:$0xff] }
0x1404   : > { %3439 = vmax.xlane.f32.xlu0 %v3438_v55 }
0x1408   : > { %3442 = vmax.xlane.f32.xlu0 %v3441_v0  ;;  %v4389_v0 = vld [vmem:[%s6408_s10 + $0xb0] sm:$0xff] }
0x1489   : > { %v3165_v42 = vpop.xlane.xlu0 %3164 }
0x148a   : > { %5285 = vrcp.f32 %v3165_v42 }
0x148d   : > { %v3168_v4 = vpop.xlane.xlu0 %3167 }
0x148e   : > { %5287 = vrcp.f32 %v3168_v4  ;;  %v4391_v4 = vld [vmem:[%s6408_s10 + $0xc0] sm:$0xff] }
0x1491   : > { %v3440_v37 = vpop.xlane.xlu0 %3439 }
0x1492   : > { %v3444_v58 = vsub.f32 %v3436_v52, %v3440_v37  ;;  %v4390_v52 = vld [vmem:[%s6408_s10 + $0xb8] sm:$0xff]  ;;  %v4393_v37 = vld [vmem:[%s6408_s10 + $0xd0] sm:$0xff] }
0x1493   : > { %v5037_v55 = vpack.c.bf16 %v4390_v52, %v4388_v49  ;;  %v4412_v49 = vld [vmem:[%s6410_s12 + $0x150] sm:$0xff]  ;;  %v4413_v52 = vld [vmem:[%s6410_s12 + $0x158] sm:$0xff] }
0x1494   : > { %v5286_v45 = vpop.eup %5285  ;;  %v3446_v7 = vmul.f32 1.442695, %v3444_v58  ;;  %v5043_v58 = vpack.c.bf16 %v4393_v37, %v4391_v4  ;;  %v4432_v4 = vld [vmem:[%s6410_s12 + $0x1f0] sm:$0xff]  ;;  %v4433_v37 = vld [vmem:[%s6410_s12 + $0x1f8] sm:$0xff] }
0x1495   : > { %v3443_v9 = vpop.xlane.xlu0 %3442  ;;  %v3171_v10 = vmul.f32 %v5286_v45, %v5282_v39  ;;  %v4396_v45 = vld [vmem:[%s6408_s10 + $0xe8] sm:$0xff] }
0x1496   : > { %5289 = vpow2.f32 %v3446_v7  ;;  %v3445_v51 = vsub.f32 %v3437_v63, %v3443_v9  ;;  %v4387_v63 = vld [vmem:[%s6408_s10 + $0xa0] sm:$0xff]  ;;  %v5045_v7 = vpack.c.bf16 %v4398_v5, %v4396_v45  ;;  %v4416_v45 = vld [vmem:[%s6410_s12 + $0x170] sm:$0xff]  ;;  %v4417_v5 = vld [vmem:[%s6410_s12 + $0x178] sm:$0xff] }
0x1497   : > { %4772 = vmatprep.mubr.msk.f32.mxu1 %vm801_vm1, %v3171_v10  ;;  %v5039_v1 = vpack.c.bf16 %v4389_v0, %v4387_v63  ;;  %v4395_v9 = vld [vmem:[%s6408_s10 + $0xe0] sm:$0xff]  ;;  %v4397_v10 = vld [vmem:[%s6408_s10 + $0xf0] sm:$0xff]  ;;  %v4431_v0 = vld [vmem:[%s6410_s12 + $0x1e8] sm:$0xff] }
0x1498   : > { %v5288_v15 = vpop.eup %5287  ;;  %v3448_v62 = vmul.f32 1.442695, %v3445_v51  ;;  %v5047_v51 = vpack.c.bf16 %v4397_v10, %v4395_v9  ;;  %v4430_v63 = vld [vmem:[%s6410_s12 + $0x1e0] sm:$0xff] }
0x1499   : > { %v3172_v16 = vmul.f32 %v5288_v15, %v5284_v48  ;;  %v4385_v48 = vld [vmem:[%s6408_s10 + $0x90] sm:$0xff]  ;;  %v4399_v9 = vld [vmem:[%s6409_s11 + $0x2] sm:$0x3] }
0x149a   : > { %5291 = vpow2.f32 %v3448_v62  ;;  %v5035_v61 = vpack.c.bf16 %v4385_v48, %v4383_v46  ;;  %v4428_v46 = vld [vmem:[%s6410_s12 + $0x1d0] sm:$0xff]  ;;  %v4429_v48 = vld [vmem:[%s6410_s12 + $0x1d8] sm:$0xff]  ;;  %v6281_v10 = vrot.slane %v4399_v9, %v5531_v57 }
0x149b   : > { %4773 = vmatmul.mubr.msk.f32.vlgmr.msra.gmra.mrb[22].mxu1 %vm801_vm1, %v3172_v16  ;;  %v6167_v16 = vld [vmem:[%s6406_s8 + $0x1] ss:$0 sm:$0xff] }
0x149c   : > { %5018 = vmatpush3.bf16.msra.mxu1 %v5015_v47  ;;  %v4394_v47 = vld [vmem:[%s6408_s10 + $0xd8] sm:$0xff] }
0x149d   : > { %5026 = vmatprep.subr.bf16.mxu1 %v5025_v17  ;;  %v5041_v42 = vpack.c.bf16 %v4394_v47, %v4392_v3  ;;  %v4414_v3 = vld [vmem:[%s6410_s12 + $0x160] sm:$0xff]  ;;  %v4415_v47 = vld [vmem:[%s6410_s12 + $0x168] sm:$0xff] }
0x14a0   : > { %v5290_v18 = vpop.eup %5289 }
0x14a1   : > { %v3450_v19 = vsel %vm801_vm1, %v5290_v18, 0.0 }
0x14a2   : > { %3451 = vadd.xlane.f32.xlu0 %v3450_v19 }
0x14a4   : > { %v5292_v54 = vpop.eup %5291 }
0x14a5   : > { %v3453_v12 = vsel %vm801_vm1, %v5292_v54, 0.0 }
0x14a6   : > { %3454 = vadd.xlane.f32.xlu0 %v3453_v12  ;;  %v4418_v12 = vld [vmem:[%s6410_s12 + $0x180] sm:$0xff] }
0x152f   : > { %v3452_v21 = vpop.xlane.xlu0 %3451 }
0x1530   : > { %5293 = vrcp.f32 %v3452_v21  ;;  %v4419_v21 = vld [vmem:[%s6410_s12 + $0x188] sm:$0xff] }
0x1533   : > { %v3455_v8 = vpop.xlane.xlu0 %3454 }
0x1534   : > { %5295 = vrcp.f32 %v3455_v8  ;;  %v5049_v8 = vpack.c.bf16 %v4419_v21, %v4418_v12 }
0x153a   : > { %v5294_v24 = vpop.eup %5293 }
0x153b   : > { %v3458_v20 = vmul.f32 %v5294_v24, %v5290_v18  ;;  %v6172_v18 = vld [vmem:[%s6407_s9 + $0x1] ss:$0 sm:$0xff]  ;;  %v5051_v24 = vpack.c.bf16 %v4403_v23, %v4402_v13 }
0x153e   : > { %v5296_v26 = vpop.eup %5295 }
0x153f   : > { %v3459_v27 = vmul.f32 %v5296_v26, %v5292_v54  ;;  %v4404_v26 = vld [vmem:[%s6410_s12 + $0x110] sm:$0xff] }
0x156e   : > { %v4774_v25 = vpop.f32.mrb[22].mxu1 }
0x156f   : > { %v3251_v22 = vpop.f32.mrb[23].mxu1 }
0x1570   : > { %4779 = vmatprep.mubr.msk.f32.mxu1 %vm801_vm1, %v3251_v22  ;;  %v4421_v22 = vld [vmem:[%s6410_s12 + $0x198] sm:$0xff] }
0x1571   : > { %4780 = vmatmul.mubr.msk.f32.vlgmr.msra.gmra.mrb[20].mxu1 %vm801_vm1, %v4774_v25  ;;  %v4420_v25 = vld [vmem:[%s6410_s12 + $0x190] sm:$0xff] }
0x1572   : > { %5028 = vmatpush3.bf16.msra.mxu1 %v5025_v17  ;;  %4793 = vmatprep.mubr.msk.f32.mxu1 %vm801_vm1, %v3458_v20  ;;  %v4405_v20 = vld [vmem:[%s6410_s12 + $0x118] sm:$0xff] }
0x1573   : > { %5030 = vmatprep.subr.bf16.mxu1 %v5029_v2 }
0x1575   : > { %4794 = vmatmul.mubr.msk.f32.vlgmr.msra.gmra.mrb[24].mxu1 %vm801_vm1, %v3459_v27  ;;  %v5055_v27 = vpack.c.bf16 %v4405_v20, %v4404_v26 }
0x1576   : > { %5032 = vmatpush3.bf16.msra.mxu1 %v5029_v2  ;;  %v5053_v2 = vpack.c.bf16 %v4421_v22, %v4420_v25 }
0x1577   : > { %5050 = vmatprep.subr.bf16.mxu1 %v5049_v8 }
0x1648   : > { %v4795_v41 = vpop.f32.mrb[24].mxu1 }
0x1649   : > { %v3538_v28 = vpop.f32.mrb[25].mxu1 }
0x164a   : > { %4800 = vmatprep.mubr.msk.f32.mxu1 %vm801_vm1, %v3538_v28  ;;  %v4423_v28 = vld [vmem:[%s6410_s12 + $0x1a8] sm:$0xff] }
0x164b   : > { %4801 = vmatmul.mubr.msk.f32.vlgmr.msra.gmra.mrb[20].mxu1 %vm801_vm1, %v4795_v41  ;;  %v4422_v41 = vld [vmem:[%s6410_s12 + $0x1a0] sm:$0xff] }
0x164c   : > { %5052 = vmatpush3.bf16.msra.mxu1 %v5051_v24 }
0x164d   : > { %5054 = vmatprep.subr.bf16.mxu1 %v5053_v2 }
0x1650   : > { %5056 = vmatpush3.bf16.msra.mxu1 %v5055_v27 }
0x171e   : > { %v4802_v56 = vpop.f32.mrb[20].mxu1 }
0x171f   : > { %v3619_v43 = vpop.f32.mrb[21].mxu1  ;;  %v3639_v30 = vadd.f32 %v4802_v56, %v4378_v29  ;;  %v4406_v56 = vld [vmem:[%s6410_s12 + $0x120] sm:$0xff] }
0x1720   : > { %v3638_v31 = vadd.f32 %v4378_v29, %v3619_v43  ;;  %v5057_v29 = vpack.c.bf16 %v4423_v28, %v4422_v41  ;;  %v4407_v43 = vld [vmem:[%s6410_s12 + $0x128] sm:$0xff] }
0x1721   : > { %v6111_v38 = vadd.f32 %v3639_v30, %v5966_v59  ;;  %v4386_v59 = vld [vmem:[%s6408_s10 + $0x98] sm:$0xff]  ;;  %v5059_v30 = vpack.c.bf16 %v4407_v43, %v4406_v56 }
0x1722   : > { %v3640_v40 = vadd.f32 %v3638_v31, %v5961_v34  ;;  %v4384_v34 = vld [vmem:[%s6408_s10 + $0x88] sm:$0xff]  ;;  %5058 = vmatprep.subr.bf16.mxu1 %v5057_v29  ;;  %v4424_v31 = vld [vmem:[%s6410_s12 + $0x1b0] sm:$0xff] }
0x1723   : > { %v3649_v53 = vsel %vm632_vm0, %v6111_v38, 0.0  ;;  %v5033_v44 = vpack.c.bf16 %v4386_v59, %v4384_v34  ;;  %5060 = vmatpush3.bf16.msra.mxu1 %v5059_v30  ;;  %v4410_v34 = vld [vmem:[%s6410_s12 + $0x140] sm:$0xff]  ;;  %v4411_v59 = vld [vmem:[%s6410_s12 + $0x148] sm:$0xff] }
0x1724   : > { %v3646_v32 = vsel %vm632_vm0, %v3640_v40, 0.0 }
0x1725   : > { %3647 = vadd.xlane.f32.xlu0 %v3646_v32  ;;  %5034 = vmatprep.subr.bf16.mxu0 %v5033_v44  ;;  %v5067_v44 = vpack.c.bf16 %v4411_v59, %v4410_v34 }
0x1726   : > { %5036 = vmatpush1.bf16.msra.mxu0 %v5035_v61  ;;  %v5069_v61 = vpack.c.bf16 %v4429_v48, %v4428_v46 }
0x1727   : > { %5038 = vmatprep.subr.bf16.mxu0 %v5037_v55  ;;  %v5071_v55 = vpack.c.bf16 %v4413_v52, %v4412_v49 }
0x1729   : > { %3650 = vadd.xlane.f32.xlu0 %v3649_v53  ;;  %v4408_v53 = vld [vmem:[%s6410_s12 + $0x130] sm:$0xff] }
0x172a   : > { %5040 = vmatpush1.bf16.msra.mxu0 %v5039_v1  ;;  %v5073_v1 = vpack.c.bf16 %v4431_v0, %v4430_v63 }
0x172b   : > { %5042 = vmatprep.subr.bf16.mxu0 %v5041_v42  ;;  %v5075_v42 = vpack.c.bf16 %v4415_v47, %v4414_v3 }
0x172e   : > { %5044 = vmatpush1.bf16.msra.mxu0 %v5043_v58  ;;  %v5077_v58 = vpack.c.bf16 %v4433_v37, %v4432_v4 }
0x172f   : > { %5046 = vmatprep.subr.bf16.mxu0 %v5045_v7  ;;  %v5079_v7 = vpack.c.bf16 %v4417_v5, %v4416_v45 }
0x1732   : > { %5048 = vmatpush1.bf16.msra.mxu0 %v5047_v51  ;;  %v6284_v51 = vrot.slane %v4399_v9, %v5537_v60 }
0x17b2   : > { %v3648_v35 = vpop.xlane.xlu0 %3647 }
0x17b3   : > { %v3652_v6 = vmul.f32 0.015625, %v3648_v35  ;;  %v4409_v35 = vld [vmem:[%s6410_s12 + $0x138] sm:$0xff] }
0x17b5   : > { %v3654_v36 = vsub.f32 %v3640_v40, %v3652_v6  ;;  %v4425_v40 = vld [vmem:[%s6410_s12 + $0x1b8] sm:$0xff]  ;;  %v5063_v6 = vpack.c.bf16 %v4409_v35, %v4408_v53 }
0x17b6   : > { %v5061_v32 = vpack.c.bf16 %v4425_v40, %v4424_v31  ;;  %v3651_v5 = vpop.xlane.xlu0 %3650 }
0x17b7   : > { %v3656_v50 = vmul.f32 %v3654_v36, %v3654_v36 }
0x17b8   : > { %5062 = vmatprep.subr.bf16.mxu1 %v5061_v32 }
0x17b9   : > { %v3658_v39 = vsel %vm632_vm0, %v3656_v50, 0.0  ;;  %5064 = vmatpush3.bf16.msra.mxu1 %v5063_v6  ;;  %v4427_v50 = vld [vmem:[%s6410_s12 + $0x1c8] sm:$0xff] }
0x17ba   : > { %3659 = vadd.xlane.f32.xlu1 %v3658_v39 }
0x1847   : > { %v3660_v11 = vpop.xlane.xlu1 %3659 }
0x1848   : > { %v3664_v14 = vmul.f32 0.015625, %v3660_v11 }
0x184a   : > { %v3666_v15 = vadd.f32 1e-12, %v3664_v14 }
0x184c   : > { %5297 = vrsqrt.f32 %v3666_v15 }
0x1856   : > { %v5298_v62 = vpop.eup %5297 }
0x1857   : > { %v3670_v17 = vmul.f32 %v5298_v62, %v3654_v36  ;;  %v4426_v36 = vld [vmem:[%s6410_s12 + $0x1c0] sm:$0xff] }
0x1858   : > { %v5065_v39 = vpack.c.bf16 %v4427_v50, %v4426_v36 }
0x1859   : > { %v3678_v19 = vmul.f32 %v6167_v16, %v3670_v17 }
0x185a   : > { %5066 = vmatprep.subr.bf16.mxu1 %v5065_v39 }
0x185b   : > { %v6176_v54 = vadd.f32 %v6172_v18, %v3678_v19  ;;  %5068 = vmatpush3.bf16.msra.mxu1 %v5067_v44 }
0x185c   : > { %5070 = vmatprep.subr.bf16.mxu1 %v5069_v61 }
0x185d   : > { %4400 = vmatmul.mubr.msk.f32.vlgmr.msra.gmra.mrb[26].mxu0 %vm632_vm0, %v6176_v54 }
0x185e   : > { %3794 = vmatprep.mubr.f32.mxu0 %v5330_v33 }
0x185f   : > { %5072 = vmatpush3.bf16.msra.mxu1 %v5071_v55 }
0x1860   : > { %5074 = vmatprep.subr.bf16.mxu1 %v5073_v1 }
0x1863   : > { %5076 = vmatpush3.bf16.msra.mxu1 %v5075_v42 }
0x1864   : > { %5078 = vmatprep.subr.bf16.mxu1 %v5077_v58 }
0x1867   : > { %5080 = vmatpush3.bf16.msra.mxu1 %v5079_v7  ;;  %v3653_v7 = vmul.f32 0.015625, %v3651_v5  ;;  %v4138_v5 = vld [vmem:[%s6416_s18 + $0x18] sm:$0xff] }
0x1930   : > { %v3790_v11 = vpop.f32.mrb[26].mxu0 }
0x1931   : > { %v3791_v14 = vadd.f32 %v3790_v11, %v6281_v10  ;;  %v3792_v15 = vpop.f32.mrb[27].mxu0  ;;  %v4435_v11 = vld [vmem:[%s6411_s13 + $0x1] ss:$0 sm:$0xff] }
0x1932   : > { %v3793_v62 = vadd.f32 %v3792_v15, %v6284_v51 }
0x1933   : > { %v3805_v17 = vmul.f32 0.70710677, %v3791_v14  ;;  %v3801_v37 = vmul.f32 0.5, %v3791_v14 }
0x1934   : > { %v3806_v19 = vmul.f32 0.70710677, %v3793_v62  ;;  %v3802_v42 = vmul.f32 0.5, %v3793_v62 }
0x1935   : > { %v3809_v12 = vand.u32 2147483647, %v3805_v17  ;;  %vm3885_vm7 = vcmp.ge.f32.partialorder %v3805_v17, 0.0 }
0x1936   : > { %v3810_v21 = vand.u32 2147483647, %v3806_v19  ;;  %vm3886_vm8 = vcmp.ge.f32.partialorder %v3806_v19, 0.0  ;;  %v3655_v19 = vsub.f32 %v6111_v38, %v3653_v7 }
0x1937   : > { %v3813_v8 = vmul.f32 0.3275911, %v3809_v12  ;;  %v3861_v57 = vsub.f32 0.0, %v3809_v12 }
0x1938   : > { %v3814_v13 = vmul.f32 0.3275911, %v3810_v21  ;;  %v3862_v25 = vsub.f32 0.0, %v3810_v21 }
0x1939   : > { %v3817_v23 = vadd.f32 1.0, %v3813_v8  ;;  %v3865_v22 = vmul.f32 %v3861_v57, %v3809_v12 }
0x193a   : > { %v3818_v24 = vadd.f32 1.0, %v3814_v13  ;;  %v3866_v20 = vmul.f32 %v3862_v25, %v3810_v21  ;;  %v3657_v21 = vmul.f32 %v3655_v19, %v3655_v19 }
0x193b   : > { %5299 = vrcp.f32 %v3817_v23  ;;  %v3869_v28 = vmul.f32 1.442695, %v3865_v22 }
0x193c   : > { %5301 = vrcp.f32 %v3818_v24  ;;  %v3871_v43 = vmul.f32 1.442695, %v3866_v20  ;;  %v3661_v8 = vsel %vm632_vm0, %v3657_v21, 0.0  ;;  %v4141_v21 = vld [vmem:[%s6416_s18 + $0x30] sm:$0xff] }
0x193d   : > { %5303 = vpow2.f32 %v3869_v28 }
0x193e   : > { %5305 = vpow2.f32 %v3871_v43  ;;  %v4056_v43 = vld [vmem:[%s6414_s16 + $0x20] sm:$0xff] }
0x1945   : > { %v5300_v60 = vpop.eup %5299 }
0x1946   : > { %v5302_v2 = vpop.eup %5301  ;;  %v3825_v26 = vmul.f32 1.0614054, %v5300_v60 }
0x1947   : > { %v3826_v27 = vmul.f32 1.0614054, %v5302_v2  ;;  %v5304_v44 = vpop.eup %5303 }
0x1948   : > { %v3829_v41 = vadd.f32 -1.4531521, %v3825_v26  ;;  %v5306_v48 = vpop.eup %5305 }
0x1949   : > { %v3830_v29 = vadd.f32 -1.4531521, %v3826_v27  ;;  %v4052_v27 = vld [vmem:[%s6414_s16] sm:$0xff] }
0x194a   : > { %v3833_v56 = vmul.f32 %v5300_v60, %v3829_v41  ;;  %v4053_v41 = vld [vmem:[%s6414_s16 + $0x8] sm:$0xff] }
0x194b   : > { %v3834_v30 = vmul.f32 %v5302_v2, %v3830_v29  ;;  %v5082_v28 = vpack.c.bf16 %v4053_v41, %v4052_v27  ;;  %v5338_v29 = vmov 0.0|0.0  }
0x194c   : > { %v3837_v31 = vadd.f32 1.4214138, %v3833_v56  ;;  %5081 = vmatprep.subr.bf16.mxu0 %v5338_v29 }
0x194d   : > { %v3838_v40 = vadd.f32 1.4214138, %v3834_v30  ;;  %5083 = vmatpush3.bf16.msra.mxu0 %v5082_v28  ;;  %v4057_v30 = vld [vmem:[%s6414_s16 + $0x28] sm:$0xff] }
0x194e   : > { %v3841_v32 = vmul.f32 %v5300_v60, %v3837_v31  ;;  %5084 = vmatprep.subr.bf16.mxu0 %v5338_v29  ;;  %v5088_v31 = vpack.c.bf16 %v4057_v30, %v4056_v43 }
0x194f   : > { %v3842_v53 = vmul.f32 %v5302_v2, %v3838_v40  ;;  %v4058_v40 = vld [vmem:[%s6414_s16 + $0x30] sm:$0xff] }
0x1950   : > { %v3845_v35 = vadd.f32 -0.28449672, %v3841_v32  ;;  %v4059_v32 = vld [vmem:[%s6414_s16 + $0x38] sm:$0xff] }
0x1951   : > { %v3846_v6 = vadd.f32 -0.28449672, %v3842_v53  ;;  %v5091_v53 = vpack.c.bf16 %v4059_v32, %v4058_v40 }
0x1952   : > { %v3849_v36 = vmul.f32 %v5300_v60, %v3845_v35 }
0x1953   : > { %v3850_v50 = vmul.f32 %v5302_v2, %v3846_v6 }
0x1954   : > { %v3853_v39 = vadd.f32 0.2548296, %v3849_v36 }
0x1955   : > { %v3854_v34 = vadd.f32 0.2548296, %v3850_v50 }
0x1956   : > { %v3857_v59 = vmul.f32 %v5300_v60, %v3853_v39  ;;  %v4438_v39 = vld [vmem:[%s6412_s14 + $0x1] ss:$0 sm:$0xff] }
0x1957   : > { %v3858_v46 = vmul.f32 %v5302_v2, %v3854_v34 }
0x1958   : > { %v3877_v61 = vmul.f32 %v5304_v44, %v3857_v59  ;;  %v4135_v59 = vld [vmem:[%s6416_s18] sm:$0xff]  ;;  %v4136_v44 = vld [vmem:[%s6416_s18 + $0x8] sm:$0xff] }
0x1959   : > { %v3878_v49 = vmul.f32 %v5306_v48, %v3858_v46  ;;  %v4439_v46 = vld [vmem:[%s6413_s15 + $0x1] ss:$0 sm:$0xff] }
0x195a   : > { %v3881_v52 = vsub.f32 1.0, %v3877_v61  ;;  %v5094_v61 = vpack.c.bf16 %v4136_v44, %v4135_v59 }
0x195b   : > { %v3882_v55 = vsub.f32 1.0, %v3878_v49 }
0x195c   : > { %v3889_v63 = vsub.f32 0.0, %v3881_v52 }
0x195d   : > { %v3890_v0 = vsub.f32 0.0, %v3882_v55 }
0x195e   : > { %v3893_v1 = vsel %vm3885_vm7, %v3881_v52, %v3889_v63 }
0x195f   : > { %v3897_v3 = vadd.f32 1.0, %v3893_v1  ;;  %v3894_v47 = vsel %vm3886_vm8, %v3882_v55, %v3890_v0 }
0x1960   : > { %v3898_v4 = vadd.f32 1.0, %v3894_v47 }
0x1961   : > { %v3901_v45 = vmul.f32 %v3897_v3, %v3801_v37 }
0x1962   : > { %v3902_v58 = vmul.f32 %v3898_v4, %v3802_v42 }
0x1964   : > { %4010 = vmatprep.mubr.f32.mxu1 %v3902_v58 }
0x1965   : > { %4011 = vmatmul.mubr.f32.vlgmr.msra.gmra.mrb[26].mxu1 %v3901_v45 }
0x1a38   : > { %v4611_v9 = vpop.f32.mrb[26].mxu1 }
0x1a39   : > { %v4612_v15 = vpop.f32.mrb[27].mxu1 }
0x1a3a   : > { %v4613_v17 = vadd.f32 %v4612_v15, %v4611_v9  ;;  %v4139_v9 = vld [vmem:[%s6416_s18 + $0x20] sm:$0xff] }
0x1a3c   : > { %v4013_v12 = vadd.f32 %v4613_v17, %v4435_v11  ;;  %v4140_v11 = vld [vmem:[%s6416_s18 + $0x28] sm:$0xff] }
0x1a3e   : > { %v4020_v62 = vadd.f32 %v4013_v12, %v6176_v54 }
0x1a40   : > { %v4025_v14 = vsel %vm632_vm0, %v4020_v62, 0.0 }
0x1a41   : > { %4026 = vadd.xlane.f32.xlu0 %v4025_v14 }
0x1a45   : > { %3662 = vadd.xlane.f32.xlu0 %v3661_v8  ;;  %v4142_v8 = vld [vmem:[%s6416_s18 + $0x38] sm:$0xff] }
0x1ace   : > { %v4027_v13 = vpop.xlane.xlu0 %4026 }
0x1acf   : > { %v4028_v23 = vmul.f32 0.015625, %v4027_v13 }
0x1ad1   : > { %v4029_v24 = vsub.f32 %v4020_v62, %v4028_v23 }
0x1ad2   : > { %v3663_v57 = vpop.xlane.xlu0 %3662 }
0x1ad3   : > { %v3665_v25 = vmul.f32 0.015625, %v3663_v57  ;;  %v4030_v60 = vmul.f32 %v4029_v24, %v4029_v24 }
0x1ad5   : > { %v3667_v22 = vadd.f32 1e-12, %v3665_v25  ;;  %v4031_v2 = vsel %vm632_vm0, %v4030_v60, 0.0  ;;  %v5103_v25 = vpack.c.bf16 %v4142_v8, %v4141_v21 }
0x1ad6   : > { %4032 = vadd.xlane.f32.xlu0 %v4031_v2 }
0x1ad7   : > { %5307 = vrsqrt.f32 %v3667_v22 }
0x1ae1   : > { %v5308_v38 = vpop.eup %5307 }
0x1ae2   : > { %v3671_v54 = vmul.f32 %v5308_v38, %v3655_v19  ;;  %v5100_v19 = vpack.c.bf16 %v4140_v11, %v4139_v9 }
0x1ae4   : > { %v3679_v26 = vmul.f32 %v6167_v16, %v3671_v54  ;;  %v4054_v16 = vld [vmem:[%s6414_s16 + $0x10] sm:$0xff] }
0x1ae6   : > { %v3687_v20 = vadd.f32 %v6172_v18, %v3679_v26  ;;  %v4055_v18 = vld [vmem:[%s6414_s16 + $0x18] sm:$0xff] }
0x1ae7   : > { %v5085_v56 = vpack.c.bf16 %v4055_v18, %v4054_v16 }
0x1ae8   : > { %4401 = vmatmul.mubr.msk.f32.gmra.mrb[28].mxu0 %vm632_vm0, %v3687_v20 }
0x1ae9   : > { %5086 = vmatpush3.bf16.msra.mxu0 %v5085_v56  ;;  %4819 = vmatprep.mubr.msk.f32.mxu0 %vm5339_vm9, %v5330_v33 }
0x1aea   : > { %5087 = vmatprep.subr.bf16.mxu0 %v5338_v29 }
0x1aed   : > { %5089 = vmatpush3.bf16.msra.mxu0 %v5088_v31 }
0x1aee   : > { %5090 = vmatprep.subr.bf16.mxu0 %v5338_v29 }
0x1af1   : > { %5092 = vmatpush3.bf16.msra.mxu0 %v5091_v53 }
0x1af2   : > { %5093 = vmatprep.subr.bf16.mxu0 %v5338_v29 }
0x1b63   : > { %v4033_v35 = vpop.xlane.xlu0 %4032 }
0x1b64   : > { %v4034_v6 = vmul.f32 0.015625, %v4033_v35 }
0x1b66   : > { %v4035_v36 = vadd.f32 1e-12, %v4034_v6 }
0x1b68   : > { %5309 = vrsqrt.f32 %v4035_v36 }
0x1b72   : > { %v5310_v50 = vpop.eup %5309 }
0x1b73   : > { %v4037_v34 = vmul.f32 %v5310_v50, %v4029_v24 }
0x1b75   : > { %v4044_v48 = vmul.f32 %v4438_v39, %v4037_v34 }
0x1b77   : > { %v4051_v49 = vadd.f32 %v4439_v46, %v4044_v48 }
0x1b79   : > { %4820 = vmatmul.mubr.msk.f32.vlgmr.msra.gmra.mrb[30].mxu0 %vm632_vm0, %v4051_v49  ;;  %v4060_v49 = vld [vmem:[%s6415_s17] sm:$0x1] }
0x1b7a   : > { %5095 = vmatpush3.bf16.msra.mxu0 %v5094_v61  ;;  %4838 = vmatprep.mubr.msk.f32.mxu0 %vm5339_vm9, %v5330_v33 }
0x1b7b   : > { %5096 = vmatprep.subr.bf16.mxu0 %v5338_v29 }
0x1bbb   : > { %v3796_v52 = vpop.f32.mrb[28].mxu0 }
0x1bbc   : > { %v6347_v55 = vadd.f32 %v3796_v52, %v6281_v10  ;;  %v3798_v63 = vpop.f32.mrb[29].mxu0 }
0x1bbd   : > { %v6350_v0 = vadd.f32 %v3798_v63, %v6284_v51  ;;  %v4137_v51 = vld [vmem:[%s6416_s18 + $0x10] sm:$0xff] }
0x1bbe   : > { %v6353_v1 = vmul.f32 0.70710677, %v6347_v55  ;;  %v5097_v7 = vpack.c.bf16 %v4138_v5, %v4137_v51  ;;  %v3803_v46 = vmul.f32 0.5, %v6347_v55  ;;  %v4143_v55 = vld [vmem:[%s6417_s19] sm:$0x1] }
0x1bbf   : > { %v6356_v3 = vmul.f32 0.70710677, %v6350_v0  ;;  %v3804_v59 = vmul.f32 0.5, %v6350_v0 }
0x1bc0   : > { %v3811_v47 = vand.u32 2147483647, %v6353_v1  ;;  %5098 = vmatpush3.bf16.msra.mxu0 %v5097_v7  ;;  %vm3887_vm10 = vcmp.ge.f32.partialorder %v6353_v1, 0.0 }
0x1bc1   : > { %v3812_v33 = vand.u32 2147483647, %v6356_v3  ;;  %5099 = vmatprep.subr.bf16.mxu0 %v5338_v29  ;;  %vm3888_vm11 = vcmp.ge.f32.partialorder %v6356_v3, 0.0 }
0x1bc2   : > { %v3815_v42 = vmul.f32 0.3275911, %v3811_v47  ;;  %v3863_v10 = vsub.f32 0.0, %v3811_v47 }
0x1bc3   : > { %v3816_v4 = vmul.f32 0.3275911, %v3812_v33  ;;  %v3864_v45 = vsub.f32 0.0, %v3812_v33 }
0x1bc4   : > { %v3819_v37 = vadd.f32 1.0, %v3815_v42  ;;  %v3867_v17 = vmul.f32 %v3863_v10, %v3811_v47  ;;  %5101 = vmatpush3.bf16.msra.mxu0 %v5100_v19 }
0x1bc5   : > { %v3820_v58 = vadd.f32 1.0, %v3816_v4  ;;  %v3868_v62 = vmul.f32 %v3864_v45, %v3812_v33  ;;  %5102 = vmatprep.subr.bf16.mxu0 %v5338_v29 }
0x1bc6   : > { %5311 = vrcp.f32 %v3819_v37  ;;  %v3873_v24 = vmul.f32 1.442695, %v3867_v17 }
0x1bc7   : > { %5313 = vrcp.f32 %v3820_v58  ;;  %v3875_v60 = vmul.f32 1.442695, %v3868_v62 }
0x1bc8   : > { %5315 = vpow2.f32 %v3873_v24  ;;  %5104 = vmatpush3.bf16.msra.mxu0 %v5103_v25 }
0x1bc9   : > { %5317 = vpow2.f32 %v3875_v60 }
0x1bd0   : > { %v5312_v15 = vpop.eup %5311 }
0x1bd1   : > { %v5314_v12 = vpop.eup %5313  ;;  %v3827_v14 = vmul.f32 1.0614054, %v5312_v15 }
0x1bd2   : > { %v3828_v13 = vmul.f32 1.0614054, %v5314_v12  ;;  %v5316_v30 = vpop.eup %5315 }
0x1bd3   : > { %v3831_v23 = vadd.f32 -1.4531521, %v3827_v14  ;;  %v5318_v40 = vpop.eup %5317 }
0x1bd4   : > { %v3832_v57 = vadd.f32 -1.4531521, %v3828_v13 }
0x1bd5   : > { %v3835_v22 = vmul.f32 %v5312_v15, %v3831_v23 }
0x1bd6   : > { %v3836_v2 = vmul.f32 %v5314_v12, %v3832_v57 }
0x1bd7   : > { %v3839_v38 = vadd.f32 1.4214138, %v3835_v22 }
0x1bd8   : > { %v3840_v54 = vadd.f32 1.4214138, %v3836_v2 }
0x1bd9   : > { %v3843_v26 = vmul.f32 %v5312_v15, %v3839_v38 }
0x1bda   : > { %v3844_v20 = vmul.f32 %v5314_v12, %v3840_v54 }
0x1bdb   : > { %v3847_v27 = vadd.f32 -0.28449672, %v3843_v26 }
0x1bdc   : > { %v3848_v41 = vadd.f32 -0.28449672, %v3844_v20 }
0x1bdd   : > { %v3851_v28 = vmul.f32 %v5312_v15, %v3847_v27 }
0x1bde   : > { %v3852_v16 = vmul.f32 %v5314_v12, %v3848_v41 }
0x1bdf   : > { %v3855_v18 = vadd.f32 0.2548296, %v3851_v28 }
0x1be0   : > { %v3856_v56 = vadd.f32 0.2548296, %v3852_v16 }
0x1be1   : > { %v3859_v43 = vmul.f32 %v5312_v15, %v3855_v18 }
0x1be2   : > { %v3860_v31 = vmul.f32 %v5314_v12, %v3856_v56 }
0x1be3   : > { %v3879_v32 = vmul.f32 %v5316_v30, %v3859_v43 }
0x1be4   : > { %v3880_v29 = vmul.f32 %v5318_v40, %v3860_v31 }
0x1be5   : > { %v3883_v53 = vsub.f32 1.0, %v3879_v32 }
0x1be6   : > { %v3884_v35 = vsub.f32 1.0, %v3880_v29 }
0x1be7   : > { %v3891_v6 = vsub.f32 0.0, %v3883_v53 }
0x1be8   : > { %v3892_v36 = vsub.f32 0.0, %v3884_v35 }
0x1be9   : > { %v3895_v50 = vsel %vm3887_vm10, %v3883_v53, %v3891_v6 }
0x1bea   : > { %v3896_v39 = vsel %vm3888_vm11, %v3884_v35, %v3892_v36  ;;  %v3899_v34 = vadd.f32 1.0, %v3895_v50 }
0x1beb   : > { %v3900_v44 = vadd.f32 1.0, %v3896_v39 }
0x1bec   : > { %v3903_v61 = vmul.f32 %v3899_v34, %v3803_v46 }
0x1bed   : > { %v3904_v48 = vmul.f32 %v3900_v44, %v3804_v59 }
0x1bef   : > { %4015 = vmatprep.mubr.f32.mxu1 %v3904_v48 }
0x1bf0   : > { %4016 = vmatmul.mubr.f32.gmra.mrb[28].mxu1 %v3903_v61 }
0x1c4c   : > { %v4130_v52 = vpop.f32.mrb[30].mxu0 }
0x1c4d   : > { %v4131_v63 = vadd.f32 %v4130_v52, %v4060_v49  ;;  %v4821_v1 = vpop.f32.mrb[31].mxu0 }
0x1c4f   : > { %5319 = vtanh.f32 %v4131_v63 }
0x1c59   : > { %v5320_v3 = vpop.eup %5319 }
0x1c5a   : > { %4839 = vmatmul.mubr.msk.f32.vlgmr.msra.gmra.mrb[32].mxu0 %vm632_vm0, %v5320_v3 }
0x1cc3   : > { %v4614_v0 = vpop.f32.mrb[28].mxu1 }
0x1cc4   : > { %v4615_v47 = vpop.f32.mrb[29].mxu1 }
0x1d2d   : > { %v4213_v33 = vpop.f32.mrb[32].mxu0 }
0x1d2e   : > { %v4214_v42 = vadd.f32 %v4213_v33, %v4143_v55  ;;  %v4840_v4 = vpop.f32.mrb[33].mxu0 }
0x1d30   : > { %4217 = vst [vmem:[%s625_s30] sm:$0x1] %v4214_v42 }
0x1d31 PF: > { %s30_s1 = sadd.s32 1, %s5328_s1  }
0x1d32   : > { %p27_p4 = scmp.ge.s32.totalorder %s30_s1, 4  }
0x1d34   :  { %29 = sbr.rel (!%p27_p4) target bundleno = 6 (0x6), region = 143 }

</bundles_post_ra>
